<compile_context>
chip_gen: v5e
topology: v5e:2x2
jax: 0.10.0
libtpu: 0.0.40
codegen_flags: <defaults>
</compile_context>

<pallas_src>
import functools

import jax
import jax.numpy as jnp
from jax.experimental import pallas as pl
from jax.experimental.pallas import tpu as pltpu


# ----------------------------------------------------------------------------
# Small helpers
# ----------------------------------------------------------------------------
def _round_up(x, m):
    return ((x + m - 1) // m) * m


def _largest_divisor(n, max_val, step=1):
    """Largest divisor of n that is <= max_val and a multiple of `step`."""
    start = min(n, max_val)
    start -= start % step
    for d in range(start, 0, -step):
        if n % d == 0:
            return d
    return n


# ----------------------------------------------------------------------------
# Pallas kernels
# ----------------------------------------------------------------------------
def _proj_kernel(x_ref, w_ref, b_ref, o_ref):
    """Gate pre-activations for a tile of rows: o = x @ W_ih^T + (b_ih+b_hh).

    x_ref: (Mt, F)   w_ref: (F, 4*Hp)   b_ref: (1, 4*Hp)   o_ref: (Mt, 4*Hp)
    """
    o_ref[...] = (jnp.dot(x_ref[...], w_ref[...],
                          preferred_element_type=jnp.float32)
                  + b_ref[...]).astype(o_ref.dtype)


def _lstm_steps(zx_ref, whh, h0, c0, out_ref=None):
    """Run Tt LSTM steps; only h @ W_hh^T is on the serial path.

    zx_ref : (Tt, Bp, 4*Hp)  precomputed x @ W_ih^T + bias for this time block
    whh    : (Hp, 4*Hp)      W_hh^T (loaded once, held in vregs/VMEM)
    h0, c0 : (Bp, Hp)        carried hidden / cell state
    out_ref: optional (Tt, Bp, Hp) ref — per-step hidden states are stored
             only when the sequence output is actually needed downstream.
    """
    Hp = h0.shape[1]
    Tt = zx_ref.shape[0]

    def step(t, carry):
        h, c = carry
        z = zx_ref[t] + jnp.dot(h, whh, preferred_element_type=jnp.float32)
        # 128-lane aligned gate slices (Hp is a multiple of 128).
        i_g = jax.nn.sigmoid(z[:, 0 * Hp:1 * Hp])
        f_g = jax.nn.sigmoid(z[:, 1 * Hp:2 * Hp])
        g_g = jnp.tanh(z[:, 2 * Hp:3 * Hp])
        o_g = jax.nn.sigmoid(z[:, 3 * Hp:4 * Hp])
        c = f_g * c + i_g * g_g
        h = o_g * jnp.tanh(c)
        if out_ref is not None:
            out_ref[t] = h.astype(out_ref.dtype)
        return h, c

    return jax.lax.fori_loop(0, Tt, step, (h0, c0), unroll=True)


def _lstm_seq_kernel(zx_ref, whh_ref, out_ref, h_ref, c_ref):
    """Intermediate LSTM layer: emits the full hidden sequence for this block.

    Grid axis 0 = time blocks (sequential recurrence, "arbitrary").
    """
    tb = pl.program_id(0)

    @pl.when(tb == 0)
    def _():
        h_ref[...] = jnp.zeros_like(h_ref)
        c_ref[...] = jnp.zeros_like(c_ref)

    h, c = _lstm_steps(zx_ref, whh_ref[...], h_ref[...], c_ref[...], out_ref)
    h_ref[...] = h
    c_ref[...] = c


def _lstm_fc_kernel(zx_ref, whh_ref, wfc_ref, bfc_ref, out_ref, h_ref, c_ref):
    """Final LSTM layer with the FC head fused: only fc(h_T) is written out,
    the (T,B,H) sequence never round-trips HBM."""
    tb = pl.program_id(0)

    @pl.when(tb == 0)
    def _():
        h_ref[...] = jnp.zeros_like(h_ref)
        c_ref[...] = jnp.zeros_like(c_ref)
        out_ref[...] = jnp.zeros_like(out_ref)

    h, c = _lstm_steps(zx_ref, whh_ref[...], h_ref[...], c_ref[...], None)
    h_ref[...] = h
    c_ref[...] = c

    @pl.when(tb == pl.num_programs(0) - 1)
    def _():
        out_ref[...] = (jnp.dot(h, wfc_ref[...],
                                preferred_element_type=jnp.float32)
                        + bfc_ref[...]).astype(out_ref.dtype)


# ----------------------------------------------------------------------------
# pallas_call wrappers
# ----------------------------------------------------------------------------
def input_projection(x_2d, w_ih_t, b_comb):
    """(T*Bp, F) @ (F, 4Hp) + b — one big parallel matmul for all timesteps."""
    M, F = x_2d.shape
    N = w_ih_t.shape[1]
    Mt = _largest_divisor(M, 512, step=8) if M % 8 == 0 else M
    return pl.pallas_call(
        _proj_kernel,
        out_shape=jax.ShapeDtypeStruct((M, N), jnp.float32),
        grid_spec=pltpu.PrefetchScalarGridSpec(
            num_scalar_prefetch=0,
            grid=(M // Mt,),
            in_specs=[
                pl.BlockSpec((Mt, F), lambda i: (i, 0)),
                pl.BlockSpec((F, N), lambda i: (0, 0)),
                pl.BlockSpec((1, N), lambda i: (0, 0)),
            ],
            out_specs=pl.BlockSpec((Mt, N), lambda i: (i, 0)),
        ),
        compiler_params=pltpu.CompilerParams(
            dimension_semantics=("parallel",)),
    )(x_2d, w_ih_t, b_comb)


def lstm_layer_seq(zx_tb4h, w_hh_t):
    """zx: (T, Bp, 4Hp) precomputed gate pre-activations. Returns (T, Bp, Hp)."""
    T, Bp, N4 = zx_tb4h.shape
    Hp = w_hh_t.shape[0]
    Tt = _largest_divisor(T, 32)
    return pl.pallas_call(
        _lstm_seq_kernel,
        out_shape=jax.ShapeDtypeStruct((T, Bp, Hp), jnp.float32),
        grid_spec=pltpu.PrefetchScalarGridSpec(
            num_scalar_prefetch=0,
            grid=(T // Tt,),
            in_specs=[
                pl.BlockSpec((Tt, Bp, N4), lambda tb: (tb, 0, 0)),
                # Constant-index weight block: fetched once across the grid.
                pl.BlockSpec((Hp, N4), lambda tb: (0, 0)),
            ],
            out_specs=pl.BlockSpec((Tt, Bp, Hp), lambda tb: (tb, 0, 0)),
            scratch_shapes=[
                pltpu.VMEM((Bp, Hp), jnp.float32),   # h carried across blocks
                pltpu.VMEM((Bp, Hp), jnp.float32),   # c carried across blocks
            ],
        ),
        compiler_params=pltpu.CompilerParams(
            dimension_semantics=("arbitrary",)),      # true time recurrence
    )(zx_tb4h, w_hh_t)


def lstm_layer_fc(zx_tb4h, w_hh_t, fc_w_t, fc_b):
    """Last layer + fused FC head. Returns (Bp, Op) = fc(h_{T-1})."""
    T, Bp, N4 = zx_tb4h.shape
    Hp = w_hh_t.shape[0]
    Op = fc_w_t.shape[1]
    Tt = _largest_divisor(T, 32)
    return pl.pallas_call(
        _lstm_fc_kernel,
        out_shape=jax.ShapeDtypeStruct((Bp, Op), jnp.float32),
        grid_spec=pltpu.PrefetchScalarGridSpec(
            num_scalar_prefetch=0,
            grid=(T // Tt,),
            in_specs=[
                pl.BlockSpec((Tt, Bp, N4), lambda tb: (tb, 0, 0)),
                pl.BlockSpec((Hp, N4), lambda tb: (0, 0)),
                pl.BlockSpec((Hp, Op), lambda tb: (0, 0)),
                pl.BlockSpec((1, Op), lambda tb: (0, 0)),
            ],
            out_specs=pl.BlockSpec((Bp, Op), lambda tb: (0, 0)),
            scratch_shapes=[
                pltpu.VMEM((Bp, Hp), jnp.float32),
                pltpu.VMEM((Bp, Hp), jnp.float32),
            ],
        ),
        compiler_params=pltpu.CompilerParams(
            dimension_semantics=("arbitrary",)),
    )(zx_tb4h, w_hh_t, fc_w_t, fc_b)


# ----------------------------------------------------------------------------
# Forward pass (matches LSTM.forward: out, _ = lstm(x); fc(out[:, -1, :]))
# ----------------------------------------------------------------------------
@functools.partial(jax.jit, static_argnames=("out_dim",))
def lstm_forward(x_btf, params, *, out_dim):
    B, T, IN = x_btf.shape
    layers = params["layers"]
    INp = layers[0][0].shape[0]
    Bp = _round_up(B, 8)

    # batch-first -> time-major; zero-pad batch (sublanes) and features (lanes)
    h_seq = jnp.transpose(x_btf, (1, 0, 2)).astype(jnp.float32)   # (T, B, IN)
    h_seq = jnp.pad(h_seq, ((0, 0), (0, Bp - B), (0, INp - IN)))  # (T, Bp, INp)

    n_layers = len(layers)
    out_p = None
    for li, (w_ih_t, w_hh_t, b_comb) in enumerate(layers):
        Fin = w_ih_t.shape[0]
        N4 = w_ih_t.shape[1]
        # Hoisted input projection for ALL timesteps of this layer.
        zx = input_projection(h_seq.reshape(T * Bp, Fin), w_ih_t, b_comb)
        zx = zx.reshape(T, Bp, N4)
        if li < n_layers - 1:
            h_seq = lstm_layer_seq(zx, w_hh_t)                    # (T, Bp, Hp)
        else:
            out_p = lstm_layer_fc(zx, w_hh_t,
                                  params["fc_w_t"], params["fc_b"])  # (Bp, Op)
    return out_p[:B, :out_dim]


# ----------------------------------------------------------------------------
# Parameter init (raw PyTorch layout) and padded/transposed preparation
# ----------------------------------------------------------------------------
def init_raw_params(key, input_size, hidden_size, output_size, num_layers):
    bound = 1.0 / float(hidden_size) ** 0.5
    layers = []
    for layer in range(num_layers):
        in_sz = input_size if layer == 0 else hidden_size
        key, k1, k2, k3, k4 = jax.random.split(key, 5)
        w_ih = jax.random.uniform(k1, (4 * hidden_size, in_sz),
                                  jnp.float32, -bound, bound)
        w_hh = jax.random.uniform(k2, (4 * hidden_size, hidden_size),
                                  jnp.float32, -bound, bound)
        b_ih = jax.random.uniform(k3, (4 * hidden_size,), jnp.float32, -bound, bound)
        b_hh = jax.random.uniform(k4, (4 * hidden_size,), jnp.float32, -bound, bound)
        layers.append((w_ih, w_hh, b_ih, b_hh))
    key, k5, k6 = jax.random.split(key, 3)
    fc_w = jax.random.uniform(k5, (output_size, hidden_size),
                              jnp.float32, -bound, bound)
    fc_b = jax.random.uniform(k6, (output_size,), jnp.float32, -bound, bound)
    return {"layers": layers, "fc_w": fc_w, "fc_b": fc_b}


def _pad_gate_matrix(w, Hp, f_pad):
    """PyTorch (4H, F) [i,f,g,o] -> transposed, padded (Fp, 4*Hp);
    each gate block starts on a 128-lane boundary, pads are zero."""
    fourH, F = w.shape
    H = fourH // 4
    w4 = w.reshape(4, H, F)
    w4 = jnp.pad(w4, ((0, 0), (0, Hp - H), (0, f_pad - F)))
    return jnp.transpose(w4, (2, 0, 1)).reshape(f_pad, 4 * Hp)


def _pad_gate_bias(b, Hp):
    H = b.shape[0] // 4
    b4 = jnp.pad(b.reshape(4, H), ((0, 0), (0, Hp - H)))
    return b4.reshape(1, 4 * Hp)


def prepare_params(raw, input_size, hidden_size, output_size):
    Hp = _round_up(hidden_size, 128)
    INp = _round_up(input_size, 128)
    Op = _round_up(output_size, 128)
    layers = []
    for li, (w_ih, w_hh, b_ih, b_hh) in enumerate(raw["layers"]):
        f_pad = INp if li == 0 else Hp
        layers.append((_pad_gate_matrix(w_ih, Hp, f_pad),
                       _pad_gate_matrix(w_hh, Hp, Hp),
                       _pad_gate_bias(b_ih + b_hh, Hp)))
    fc_w_t = jnp.pad(raw["fc_w"],
                     ((0, Op - output_size), (0, Hp - hidden_size))).T  # (Hp, Op)
    fc_b = jnp.pad(raw["fc_b"], ((0, Op - output_size),))[None, :]      # (1, Op)
    return {"layers": layers, "fc_w_t": fc_w_t, "fc_b": fc_b}


# ----------------------------------------------------------------------------
# Pure-JAX reference (unpadded) for correctness check
# ----------------------------------------------------------------------------
def reference_forward(x_btf, raw):
    h_seq = jnp.transpose(x_btf, (1, 0, 2)).astype(jnp.float32)
    for (w_ih, w_hh, b_ih, b_hh) in raw["layers"]:
        T, B, _ = h_seq.shape
        H = w_hh.shape[1]
        h = jnp.zeros((B, H), jnp.float32)
        c = jnp.zeros((B, H), jnp.float32)
        outs = []
        for t in range(T):
            z = h_seq[t] @ w_ih.T + h @ w_hh.T + b_ih + b_hh
            i_g = jax.nn.sigmoid(z[:, 0:H])
            f_g = jax.nn.sigmoid(z[:, H:2 * H])
            g_g = jnp.tanh(z[:, 2 * H:3 * H])
            o_g = jax.nn.sigmoid(z[:, 3 * H:4 * H])
            c = f_g * c + i_g * g_g
            h = o_g * jnp.tanh(c)
            outs.append(h)
        h_seq = jnp.stack(outs, axis=0)
    return h_seq[-1] @ raw["fc_w"].T + raw["fc_b"]


# ----------------------------------------------------------------------------
if __name__ == "__main__":
    # Small shapes consistent with the module: x is (batch, seq, input_size)
    batch, seq_len = 2, 8
    input_size, hidden_size, output_size, num_layers = 8, 32, 4, 2

    key = jax.random.PRNGKey(0)
    key, kx, kp = jax.random.split(key, 3)
    x = jax.random.normal(kx, (batch, seq_len, input_size), jnp.float32)

    raw = init_raw_params(kp, input_size, hidden_size, output_size, num_layers)
    params = prepare_params(raw, input_size, hidden_size, output_size)

    out = lstm_forward(x, params, out_dim=output_size)
    out = jax.block_until_ready(out)

    ref = reference_forward(x, raw)
    assert out.shape == (batch, output_size)
    assert jnp.allclose(out, ref, atol=1e-4, rtol=1e-4), "mismatch vs reference"

    print("KERNEL_OK")
</pallas_src>

<mosaic_0001>
module attributes {stable_mosaic.version = 11 : i64} {
  func.func @_lstm_seq_kernel(%arg0: i32, %arg1: memref<8x8x512xf32, #tpu.memory_space<vmem>>, %arg2: memref<128x512xf32, #tpu.memory_space<vmem>>, %arg3: memref<8x8x128xf32, #tpu.memory_space<vmem>>, %arg4: memref<8x128xf32, #tpu.memory_space<vmem>>, %arg5: memref<8x128xf32, #tpu.memory_space<vmem>>) attributes {dimension_semantics = [#tpu.dimension_semantics<arbitrary>], iteration_bounds = array<i64: 1>, scalar_prefetch = 0 : i64, scratch_operands = 2 : i64, tpu.core_type = #tpu.core_type<tc>, window_params = [{transform_indices = @transform_0, window_bounds = array<i64: 8, 8, 512>}, {pipeline_mode = #tpu.pipeline_mode<synchronous>, transform_indices = @transform_1, window_bounds = array<i64: 128, 512>}, {transform_indices = @transform_2, window_bounds = array<i64: 8, 8, 128>}]} {
    %c0_i32 = arith.constant 0 : i32
    %0 = arith.cmpi eq, %arg0, %c0_i32 : i32
    %1 = arith.extui %0 : i1 to i32
    %c0_i32_0 = arith.constant 0 : i32
    %2 = arith.cmpi ne, %1, %c0_i32_0 : i32
    scf.if %2 {
      %cst_74 = arith.constant 0.000000e+00 : f32
      %280 = vector.broadcast %cst_74 : f32 to vector<8x128xf32>
      %c0_75 = arith.constant 0 : index
      %c0_76 = arith.constant 0 : index
      %281 = vector.load %arg4[%c0_75, %c0_76] : memref<8x128xf32, #tpu.memory_space<vmem>>, vector<8x128xf32>
      tpu.vector_store %arg4[%c0_75, %c0_76], %280 {strides = array<i32>} : memref<8x128xf32, #tpu.memory_space<vmem>>, vector<8x128xf32>,
      %cst_77 = arith.constant 0.000000e+00 : f32
      %282 = vector.broadcast %cst_77 : f32 to vector<8x128xf32>
      %c0_78 = arith.constant 0 : index
      %c0_79 = arith.constant 0 : index
      %283 = vector.load %arg5[%c0_78, %c0_79] : memref<8x128xf32, #tpu.memory_space<vmem>>, vector<8x128xf32>
      tpu.vector_store %arg5[%c0_78, %c0_79], %282 {strides = array<i32>} : memref<8x128xf32, #tpu.memory_space<vmem>>, vector<8x128xf32>,
    } else {
    }
    %c0 = arith.constant 0 : index
    %c0_1 = arith.constant 0 : index
    %3 = vector.load %arg2[%c0, %c0_1] : memref<128x512xf32, #tpu.memory_space<vmem>>, vector<128x512xf32>
    %c0_2 = arith.constant 0 : index
    %c0_3 = arith.constant 0 : index
    %4 = vector.load %arg4[%c0_2, %c0_3] : memref<8x128xf32, #tpu.memory_space<vmem>>, vector<8x128xf32>
    %c0_4 = arith.constant 0 : index
    %c0_5 = arith.constant 0 : index
    %5 = vector.load %arg5[%c0_4, %c0_5] : memref<8x128xf32, #tpu.memory_space<vmem>>, vector<8x128xf32>
    %c0_i32_6 = arith.constant 0 : i32
    %6 = arith.index_cast %c0_i32_6 : i32 to index
    %c0_7 = arith.constant 0 : index
    %c0_8 = arith.constant 0 : index
    %7 = vector.load %arg1[%6, %c0_7, %c0_8] : memref<8x8x512xf32, #tpu.memory_space<vmem>>, vector<1x8x512xf32>
    %8 = vector.shape_cast %7 : vector<1x8x512xf32> to vector<8x512xf32>
    %cst = arith.constant dense<0.000000e+00> : vector<8x512xf32>
    %9 = tpu.matmul %4, %3, %cst {dimension_numbers = #tpu.dot_dimension_numbers<[1], [0], [0], [1], [0, 0, 1, 1], [], []>} : vector<8x128xf32>, vector<128x512xf32>, vector<8x512xf32> -> vector<8x512xf32>
    %10 = arith.addf %8, %9 : vector<8x512xf32>
    %11 = vector.extract_strided_slice %10 {offsets = [0, 0], sizes = [8, 128], strides = [1, 1]} : vector<8x512xf32> to vector<8x128xf32>
    %12 = arith.negf %11 : vector<8x128xf32>
    %13 = math.exp %12 : vector<8x128xf32>
    %cst_9 = arith.constant 1.000000e+00 : f32
    %14 = vector.broadcast %cst_9 : f32 to vector<8x128xf32>
    %15 = arith.addf %14, %13 : vector<8x128xf32>
    %16 = arith.divf %14, %15 : vector<8x128xf32>
    %17 = vector.extract_strided_slice %10 {offsets = [0, 128], sizes = [8, 128], strides = [1, 1]} : vector<8x512xf32> to vector<8x128xf32>
    %18 = arith.negf %17 : vector<8x128xf32>
    %19 = math.exp %18 : vector<8x128xf32>
    %cst_10 = arith.constant 1.000000e+00 : f32
    %20 = vector.broadcast %cst_10 : f32 to vector<8x128xf32>
    %21 = arith.addf %20, %19 : vector<8x128xf32>
    %22 = arith.divf %20, %21 : vector<8x128xf32>
    %23 = vector.extract_strided_slice %10 {offsets = [0, 256], sizes = [8, 128], strides = [1, 1]} : vector<8x512xf32> to vector<8x128xf32>
    %24 = math.tanh %23 : vector<8x128xf32>
    %25 = vector.extract_strided_slice %10 {offsets = [0, 384], sizes = [8, 128], strides = [1, 1]} : vector<8x512xf32> to vector<8x128xf32>
    %26 = arith.negf %25 : vector<8x128xf32>
    %27 = math.exp %26 : vector<8x128xf32>
    %cst_11 = arith.constant 1.000000e+00 : f32
    %28 = vector.broadcast %cst_11 : f32 to vector<8x128xf32>
    %29 = arith.addf %28, %27 : vector<8x128xf32>
    %30 = arith.divf %28, %29 : vector<8x128xf32>
    %31 = arith.mulf %22, %5 : vector<8x128xf32>
    %32 = arith.mulf %16, %24 : vector<8x128xf32>
    %33 = arith.addf %31, %32 : vector<8x128xf32>
    %34 = math.tanh %33 : vector<8x128xf32>
    %35 = arith.mulf %30, %34 : vector<8x128xf32>
    %36 = arith.index_cast %c0_i32_6 : i32 to index
    %c0_12 = arith.constant 0 : index
    %c0_13 = arith.constant 0 : index
    %37 = vector.load %arg3[%36, %c0_12, %c0_13] : memref<8x8x128xf32, #tpu.memory_space<vmem>>, vector<1x8x128xf32>
    %38 = vector.shape_cast %37 : vector<1x8x128xf32> to vector<8x128xf32>
    %39 = vector.shape_cast %35 : vector<8x128xf32> to vector<1x8x128xf32>
    tpu.vector_store %arg3[%36, %c0_12, %c0_13], %39 {strides = array<i32>} : memref<8x8x128xf32, #tpu.memory_space<vmem>>, vector<1x8x128xf32>,
    %c1_i32 = arith.constant 1 : i32
    %40 = arith.index_cast %c1_i32 : i32 to index
    %c0_14 = arith.constant 0 : index
    %c0_15 = arith.constant 0 : index
    %41 = vector.load %arg1[%40, %c0_14, %c0_15] : memref<8x8x512xf32, #tpu.memory_space<vmem>>, vector<1x8x512xf32>
    %42 = vector.shape_cast %41 : vector<1x8x512xf32> to vector<8x512xf32>
    %cst_16 = arith.constant dense<0.000000e+00> : vector<8x512xf32>
    %43 = tpu.matmul %35, %3, %cst_16 {dimension_numbers = #tpu.dot_dimension_numbers<[1], [0], [0], [1], [0, 0, 1, 1], [], []>} : vector<8x128xf32>, vector<128x512xf32>, vector<8x512xf32> -> vector<8x512xf32>
    %44 = arith.addf %42, %43 : vector<8x512xf32>
    %45 = vector.extract_strided_slice %44 {offsets = [0, 0], sizes = [8, 128], strides = [1, 1]} : vector<8x512xf32> to vector<8x128xf32>
    %46 = arith.negf %45 : vector<8x128xf32>
    %47 = math.exp %46 : vector<8x128xf32>
    %cst_17 = arith.constant 1.000000e+00 : f32
    %48 = vector.broadcast %cst_17 : f32 to vector<8x128xf32>
    %49 = arith.addf %48, %47 : vector<8x128xf32>
    %50 = arith.divf %48, %49 : vector<8x128xf32>
    %51 = vector.extract_strided_slice %44 {offsets = [0, 128], sizes = [8, 128], strides = [1, 1]} : vector<8x512xf32> to vector<8x128xf32>
    %52 = arith.negf %51 : vector<8x128xf32>
    %53 = math.exp %52 : vector<8x128xf32>
    %cst_18 = arith.constant 1.000000e+00 : f32
    %54 = vector.broadcast %cst_18 : f32 to vector<8x128xf32>
    %55 = arith.addf %54, %53 : vector<8x128xf32>
    %56 = arith.divf %54, %55 : vector<8x128xf32>
    %57 = vector.extract_strided_slice %44 {offsets = [0, 256], sizes = [8, 128], strides = [1, 1]} : vector<8x512xf32> to vector<8x128xf32>
    %58 = math.tanh %57 : vector<8x128xf32>
    %59 = vector.extract_strided_slice %44 {offsets = [0, 384], sizes = [8, 128], strides = [1, 1]} : vector<8x512xf32> to vector<8x128xf32>
    %60 = arith.negf %59 : vector<8x128xf32>
    %61 = math.exp %60 : vector<8x128xf32>
    %cst_19 = arith.constant 1.000000e+00 : f32
    %62 = vector.broadcast %cst_19 : f32 to vector<8x128xf32>
    %63 = arith.addf %62, %61 : vector<8x128xf32>
    %64 = arith.divf %62, %63 : vector<8x128xf32>
    %65 = arith.mulf %56, %33 : vector<8x128xf32>
    %66 = arith.mulf %50, %58 : vector<8x128xf32>
    %67 = arith.addf %65, %66 : vector<8x128xf32>
    %68 = math.tanh %67 : vector<8x128xf32>
    %69 = arith.mulf %64, %68 : vector<8x128xf32>
    %70 = arith.index_cast %c1_i32 : i32 to index
    %c0_20 = arith.constant 0 : index
    %c0_21 = arith.constant 0 : index
    %71 = vector.load %arg3[%70, %c0_20, %c0_21] : memref<8x8x128xf32, #tpu.memory_space<vmem>>, vector<1x8x128xf32>
    %72 = vector.shape_cast %71 : vector<1x8x128xf32> to vector<8x128xf32>
    %73 = vector.shape_cast %69 : vector<8x128xf32> to vector<1x8x128xf32>
    tpu.vector_store %arg3[%70, %c0_20, %c0_21], %73 {strides = array<i32>} : memref<8x8x128xf32, #tpu.memory_space<vmem>>, vector<1x8x128xf32>,
    %c2_i32 = arith.constant 2 : i32
    %74 = arith.index_cast %c2_i32 : i32 to index
    %c0_22 = arith.constant 0 : index
    %c0_23 = arith.constant 0 : index
    %75 = vector.load %arg1[%74, %c0_22, %c0_23] : memref<8x8x512xf32, #tpu.memory_space<vmem>>, vector<1x8x512xf32>
    %76 = vector.shape_cast %75 : vector<1x8x512xf32> to vector<8x512xf32>
    %cst_24 = arith.constant dense<0.000000e+00> : vector<8x512xf32>
    %77 = tpu.matmul %69, %3, %cst_24 {dimension_numbers = #tpu.dot_dimension_numbers<[1], [0], [0], [1], [0, 0, 1, 1], [], []>} : vector<8x128xf32>, vector<128x512xf32>, vector<8x512xf32> -> vector<8x512xf32>
    %78 = arith.addf %76, %77 : vector<8x512xf32>
    %79 = vector.extract_strided_slice %78 {offsets = [0, 0], sizes = [8, 128], strides = [1, 1]} : vector<8x512xf32> to vector<8x128xf32>
    %80 = arith.negf %79 : vector<8x128xf32>
    %81 = math.exp %80 : vector<8x128xf32>
    %cst_25 = arith.constant 1.000000e+00 : f32
    %82 = vector.broadcast %cst_25 : f32 to vector<8x128xf32>
    %83 = arith.addf %82, %81 : vector<8x128xf32>
    %84 = arith.divf %82, %83 : vector<8x128xf32>
    %85 = vector.extract_strided_slice %78 {offsets = [0, 128], sizes = [8, 128], strides = [1, 1]} : vector<8x512xf32> to vector<8x128xf32>
    %86 = arith.negf %85 : vector<8x128xf32>
    %87 = math.exp %86 : vector<8x128xf32>
    %cst_26 = arith.constant 1.000000e+00 : f32
    %88 = vector.broadcast %cst_26 : f32 to vector<8x128xf32>
    %89 = arith.addf %88, %87 : vector<8x128xf32>
    %90 = arith.divf %88, %89 : vector<8x128xf32>
    %91 = vector.extract_strided_slice %78 {offsets = [0, 256], sizes = [8, 128], strides = [1, 1]} : vector<8x512xf32> to vector<8x128xf32>
    %92 = math.tanh %91 : vector<8x128xf32>
    %93 = vector.extract_strided_slice %78 {offsets = [0, 384], sizes = [8, 128], strides = [1, 1]} : vector<8x512xf32> to vector<8x128xf32>
    %94 = arith.negf %93 : vector<8x128xf32>
    %95 = math.exp %94 : vector<8x128xf32>
    %cst_27 = arith.constant 1.000000e+00 : f32
    %96 = vector.broadcast %cst_27 : f32 to vector<8x128xf32>
    %97 = arith.addf %96, %95 : vector<8x128xf32>
    %98 = arith.divf %96, %97 : vector<8x128xf32>
    %99 = arith.mulf %90, %67 : vector<8x128xf32>
    %100 = arith.mulf %84, %92 : vector<8x128xf32>
    %101 = arith.addf %99, %100 : vector<8x128xf32>
    %102 = math.tanh %101 : vector<8x128xf32>
    %103 = arith.mulf %98, %102 : vector<8x128xf32>
    %104 = arith.index_cast %c2_i32 : i32 to index
    %c0_28 = arith.constant 0 : index
    %c0_29 = arith.constant 0 : index
    %105 = vector.load %arg3[%104, %c0_28, %c0_29] : memref<8x8x128xf32, #tpu.memory_space<vmem>>, vector<1x8x128xf32>
    %106 = vector.shape_cast %105 : vector<1x8x128xf32> to vector<8x128xf32>
    %107 = vector.shape_cast %103 : vector<8x128xf32> to vector<1x8x128xf32>
    tpu.vector_store %arg3[%104, %c0_28, %c0_29], %107 {strides = array<i32>} : memref<8x8x128xf32, #tpu.memory_space<vmem>>, vector<1x8x128xf32>,
    %c3_i32 = arith.constant 3 : i32
    %108 = arith.index_cast %c3_i32 : i32 to index
    %c0_30 = arith.constant 0 : index
    %c0_31 = arith.constant 0 : index
    %109 = vector.load %arg1[%108, %c0_30, %c0_31] : memref<8x8x512xf32, #tpu.memory_space<vmem>>, vector<1x8x512xf32>
    %110 = vector.shape_cast %109 : vector<1x8x512xf32> to vector<8x512xf32>
    %cst_32 = arith.constant dense<0.000000e+00> : vector<8x512xf32>
    %111 = tpu.matmul %103, %3, %cst_32 {dimension_numbers = #tpu.dot_dimension_numbers<[1], [0], [0], [1], [0, 0, 1, 1], [], []>} : vector<8x128xf32>, vector<128x512xf32>, vector<8x512xf32> -> vector<8x512xf32>
    %112 = arith.addf %110, %111 : vector<8x512xf32>
    %113 = vector.extract_strided_slice %112 {offsets = [0, 0], sizes = [8, 128], strides = [1, 1]} : vector<8x512xf32> to vector<8x128xf32>
    %114 = arith.negf %113 : vector<8x128xf32>
    %115 = math.exp %114 : vector<8x128xf32>
    %cst_33 = arith.constant 1.000000e+00 : f32
    %116 = vector.broadcast %cst_33 : f32 to vector<8x128xf32>
    %117 = arith.addf %116, %115 : vector<8x128xf32>
    %118 = arith.divf %116, %117 : vector<8x128xf32>
    %119 = vector.extract_strided_slice %112 {offsets = [0, 128], sizes = [8, 128], strides = [1, 1]} : vector<8x512xf32> to vector<8x128xf32>
    %120 = arith.negf %119 : vector<8x128xf32>
    %121 = math.exp %120 : vector<8x128xf32>
    %cst_34 = arith.constant 1.000000e+00 : f32
    %122 = vector.broadcast %cst_34 : f32 to vector<8x128xf32>
    %123 = arith.addf %122, %121 : vector<8x128xf32>
    %124 = arith.divf %122, %123 : vector<8x128xf32>
    %125 = vector.extract_strided_slice %112 {offsets = [0, 256], sizes = [8, 128], strides = [1, 1]} : vector<8x512xf32> to vector<8x128xf32>
    %126 = math.tanh %125 : vector<8x128xf32>
    %127 = vector.extract_strided_slice %112 {offsets = [0, 384], sizes = [8, 128], strides = [1, 1]} : vector<8x512xf32> to vector<8x128xf32>
    %128 = arith.negf %127 : vector<8x128xf32>
    %129 = math.exp %128 : vector<8x128xf32>
    %cst_35 = arith.constant 1.000000e+00 : f32
    %130 = vector.broadcast %cst_35 : f32 to vector<8x128xf32>
    %131 = arith.addf %130, %129 : vector<8x128xf32>
    %132 = arith.divf %130, %131 : vector<8x128xf32>
    %133 = arith.mulf %124, %101 : vector<8x128xf32>
    %134 = arith.mulf %118, %126 : vector<8x128xf32>
    %135 = arith.addf %133, %134 : vector<8x128xf32>
    %136 = math.tanh %135 : vector<8x128xf32>
    %137 = arith.mulf %132, %136 : vector<8x128xf32>
    %138 = arith.index_cast %c3_i32 : i32 to index
    %c0_36 = arith.constant 0 : index
    %c0_37 = arith.constant 0 : index
    %139 = vector.load %arg3[%138, %c0_36, %c0_37] : memref<8x8x128xf32, #tpu.memory_space<vmem>>, vector<1x8x128xf32>
    %140 = vector.shape_cast %139 : vector<1x8x128xf32> to vector<8x128xf32>
    %141 = vector.shape_cast %137 : vector<8x128xf32> to vector<1x8x128xf32>
    tpu.vector_store %arg3[%138, %c0_36, %c0_37], %141 {strides = array<i32>} : memref<8x8x128xf32, #tpu.memory_space<vmem>>, vector<1x8x128xf32>,
    %c4_i32 = arith.constant 4 : i32
    %142 = arith.index_cast %c4_i32 : i32 to index
    %c0_38 = arith.constant 0 : index
    %c0_39 = arith.constant 0 : index
    %143 = vector.load %arg1[%142, %c0_38, %c0_39] : memref<8x8x512xf32, #tpu.memory_space<vmem>>, vector<1x8x512xf32>
    %144 = vector.shape_cast %143 : vector<1x8x512xf32> to vector<8x512xf32>
    %cst_40 = arith.constant dense<0.000000e+00> : vector<8x512xf32>
    %145 = tpu.matmul %137, %3, %cst_40 {dimension_numbers = #tpu.dot_dimension_numbers<[1], [0], [0], [1], [0, 0, 1, 1], [], []>} : vector<8x128xf32>, vector<128x512xf32>, vector<8x512xf32> -> vector<8x512xf32>
    %146 = arith.addf %144, %145 : vector<8x512xf32>
    %147 = vector.extract_strided_slice %146 {offsets = [0, 0], sizes = [8, 128], strides = [1, 1]} : vector<8x512xf32> to vector<8x128xf32>
    %148 = arith.negf %147 : vector<8x128xf32>
    %149 = math.exp %148 : vector<8x128xf32>
    %cst_41 = arith.constant 1.000000e+00 : f32
    %150 = vector.broadcast %cst_41 : f32 to vector<8x128xf32>
    %151 = arith.addf %150, %149 : vector<8x128xf32>
    %152 = arith.divf %150, %151 : vector<8x128xf32>
    %153 = vector.extract_strided_slice %146 {offsets = [0, 128], sizes = [8, 128], strides = [1, 1]} : vector<8x512xf32> to vector<8x128xf32>
    %154 = arith.negf %153 : vector<8x128xf32>
    %155 = math.exp %154 : vector<8x128xf32>
    %cst_42 = arith.constant 1.000000e+00 : f32
    %156 = vector.broadcast %cst_42 : f32 to vector<8x128xf32>
    %157 = arith.addf %156, %155 : vector<8x128xf32>
    %158 = arith.divf %156, %157 : vector<8x128xf32>
    %159 = vector.extract_strided_slice %146 {offsets = [0, 256], sizes = [8, 128], strides = [1, 1]} : vector<8x512xf32> to vector<8x128xf32>
    %160 = math.tanh %159 : vector<8x128xf32>
    %161 = vector.extract_strided_slice %146 {offsets = [0, 384], sizes = [8, 128], strides = [1, 1]} : vector<8x512xf32> to vector<8x128xf32>
    %162 = arith.negf %161 : vector<8x128xf32>
    %163 = math.exp %162 : vector<8x128xf32>
    %cst_43 = arith.constant 1.000000e+00 : f32
    %164 = vector.broadcast %cst_43 : f32 to vector<8x128xf32>
    %165 = arith.addf %164, %163 : vector<8x128xf32>
    %166 = arith.divf %164, %165 : vector<8x128xf32>
    %167 = arith.mulf %158, %135 : vector<8x128xf32>
    %168 = arith.mulf %152, %160 : vector<8x128xf32>
    %169 = arith.addf %167, %168 : vector<8x128xf32>
    %170 = math.tanh %169 : vector<8x128xf32>
    %171 = arith.mulf %166, %170 : vector<8x128xf32>
    %172 = arith.index_cast %c4_i32 : i32 to index
    %c0_44 = arith.constant 0 : index
    %c0_45 = arith.constant 0 : index
    %173 = vector.load %arg3[%172, %c0_44, %c0_45] : memref<8x8x128xf32, #tpu.memory_space<vmem>>, vector<1x8x128xf32>
    %174 = vector.shape_cast %173 : vector<1x8x128xf32> to vector<8x128xf32>
    %175 = vector.shape_cast %171 : vector<8x128xf32> to vector<1x8x128xf32>
    tpu.vector_store %arg3[%172, %c0_44, %c0_45], %175 {strides = array<i32>} : memref<8x8x128xf32, #tpu.memory_space<vmem>>, vector<1x8x128xf32>,
    %c5_i32 = arith.constant 5 : i32
    %176 = arith.index_cast %c5_i32 : i32 to index
    %c0_46 = arith.constant 0 : index
    %c0_47 = arith.constant 0 : index
    %177 = vector.load %arg1[%176, %c0_46, %c0_47] : memref<8x8x512xf32, #tpu.memory_space<vmem>>, vector<1x8x512xf32>
    %178 = vector.shape_cast %177 : vector<1x8x512xf32> to vector<8x512xf32>
    %cst_48 = arith.constant dense<0.000000e+00> : vector<8x512xf32>
    %179 = tpu.matmul %171, %3, %cst_48 {dimension_numbers = #tpu.dot_dimension_numbers<[1], [0], [0], [1], [0, 0, 1, 1], [], []>} : vector<8x128xf32>, vector<128x512xf32>, vector<8x512xf32> -> vector<8x512xf32>
    %180 = arith.addf %178, %179 : vector<8x512xf32>
    %181 = vector.extract_strided_slice %180 {offsets = [0, 0], sizes = [8, 128], strides = [1, 1]} : vector<8x512xf32> to vector<8x128xf32>
    %182 = arith.negf %181 : vector<8x128xf32>
    %183 = math.exp %182 : vector<8x128xf32>
    %cst_49 = arith.constant 1.000000e+00 : f32
    %184 = vector.broadcast %cst_49 : f32 to vector<8x128xf32>
    %185 = arith.addf %184, %183 : vector<8x128xf32>
    %186 = arith.divf %184, %185 : vector<8x128xf32>
    %187 = vector.extract_strided_slice %180 {offsets = [0, 128], sizes = [8, 128], strides = [1, 1]} : vector<8x512xf32> to vector<8x128xf32>
    %188 = arith.negf %187 : vector<8x128xf32>
    %189 = math.exp %188 : vector<8x128xf32>
    %cst_50 = arith.constant 1.000000e+00 : f32
    %190 = vector.broadcast %cst_50 : f32 to vector<8x128xf32>
    %191 = arith.addf %190, %189 : vector<8x128xf32>
    %192 = arith.divf %190, %191 : vector<8x128xf32>
    %193 = vector.extract_strided_slice %180 {offsets = [0, 256], sizes = [8, 128], strides = [1, 1]} : vector<8x512xf32> to vector<8x128xf32>
    %194 = math.tanh %193 : vector<8x128xf32>
    %195 = vector.extract_strided_slice %180 {offsets = [0, 384], sizes = [8, 128], strides = [1, 1]} : vector<8x512xf32> to vector<8x128xf32>
    %196 = arith.negf %195 : vector<8x128xf32>
    %197 = math.exp %196 : vector<8x128xf32>
    %cst_51 = arith.constant 1.000000e+00 : f32
    %198 = vector.broadcast %cst_51 : f32 to vector<8x128xf32>
    %199 = arith.addf %198, %197 : vector<8x128xf32>
    %200 = arith.divf %198, %199 : vector<8x128xf32>
    %201 = arith.mulf %192, %169 : vector<8x128xf32>
    %202 = arith.mulf %186, %194 : vector<8x128xf32>
    %203 = arith.addf %201, %202 : vector<8x128xf32>
    %204 = math.tanh %203 : vector<8x128xf32>
    %205 = arith.mulf %200, %204 : vector<8x128xf32>
    %206 = arith.index_cast %c5_i32 : i32 to index
    %c0_52 = arith.constant 0 : index
    %c0_53 = arith.constant 0 : index
    %207 = vector.load %arg3[%206, %c0_52, %c0_53] : memref<8x8x128xf32, #tpu.memory_space<vmem>>, vector<1x8x128xf32>
    %208 = vector.shape_cast %207 : vector<1x8x128xf32> to vector<8x128xf32>
    %209 = vector.shape_cast %205 : vector<8x128xf32> to vector<1x8x128xf32>
    tpu.vector_store %arg3[%206, %c0_52, %c0_53], %209 {strides = array<i32>} : memref<8x8x128xf32, #tpu.memory_space<vmem>>, vector<1x8x128xf32>,
    %c6_i32 = arith.constant 6 : i32
    %210 = arith.index_cast %c6_i32 : i32 to index
    %c0_54 = arith.constant 0 : index
    %c0_55 = arith.constant 0 : index
    %211 = vector.load %arg1[%210, %c0_54, %c0_55] : memref<8x8x512xf32, #tpu.memory_space<vmem>>, vector<1x8x512xf32>
    %212 = vector.shape_cast %211 : vector<1x8x512xf32> to vector<8x512xf32>
    %cst_56 = arith.constant dense<0.000000e+00> : vector<8x512xf32>
    %213 = tpu.matmul %205, %3, %cst_56 {dimension_numbers = #tpu.dot_dimension_numbers<[1], [0], [0], [1], [0, 0, 1, 1], [], []>} : vector<8x128xf32>, vector<128x512xf32>, vector<8x512xf32> -> vector<8x512xf32>
    %214 = arith.addf %212, %213 : vector<8x512xf32>
    %215 = vector.extract_strided_slice %214 {offsets = [0, 0], sizes = [8, 128], strides = [1, 1]} : vector<8x512xf32> to vector<8x128xf32>
    %216 = arith.negf %215 : vector<8x128xf32>
    %217 = math.exp %216 : vector<8x128xf32>
    %cst_57 = arith.constant 1.000000e+00 : f32
    %218 = vector.broadcast %cst_57 : f32 to vector<8x128xf32>
    %219 = arith.addf %218, %217 : vector<8x128xf32>
    %220 = arith.divf %218, %219 : vector<8x128xf32>
    %221 = vector.extract_strided_slice %214 {offsets = [0, 128], sizes = [8, 128], strides = [1, 1]} : vector<8x512xf32> to vector<8x128xf32>
    %222 = arith.negf %221 : vector<8x128xf32>
    %223 = math.exp %222 : vector<8x128xf32>
    %cst_58 = arith.constant 1.000000e+00 : f32
    %224 = vector.broadcast %cst_58 : f32 to vector<8x128xf32>
    %225 = arith.addf %224, %223 : vector<8x128xf32>
    %226 = arith.divf %224, %225 : vector<8x128xf32>
    %227 = vector.extract_strided_slice %214 {offsets = [0, 256], sizes = [8, 128], strides = [1, 1]} : vector<8x512xf32> to vector<8x128xf32>
    %228 = math.tanh %227 : vector<8x128xf32>
    %229 = vector.extract_strided_slice %214 {offsets = [0, 384], sizes = [8, 128], strides = [1, 1]} : vector<8x512xf32> to vector<8x128xf32>
    %230 = arith.negf %229 : vector<8x128xf32>
    %231 = math.exp %230 : vector<8x128xf32>
    %cst_59 = arith.constant 1.000000e+00 : f32
    %232 = vector.broadcast %cst_59 : f32 to vector<8x128xf32>
    %233 = arith.addf %232, %231 : vector<8x128xf32>
    %234 = arith.divf %232, %233 : vector<8x128xf32>
    %235 = arith.mulf %226, %203 : vector<8x128xf32>
    %236 = arith.mulf %220, %228 : vector<8x128xf32>
    %237 = arith.addf %235, %236 : vector<8x128xf32>
    %238 = math.tanh %237 : vector<8x128xf32>
    %239 = arith.mulf %234, %238 : vector<8x128xf32>
    %240 = arith.index_cast %c6_i32 : i32 to index
    %c0_60 = arith.constant 0 : index
    %c0_61 = arith.constant 0 : index
    %241 = vector.load %arg3[%240, %c0_60, %c0_61] : memref<8x8x128xf32, #tpu.memory_space<vmem>>, vector<1x8x128xf32>
    %242 = vector.shape_cast %241 : vector<1x8x128xf32> to vector<8x128xf32>
    %243 = vector.shape_cast %239 : vector<8x128xf32> to vector<1x8x128xf32>
    tpu.vector_store %arg3[%240, %c0_60, %c0_61], %243 {strides = array<i32>} : memref<8x8x128xf32, #tpu.memory_space<vmem>>, vector<1x8x128xf32>,
    %c7_i32 = arith.constant 7 : i32
    %244 = arith.index_cast %c7_i32 : i32 to index
    %c0_62 = arith.constant 0 : index
    %c0_63 = arith.constant 0 : index
    %245 = vector.load %arg1[%244, %c0_62, %c0_63] : memref<8x8x512xf32, #tpu.memory_space<vmem>>, vector<1x8x512xf32>
    %246 = vector.shape_cast %245 : vector<1x8x512xf32> to vector<8x512xf32>
    %cst_64 = arith.constant dense<0.000000e+00> : vector<8x512xf32>
    %247 = tpu.matmul %239, %3, %cst_64 {dimension_numbers = #tpu.dot_dimension_numbers<[1], [0], [0], [1], [0, 0, 1, 1], [], []>} : vector<8x128xf32>, vector<128x512xf32>, vector<8x512xf32> -> vector<8x512xf32>
    %248 = arith.addf %246, %247 : vector<8x512xf32>
    %249 = vector.extract_strided_slice %248 {offsets = [0, 0], sizes = [8, 128], strides = [1, 1]} : vector<8x512xf32> to vector<8x128xf32>
    %250 = arith.negf %249 : vector<8x128xf32>
    %251 = math.exp %250 : vector<8x128xf32>
    %cst_65 = arith.constant 1.000000e+00 : f32
    %252 = vector.broadcast %cst_65 : f32 to vector<8x128xf32>
    %253 = arith.addf %252, %251 : vector<8x128xf32>
    %254 = arith.divf %252, %253 : vector<8x128xf32>
    %255 = vector.extract_strided_slice %248 {offsets = [0, 128], sizes = [8, 128], strides = [1, 1]} : vector<8x512xf32> to vector<8x128xf32>
    %256 = arith.negf %255 : vector<8x128xf32>
    %257 = math.exp %256 : vector<8x128xf32>
    %cst_66 = arith.constant 1.000000e+00 : f32
    %258 = vector.broadcast %cst_66 : f32 to vector<8x128xf32>
    %259 = arith.addf %258, %257 : vector<8x128xf32>
    %260 = arith.divf %258, %259 : vector<8x128xf32>
    %261 = vector.extract_strided_slice %248 {offsets = [0, 256], sizes = [8, 128], strides = [1, 1]} : vector<8x512xf32> to vector<8x128xf32>
    %262 = math.tanh %261 : vector<8x128xf32>
    %263 = vector.extract_strided_slice %248 {offsets = [0, 384], sizes = [8, 128], strides = [1, 1]} : vector<8x512xf32> to vector<8x128xf32>
    %264 = arith.negf %263 : vector<8x128xf32>
    %265 = math.exp %264 : vector<8x128xf32>
    %cst_67 = arith.constant 1.000000e+00 : f32
    %266 = vector.broadcast %cst_67 : f32 to vector<8x128xf32>
    %267 = arith.addf %266, %265 : vector<8x128xf32>
    %268 = arith.divf %266, %267 : vector<8x128xf32>
    %269 = arith.mulf %260, %237 : vector<8x128xf32>
    %270 = arith.mulf %254, %262 : vector<8x128xf32>
    %271 = arith.addf %269, %270 : vector<8x128xf32>
    %272 = math.tanh %271 : vector<8x128xf32>
    %273 = arith.mulf %268, %272 : vector<8x128xf32>
    %274 = arith.index_cast %c7_i32 : i32 to index
    %c0_68 = arith.constant 0 : index
    %c0_69 = arith.constant 0 : index
    %275 = vector.load %arg3[%274, %c0_68, %c0_69] : memref<8x8x128xf32, #tpu.memory_space<vmem>>, vector<1x8x128xf32>
    %276 = vector.shape_cast %275 : vector<1x8x128xf32> to vector<8x128xf32>
    %277 = vector.shape_cast %273 : vector<8x128xf32> to vector<1x8x128xf32>
    tpu.vector_store %arg3[%274, %c0_68, %c0_69], %277 {strides = array<i32>} : memref<8x8x128xf32, #tpu.memory_space<vmem>>, vector<1x8x128xf32>,
    %c8_i32 = arith.constant 8 : i32
    %c0_70 = arith.constant 0 : index
    %c0_71 = arith.constant 0 : index
    %278 = vector.load %arg4[%c0_70, %c0_71] : memref<8x128xf32, #tpu.memory_space<vmem>>, vector<8x128xf32>
    tpu.vector_store %arg4[%c0_70, %c0_71], %273 {strides = array<i32>} : memref<8x128xf32, #tpu.memory_space<vmem>>, vector<8x128xf32>,
    %c0_72 = arith.constant 0 : index
    %c0_73 = arith.constant 0 : index
    %279 = vector.load %arg5[%c0_72, %c0_73] : memref<8x128xf32, #tpu.memory_space<vmem>>, vector<8x128xf32>
    tpu.vector_store %arg5[%c0_72, %c0_73], %271 {strides = array<i32>} : memref<8x128xf32, #tpu.memory_space<vmem>>, vector<8x128xf32>,
    return
  }
  func.func @transform_0(%arg0: i32) -> (i32, i32, i32) {
    %c0_i32 = arith.constant 0 : i32
    %c0_i32_0 = arith.constant 0 : i32
    %c0_i32_1 = arith.constant 0 : i32
    return %arg0, %c0_i32, %c0_i32_0 : i32, i32, i32
  }
  func.func @transform_1(%arg0: i32) -> (i32, i32) {
    %c0_i32 = arith.constant 0 : i32
    %c0_i32_0 = arith.constant 0 : i32
    %c0_i32_1 = arith.constant 0 : i32
    return %c0_i32, %c0_i32_0 : i32, i32
  }
  func.func @transform_2(%arg0: i32) -> (i32, i32, i32) {
    %c0_i32 = arith.constant 0 : i32
    %c0_i32_0 = arith.constant 0 : i32
    %c0_i32_1 = arith.constant 0 : i32
    return %arg0, %c0_i32, %c0_i32_0 : i32, i32, i32
  }
}

module attributes {stable_mosaic.version = 11 : i64} {
  func.func @_proj_kernel(%arg0: i32, %arg1: memref<64x128xf32, #tpu.memory_space<vmem>>, %arg2: memref<128x512xf32, #tpu.memory_space<vmem>>, %arg3: memref<1x512xf32, #tpu.memory_space<vmem>>, %arg4: memref<64x512xf32, #tpu.memory_space<vmem>>) attributes {dimension_semantics = [#tpu.dimension_semantics<parallel>], iteration_bounds = array<i64: 1>, scalar_prefetch = 0 : i64, scratch_operands = 0 : i64, tpu.core_type = #tpu.core_type<tc>, window_params = [{transform_indices = @transform_0, window_bounds = array<i64: 64, 128>}, {pipeline_mode = #tpu.pipeline_mode<synchronous>, transform_indices = @transform_1, window_bounds = array<i64: 128, 512>}, {pipeline_mode = #tpu.pipeline_mode<synchronous>, transform_indices = @transform_2, window_bounds = array<i64: 1, 512>}, {transform_indices = @transform_3, window_bounds = array<i64: 64, 512>}]} {
    %c0 = arith.constant 0 : index
    %c0_0 = arith.constant 0 : index
    %0 = vector.load %arg1[%c0, %c0_0] : memref<64x128xf32, #tpu.memory_space<vmem>>, vector<64x128xf32>
    %c0_1 = arith.constant 0 : index
    %c0_2 = arith.constant 0 : index
    %1 = vector.load %arg2[%c0_1, %c0_2] : memref<128x512xf32, #tpu.memory_space<vmem>>, vector<128x512xf32>
    %cst = arith.constant dense<0.000000e+00> : vector<64x512xf32>
    %2 = tpu.matmul %0, %1, %cst {dimension_numbers = #tpu.dot_dimension_numbers<[1], [0], [0], [1], [0, 0, 1, 1], [], []>} : vector<64x128xf32>, vector<128x512xf32>, vector<64x512xf32> -> vector<64x512xf32>
    %c0_3 = arith.constant 0 : index
    %c0_4 = arith.constant 0 : index
    %3 = vector.load %arg3[%c0_3, %c0_4] : memref<1x512xf32, #tpu.memory_space<vmem>>, vector<1x512xf32>
    %4 = vector.broadcast %3 : vector<1x512xf32> to vector<64x512xf32>
    %5 = arith.addf %2, %4 : vector<64x512xf32>
    %c0_5 = arith.constant 0 : index
    %c0_6 = arith.constant 0 : index
    %6 = vector.load %arg4[%c0_5, %c0_6] : memref<64x512xf32, #tpu.memory_space<vmem>>, vector<64x512xf32>
    tpu.vector_store %arg4[%c0_5, %c0_6], %5 {strides = array<i32>} : memref<64x512xf32, #tpu.memory_space<vmem>>, vector<64x512xf32>,
    return
  }
  func.func @transform_0(%arg0: i32) -> (i32, i32) {
    %c0_i32 = arith.constant 0 : i32
    %c0_i32_0 = arith.constant 0 : i32
    return %arg0, %c0_i32 : i32, i32
  }
  func.func @transform_1(%arg0: i32) -> (i32, i32) {
    %c0_i32 = arith.constant 0 : i32
    %c0_i32_0 = arith.constant 0 : i32
    %c0_i32_1 = arith.constant 0 : i32
    return %c0_i32, %c0_i32_0 : i32, i32
  }
  func.func @transform_2(%arg0: i32) -> (i32, i32) {
    %c0_i32 = arith.constant 0 : i32
    %c0_i32_0 = arith.constant 0 : i32
    %c0_i32_1 = arith.constant 0 : i32
    return %c0_i32, %c0_i32_0 : i32, i32
  }
  func.func @transform_3(%arg0: i32) -> (i32, i32) {
    %c0_i32 = arith.constant 0 : i32
    %c0_i32_0 = arith.constant 0 : i32
    return %arg0, %c0_i32 : i32, i32
  }
}

module attributes {stable_mosaic.version = 11 : i64} {
  func.func @_lstm_fc_kernel(%arg0: i32, %arg1: memref<8x8x512xf32, #tpu.memory_space<vmem>>, %arg2: memref<128x512xf32, #tpu.memory_space<vmem>>, %arg3: memref<128x128xf32, #tpu.memory_space<vmem>>, %arg4: memref<1x128xf32, #tpu.memory_space<vmem>>, %arg5: memref<8x128xf32, #tpu.memory_space<vmem>>, %arg6: memref<8x128xf32, #tpu.memory_space<vmem>>, %arg7: memref<8x128xf32, #tpu.memory_space<vmem>>) attributes {dimension_semantics = [#tpu.dimension_semantics<arbitrary>], iteration_bounds = array<i64: 1>, scalar_prefetch = 0 : i64, scratch_operands = 2 : i64, tpu.core_type = #tpu.core_type<tc>, window_params = [{transform_indices = @transform_0, window_bounds = array<i64: 8, 8, 512>}, {pipeline_mode = #tpu.pipeline_mode<synchronous>, transform_indices = @transform_1, window_bounds = array<i64: 128, 512>}, {pipeline_mode = #tpu.pipeline_mode<synchronous>, transform_indices = @transform_2, window_bounds = array<i64: 128, 128>}, {pipeline_mode = #tpu.pipeline_mode<synchronous>, transform_indices = @transform_3, window_bounds = array<i64: 1, 128>}, {pipeline_mode = #tpu.pipeline_mode<synchronous>, transform_indices = @transform_4, window_bounds = array<i64: 8, 128>}]} {
    %c0_i32 = arith.constant 0 : i32
    %0 = arith.cmpi eq, %arg0, %c0_i32 : i32
    %1 = arith.extui %0 : i1 to i32
    %c0_i32_0 = arith.constant 0 : i32
    %2 = arith.cmpi ne, %1, %c0_i32_0 : i32
    scf.if %2 {
      %cst_60 = arith.constant 0.000000e+00 : f32
      %251 = vector.broadcast %cst_60 : f32 to vector<8x128xf32>
      %c0_61 = arith.constant 0 : index
      %c0_62 = arith.constant 0 : index
      %252 = vector.load %arg6[%c0_61, %c0_62] : memref<8x128xf32, #tpu.memory_space<vmem>>, vector<8x128xf32>
      tpu.vector_store %arg6[%c0_61, %c0_62], %251 {strides = array<i32>} : memref<8x128xf32, #tpu.memory_space<vmem>>, vector<8x128xf32>,
      %cst_63 = arith.constant 0.000000e+00 : f32
      %253 = vector.broadcast %cst_63 : f32 to vector<8x128xf32>
      %c0_64 = arith.constant 0 : index
      %c0_65 = arith.constant 0 : index
      %254 = vector.load %arg7[%c0_64, %c0_65] : memref<8x128xf32, #tpu.memory_space<vmem>>, vector<8x128xf32>
      tpu.vector_store %arg7[%c0_64, %c0_65], %253 {strides = array<i32>} : memref<8x128xf32, #tpu.memory_space<vmem>>, vector<8x128xf32>,
      %cst_66 = arith.constant 0.000000e+00 : f32
      %255 = vector.broadcast %cst_66 : f32 to vector<8x128xf32>
      %c0_67 = arith.constant 0 : index
      %c0_68 = arith.constant 0 : index
      %256 = vector.load %arg5[%c0_67, %c0_68] : memref<8x128xf32, #tpu.memory_space<vmem>>, vector<8x128xf32>
      tpu.vector_store %arg5[%c0_67, %c0_68], %255 {strides = array<i32>} : memref<8x128xf32, #tpu.memory_space<vmem>>, vector<8x128xf32>,
    } else {
    }
    %c0 = arith.constant 0 : index
    %c0_1 = arith.constant 0 : index
    %3 = vector.load %arg2[%c0, %c0_1] : memref<128x512xf32, #tpu.memory_space<vmem>>, vector<128x512xf32>
    %c0_2 = arith.constant 0 : index
    %c0_3 = arith.constant 0 : index
    %4 = vector.load %arg6[%c0_2, %c0_3] : memref<8x128xf32, #tpu.memory_space<vmem>>, vector<8x128xf32>
    %c0_4 = arith.constant 0 : index
    %c0_5 = arith.constant 0 : index
    %5 = vector.load %arg7[%c0_4, %c0_5] : memref<8x128xf32, #tpu.memory_space<vmem>>, vector<8x128xf32>
    %c0_i32_6 = arith.constant 0 : i32
    %6 = arith.index_cast %c0_i32_6 : i32 to index
    %c0_7 = arith.constant 0 : index
    %c0_8 = arith.constant 0 : index
    %7 = vector.load %arg1[%6, %c0_7, %c0_8] : memref<8x8x512xf32, #tpu.memory_space<vmem>>, vector<1x8x512xf32>
    %8 = vector.shape_cast %7 : vector<1x8x512xf32> to vector<8x512xf32>
    %cst = arith.constant dense<0.000000e+00> : vector<8x512xf32>
    %9 = tpu.matmul %4, %3, %cst {dimension_numbers = #tpu.dot_dimension_numbers<[1], [0], [0], [1], [0, 0, 1, 1], [], []>} : vector<8x128xf32>, vector<128x512xf32>, vector<8x512xf32> -> vector<8x512xf32>
    %10 = arith.addf %8, %9 : vector<8x512xf32>
    %11 = vector.extract_strided_slice %10 {offsets = [0, 0], sizes = [8, 128], strides = [1, 1]} : vector<8x512xf32> to vector<8x128xf32>
    %12 = arith.negf %11 : vector<8x128xf32>
    %13 = math.exp %12 : vector<8x128xf32>
    %cst_9 = arith.constant 1.000000e+00 : f32
    %14 = vector.broadcast %cst_9 : f32 to vector<8x128xf32>
    %15 = arith.addf %14, %13 : vector<8x128xf32>
    %16 = arith.divf %14, %15 : vector<8x128xf32>
    %17 = vector.extract_strided_slice %10 {offsets = [0, 128], sizes = [8, 128], strides = [1, 1]} : vector<8x512xf32> to vector<8x128xf32>
    %18 = arith.negf %17 : vector<8x128xf32>
    %19 = math.exp %18 : vector<8x128xf32>
    %cst_10 = arith.constant 1.000000e+00 : f32
    %20 = vector.broadcast %cst_10 : f32 to vector<8x128xf32>
    %21 = arith.addf %20, %19 : vector<8x128xf32>
    %22 = arith.divf %20, %21 : vector<8x128xf32>
    %23 = vector.extract_strided_slice %10 {offsets = [0, 256], sizes = [8, 128], strides = [1, 1]} : vector<8x512xf32> to vector<8x128xf32>
    %24 = math.tanh %23 : vector<8x128xf32>
    %25 = vector.extract_strided_slice %10 {offsets = [0, 384], sizes = [8, 128], strides = [1, 1]} : vector<8x512xf32> to vector<8x128xf32>
    %26 = arith.negf %25 : vector<8x128xf32>
    %27 = math.exp %26 : vector<8x128xf32>
    %cst_11 = arith.constant 1.000000e+00 : f32
    %28 = vector.broadcast %cst_11 : f32 to vector<8x128xf32>
    %29 = arith.addf %28, %27 : vector<8x128xf32>
    %30 = arith.divf %28, %29 : vector<8x128xf32>
    %31 = arith.mulf %22, %5 : vector<8x128xf32>
    %32 = arith.mulf %16, %24 : vector<8x128xf32>
    %33 = arith.addf %31, %32 : vector<8x128xf32>
    %34 = math.tanh %33 : vector<8x128xf32>
    %35 = arith.mulf %30, %34 : vector<8x128xf32>
    %c1_i32 = arith.constant 1 : i32
    %36 = arith.index_cast %c1_i32 : i32 to index
    %c0_12 = arith.constant 0 : index
    %c0_13 = arith.constant 0 : index
    %37 = vector.load %arg1[%36, %c0_12, %c0_13] : memref<8x8x512xf32, #tpu.memory_space<vmem>>, vector<1x8x512xf32>
    %38 = vector.shape_cast %37 : vector<1x8x512xf32> to vector<8x512xf32>
    %cst_14 = arith.constant dense<0.000000e+00> : vector<8x512xf32>
    %39 = tpu.matmul %35, %3, %cst_14 {dimension_numbers = #tpu.dot_dimension_numbers<[1], [0], [0], [1], [0, 0, 1, 1], [], []>} : vector<8x128xf32>, vector<128x512xf32>, vector<8x512xf32> -> vector<8x512xf32>
    %40 = arith.addf %38, %39 : vector<8x512xf32>
    %41 = vector.extract_strided_slice %40 {offsets = [0, 0], sizes = [8, 128], strides = [1, 1]} : vector<8x512xf32> to vector<8x128xf32>
    %42 = arith.negf %41 : vector<8x128xf32>
    %43 = math.exp %42 : vector<8x128xf32>
    %cst_15 = arith.constant 1.000000e+00 : f32
    %44 = vector.broadcast %cst_15 : f32 to vector<8x128xf32>
    %45 = arith.addf %44, %43 : vector<8x128xf32>
    %46 = arith.divf %44, %45 : vector<8x128xf32>
    %47 = vector.extract_strided_slice %40 {offsets = [0, 128], sizes = [8, 128], strides = [1, 1]} : vector<8x512xf32> to vector<8x128xf32>
    %48 = arith.negf %47 : vector<8x128xf32>
    %49 = math.exp %48 : vector<8x128xf32>
    %cst_16 = arith.constant 1.000000e+00 : f32
    %50 = vector.broadcast %cst_16 : f32 to vector<8x128xf32>
    %51 = arith.addf %50, %49 : vector<8x128xf32>
    %52 = arith.divf %50, %51 : vector<8x128xf32>
    %53 = vector.extract_strided_slice %40 {offsets = [0, 256], sizes = [8, 128], strides = [1, 1]} : vector<8x512xf32> to vector<8x128xf32>
    %54 = math.tanh %53 : vector<8x128xf32>
    %55 = vector.extract_strided_slice %40 {offsets = [0, 384], sizes = [8, 128], strides = [1, 1]} : vector<8x512xf32> to vector<8x128xf32>
    %56 = arith.negf %55 : vector<8x128xf32>
    %57 = math.exp %56 : vector<8x128xf32>
    %cst_17 = arith.constant 1.000000e+00 : f32
    %58 = vector.broadcast %cst_17 : f32 to vector<8x128xf32>
    %59 = arith.addf %58, %57 : vector<8x128xf32>
    %60 = arith.divf %58, %59 : vector<8x128xf32>
    %61 = arith.mulf %52, %33 : vector<8x128xf32>
    %62 = arith.mulf %46, %54 : vector<8x128xf32>
    %63 = arith.addf %61, %62 : vector<8x128xf32>
    %64 = math.tanh %63 : vector<8x128xf32>
    %65 = arith.mulf %60, %64 : vector<8x128xf32>
    %c2_i32 = arith.constant 2 : i32
    %66 = arith.index_cast %c2_i32 : i32 to index
    %c0_18 = arith.constant 0 : index
    %c0_19 = arith.constant 0 : index
    %67 = vector.load %arg1[%66, %c0_18, %c0_19] : memref<8x8x512xf32, #tpu.memory_space<vmem>>, vector<1x8x512xf32>
    %68 = vector.shape_cast %67 : vector<1x8x512xf32> to vector<8x512xf32>
    %cst_20 = arith.constant dense<0.000000e+00> : vector<8x512xf32>
    %69 = tpu.matmul %65, %3, %cst_20 {dimension_numbers = #tpu.dot_dimension_numbers<[1], [0], [0], [1], [0, 0, 1, 1], [], []>} : vector<8x128xf32>, vector<128x512xf32>, vector<8x512xf32> -> vector<8x512xf32>
    %70 = arith.addf %68, %69 : vector<8x512xf32>
    %71 = vector.extract_strided_slice %70 {offsets = [0, 0], sizes = [8, 128], strides = [1, 1]} : vector<8x512xf32> to vector<8x128xf32>
    %72 = arith.negf %71 : vector<8x128xf32>
    %73 = math.exp %72 : vector<8x128xf32>
    %cst_21 = arith.constant 1.000000e+00 : f32
    %74 = vector.broadcast %cst_21 : f32 to vector<8x128xf32>
    %75 = arith.addf %74, %73 : vector<8x128xf32>
    %76 = arith.divf %74, %75 : vector<8x128xf32>
    %77 = vector.extract_strided_slice %70 {offsets = [0, 128], sizes = [8, 128], strides = [1, 1]} : vector<8x512xf32> to vector<8x128xf32>
    %78 = arith.negf %77 : vector<8x128xf32>
    %79 = math.exp %78 : vector<8x128xf32>
    %cst_22 = arith.constant 1.000000e+00 : f32
    %80 = vector.broadcast %cst_22 : f32 to vector<8x128xf32>
    %81 = arith.addf %80, %79 : vector<8x128xf32>
    %82 = arith.divf %80, %81 : vector<8x128xf32>
    %83 = vector.extract_strided_slice %70 {offsets = [0, 256], sizes = [8, 128], strides = [1, 1]} : vector<8x512xf32> to vector<8x128xf32>
    %84 = math.tanh %83 : vector<8x128xf32>
    %85 = vector.extract_strided_slice %70 {offsets = [0, 384], sizes = [8, 128], strides = [1, 1]} : vector<8x512xf32> to vector<8x128xf32>
    %86 = arith.negf %85 : vector<8x128xf32>
    %87 = math.exp %86 : vector<8x128xf32>
    %cst_23 = arith.constant 1.000000e+00 : f32
    %88 = vector.broadcast %cst_23 : f32 to vector<8x128xf32>
    %89 = arith.addf %88, %87 : vector<8x128xf32>
    %90 = arith.divf %88, %89 : vector<8x128xf32>
    %91 = arith.mulf %82, %63 : vector<8x128xf32>
    %92 = arith.mulf %76, %84 : vector<8x128xf32>
    %93 = arith.addf %91, %92 : vector<8x128xf32>
    %94 = math.tanh %93 : vector<8x128xf32>
    %95 = arith.mulf %90, %94 : vector<8x128xf32>
    %c3_i32 = arith.constant 3 : i32
    %96 = arith.index_cast %c3_i32 : i32 to index
    %c0_24 = arith.constant 0 : index
    %c0_25 = arith.constant 0 : index
    %97 = vector.load %arg1[%96, %c0_24, %c0_25] : memref<8x8x512xf32, #tpu.memory_space<vmem>>, vector<1x8x512xf32>
    %98 = vector.shape_cast %97 : vector<1x8x512xf32> to vector<8x512xf32>
    %cst_26 = arith.constant dense<0.000000e+00> : vector<8x512xf32>
    %99 = tpu.matmul %95, %3, %cst_26 {dimension_numbers = #tpu.dot_dimension_numbers<[1], [0], [0], [1], [0, 0, 1, 1], [], []>} : vector<8x128xf32>, vector<128x512xf32>, vector<8x512xf32> -> vector<8x512xf32>
    %100 = arith.addf %98, %99 : vector<8x512xf32>
    %101 = vector.extract_strided_slice %100 {offsets = [0, 0], sizes = [8, 128], strides = [1, 1]} : vector<8x512xf32> to vector<8x128xf32>
    %102 = arith.negf %101 : vector<8x128xf32>
    %103 = math.exp %102 : vector<8x128xf32>
    %cst_27 = arith.constant 1.000000e+00 : f32
    %104 = vector.broadcast %cst_27 : f32 to vector<8x128xf32>
    %105 = arith.addf %104, %103 : vector<8x128xf32>
    %106 = arith.divf %104, %105 : vector<8x128xf32>
    %107 = vector.extract_strided_slice %100 {offsets = [0, 128], sizes = [8, 128], strides = [1, 1]} : vector<8x512xf32> to vector<8x128xf32>
    %108 = arith.negf %107 : vector<8x128xf32>
    %109 = math.exp %108 : vector<8x128xf32>
    %cst_28 = arith.constant 1.000000e+00 : f32
    %110 = vector.broadcast %cst_28 : f32 to vector<8x128xf32>
    %111 = arith.addf %110, %109 : vector<8x128xf32>
    %112 = arith.divf %110, %111 : vector<8x128xf32>
    %113 = vector.extract_strided_slice %100 {offsets = [0, 256], sizes = [8, 128], strides = [1, 1]} : vector<8x512xf32> to vector<8x128xf32>
    %114 = math.tanh %113 : vector<8x128xf32>
    %115 = vector.extract_strided_slice %100 {offsets = [0, 384], sizes = [8, 128], strides = [1, 1]} : vector<8x512xf32> to vector<8x128xf32>
    %116 = arith.negf %115 : vector<8x128xf32>
    %117 = math.exp %116 : vector<8x128xf32>
    %cst_29 = arith.constant 1.000000e+00 : f32
    %118 = vector.broadcast %cst_29 : f32 to vector<8x128xf32>
    %119 = arith.addf %118, %117 : vector<8x128xf32>
    %120 = arith.divf %118, %119 : vector<8x128xf32>
    %121 = arith.mulf %112, %93 : vector<8x128xf32>
    %122 = arith.mulf %106, %114 : vector<8x128xf32>
    %123 = arith.addf %121, %122 : vector<8x128xf32>
    %124 = math.tanh %123 : vector<8x128xf32>
    %125 = arith.mulf %120, %124 : vector<8x128xf32>
    %c4_i32 = arith.constant 4 : i32
    %126 = arith.index_cast %c4_i32 : i32 to index
    %c0_30 = arith.constant 0 : index
    %c0_31 = arith.constant 0 : index
    %127 = vector.load %arg1[%126, %c0_30, %c0_31] : memref<8x8x512xf32, #tpu.memory_space<vmem>>, vector<1x8x512xf32>
    %128 = vector.shape_cast %127 : vector<1x8x512xf32> to vector<8x512xf32>
    %cst_32 = arith.constant dense<0.000000e+00> : vector<8x512xf32>
    %129 = tpu.matmul %125, %3, %cst_32 {dimension_numbers = #tpu.dot_dimension_numbers<[1], [0], [0], [1], [0, 0, 1, 1], [], []>} : vector<8x128xf32>, vector<128x512xf32>, vector<8x512xf32> -> vector<8x512xf32>
    %130 = arith.addf %128, %129 : vector<8x512xf32>
    %131 = vector.extract_strided_slice %130 {offsets = [0, 0], sizes = [8, 128], strides = [1, 1]} : vector<8x512xf32> to vector<8x128xf32>
    %132 = arith.negf %131 : vector<8x128xf32>
    %133 = math.exp %132 : vector<8x128xf32>
    %cst_33 = arith.constant 1.000000e+00 : f32
    %134 = vector.broadcast %cst_33 : f32 to vector<8x128xf32>
    %135 = arith.addf %134, %133 : vector<8x128xf32>
    %136 = arith.divf %134, %135 : vector<8x128xf32>
    %137 = vector.extract_strided_slice %130 {offsets = [0, 128], sizes = [8, 128], strides = [1, 1]} : vector<8x512xf32> to vector<8x128xf32>
    %138 = arith.negf %137 : vector<8x128xf32>
    %139 = math.exp %138 : vector<8x128xf32>
    %cst_34 = arith.constant 1.000000e+00 : f32
    %140 = vector.broadcast %cst_34 : f32 to vector<8x128xf32>
    %141 = arith.addf %140, %139 : vector<8x128xf32>
    %142 = arith.divf %140, %141 : vector<8x128xf32>
    %143 = vector.extract_strided_slice %130 {offsets = [0, 256], sizes = [8, 128], strides = [1, 1]} : vector<8x512xf32> to vector<8x128xf32>
    %144 = math.tanh %143 : vector<8x128xf32>
    %145 = vector.extract_strided_slice %130 {offsets = [0, 384], sizes = [8, 128], strides = [1, 1]} : vector<8x512xf32> to vector<8x128xf32>
    %146 = arith.negf %145 : vector<8x128xf32>
    %147 = math.exp %146 : vector<8x128xf32>
    %cst_35 = arith.constant 1.000000e+00 : f32
    %148 = vector.broadcast %cst_35 : f32 to vector<8x128xf32>
    %149 = arith.addf %148, %147 : vector<8x128xf32>
    %150 = arith.divf %148, %149 : vector<8x128xf32>
    %151 = arith.mulf %142, %123 : vector<8x128xf32>
    %152 = arith.mulf %136, %144 : vector<8x128xf32>
    %153 = arith.addf %151, %152 : vector<8x128xf32>
    %154 = math.tanh %153 : vector<8x128xf32>
    %155 = arith.mulf %150, %154 : vector<8x128xf32>
    %c5_i32 = arith.constant 5 : i32
    %156 = arith.index_cast %c5_i32 : i32 to index
    %c0_36 = arith.constant 0 : index
    %c0_37 = arith.constant 0 : index
    %157 = vector.load %arg1[%156, %c0_36, %c0_37] : memref<8x8x512xf32, #tpu.memory_space<vmem>>, vector<1x8x512xf32>
    %158 = vector.shape_cast %157 : vector<1x8x512xf32> to vector<8x512xf32>
    %cst_38 = arith.constant dense<0.000000e+00> : vector<8x512xf32>
    %159 = tpu.matmul %155, %3, %cst_38 {dimension_numbers = #tpu.dot_dimension_numbers<[1], [0], [0], [1], [0, 0, 1, 1], [], []>} : vector<8x128xf32>, vector<128x512xf32>, vector<8x512xf32> -> vector<8x512xf32>
    %160 = arith.addf %158, %159 : vector<8x512xf32>
    %161 = vector.extract_strided_slice %160 {offsets = [0, 0], sizes = [8, 128], strides = [1, 1]} : vector<8x512xf32> to vector<8x128xf32>
    %162 = arith.negf %161 : vector<8x128xf32>
    %163 = math.exp %162 : vector<8x128xf32>
    %cst_39 = arith.constant 1.000000e+00 : f32
    %164 = vector.broadcast %cst_39 : f32 to vector<8x128xf32>
    %165 = arith.addf %164, %163 : vector<8x128xf32>
    %166 = arith.divf %164, %165 : vector<8x128xf32>
    %167 = vector.extract_strided_slice %160 {offsets = [0, 128], sizes = [8, 128], strides = [1, 1]} : vector<8x512xf32> to vector<8x128xf32>
    %168 = arith.negf %167 : vector<8x128xf32>
    %169 = math.exp %168 : vector<8x128xf32>
    %cst_40 = arith.constant 1.000000e+00 : f32
    %170 = vector.broadcast %cst_40 : f32 to vector<8x128xf32>
    %171 = arith.addf %170, %169 : vector<8x128xf32>
    %172 = arith.divf %170, %171 : vector<8x128xf32>
    %173 = vector.extract_strided_slice %160 {offsets = [0, 256], sizes = [8, 128], strides = [1, 1]} : vector<8x512xf32> to vector<8x128xf32>
    %174 = math.tanh %173 : vector<8x128xf32>
    %175 = vector.extract_strided_slice %160 {offsets = [0, 384], sizes = [8, 128], strides = [1, 1]} : vector<8x512xf32> to vector<8x128xf32>
    %176 = arith.negf %175 : vector<8x128xf32>
    %177 = math.exp %176 : vector<8x128xf32>
    %cst_41 = arith.constant 1.000000e+00 : f32
    %178 = vector.broadcast %cst_41 : f32 to vector<8x128xf32>
    %179 = arith.addf %178, %177 : vector<8x128xf32>
    %180 = arith.divf %178, %179 : vector<8x128xf32>
    %181 = arith.mulf %172, %153 : vector<8x128xf32>
    %182 = arith.mulf %166, %174 : vector<8x128xf32>
    %183 = arith.addf %181, %182 : vector<8x128xf32>
    %184 = math.tanh %183 : vector<8x128xf32>
    %185 = arith.mulf %180, %184 : vector<8x128xf32>
    %c6_i32 = arith.constant 6 : i32
    %186 = arith.index_cast %c6_i32 : i32 to index
    %c0_42 = arith.constant 0 : index
    %c0_43 = arith.constant 0 : index
    %187 = vector.load %arg1[%186, %c0_42, %c0_43] : memref<8x8x512xf32, #tpu.memory_space<vmem>>, vector<1x8x512xf32>
    %188 = vector.shape_cast %187 : vector<1x8x512xf32> to vector<8x512xf32>
    %cst_44 = arith.constant dense<0.000000e+00> : vector<8x512xf32>
    %189 = tpu.matmul %185, %3, %cst_44 {dimension_numbers = #tpu.dot_dimension_numbers<[1], [0], [0], [1], [0, 0, 1, 1], [], []>} : vector<8x128xf32>, vector<128x512xf32>, vector<8x512xf32> -> vector<8x512xf32>
    %190 = arith.addf %188, %189 : vector<8x512xf32>
    %191 = vector.extract_strided_slice %190 {offsets = [0, 0], sizes = [8, 128], strides = [1, 1]} : vector<8x512xf32> to vector<8x128xf32>
    %192 = arith.negf %191 : vector<8x128xf32>
    %193 = math.exp %192 : vector<8x128xf32>
    %cst_45 = arith.constant 1.000000e+00 : f32
    %194 = vector.broadcast %cst_45 : f32 to vector<8x128xf32>
    %195 = arith.addf %194, %193 : vector<8x128xf32>
    %196 = arith.divf %194, %195 : vector<8x128xf32>
    %197 = vector.extract_strided_slice %190 {offsets = [0, 128], sizes = [8, 128], strides = [1, 1]} : vector<8x512xf32> to vector<8x128xf32>
    %198 = arith.negf %197 : vector<8x128xf32>
    %199 = math.exp %198 : vector<8x128xf32>
    %cst_46 = arith.constant 1.000000e+00 : f32
    %200 = vector.broadcast %cst_46 : f32 to vector<8x128xf32>
    %201 = arith.addf %200, %199 : vector<8x128xf32>
    %202 = arith.divf %200, %201 : vector<8x128xf32>
    %203 = vector.extract_strided_slice %190 {offsets = [0, 256], sizes = [8, 128], strides = [1, 1]} : vector<8x512xf32> to vector<8x128xf32>
    %204 = math.tanh %203 : vector<8x128xf32>
    %205 = vector.extract_strided_slice %190 {offsets = [0, 384], sizes = [8, 128], strides = [1, 1]} : vector<8x512xf32> to vector<8x128xf32>
    %206 = arith.negf %205 : vector<8x128xf32>
    %207 = math.exp %206 : vector<8x128xf32>
    %cst_47 = arith.constant 1.000000e+00 : f32
    %208 = vector.broadcast %cst_47 : f32 to vector<8x128xf32>
    %209 = arith.addf %208, %207 : vector<8x128xf32>
    %210 = arith.divf %208, %209 : vector<8x128xf32>
    %211 = arith.mulf %202, %183 : vector<8x128xf32>
    %212 = arith.mulf %196, %204 : vector<8x128xf32>
    %213 = arith.addf %211, %212 : vector<8x128xf32>
    %214 = math.tanh %213 : vector<8x128xf32>
    %215 = arith.mulf %210, %214 : vector<8x128xf32>
    %c7_i32 = arith.constant 7 : i32
    %216 = arith.index_cast %c7_i32 : i32 to index
    %c0_48 = arith.constant 0 : index
    %c0_49 = arith.constant 0 : index
    %217 = vector.load %arg1[%216, %c0_48, %c0_49] : memref<8x8x512xf32, #tpu.memory_space<vmem>>, vector<1x8x512xf32>
    %218 = vector.shape_cast %217 : vector<1x8x512xf32> to vector<8x512xf32>
    %cst_50 = arith.constant dense<0.000000e+00> : vector<8x512xf32>
    %219 = tpu.matmul %215, %3, %cst_50 {dimension_numbers = #tpu.dot_dimension_numbers<[1], [0], [0], [1], [0, 0, 1, 1], [], []>} : vector<8x128xf32>, vector<128x512xf32>, vector<8x512xf32> -> vector<8x512xf32>
    %220 = arith.addf %218, %219 : vector<8x512xf32>
    %221 = vector.extract_strided_slice %220 {offsets = [0, 0], sizes = [8, 128], strides = [1, 1]} : vector<8x512xf32> to vector<8x128xf32>
    %222 = arith.negf %221 : vector<8x128xf32>
    %223 = math.exp %222 : vector<8x128xf32>
    %cst_51 = arith.constant 1.000000e+00 : f32
    %224 = vector.broadcast %cst_51 : f32 to vector<8x128xf32>
    %225 = arith.addf %224, %223 : vector<8x128xf32>
    %226 = arith.divf %224, %225 : vector<8x128xf32>
    %227 = vector.extract_strided_slice %220 {offsets = [0, 128], sizes = [8, 128], strides = [1, 1]} : vector<8x512xf32> to vector<8x128xf32>
    %228 = arith.negf %227 : vector<8x128xf32>
    %229 = math.exp %228 : vector<8x128xf32>
    %cst_52 = arith.constant 1.000000e+00 : f32
    %230 = vector.broadcast %cst_52 : f32 to vector<8x128xf32>
    %231 = arith.addf %230, %229 : vector<8x128xf32>
    %232 = arith.divf %230, %231 : vector<8x128xf32>
    %233 = vector.extract_strided_slice %220 {offsets = [0, 256], sizes = [8, 128], strides = [1, 1]} : vector<8x512xf32> to vector<8x128xf32>
    %234 = math.tanh %233 : vector<8x128xf32>
    %235 = vector.extract_strided_slice %220 {offsets = [0, 384], sizes = [8, 128], strides = [1, 1]} : vector<8x512xf32> to vector<8x128xf32>
    %236 = arith.negf %235 : vector<8x128xf32>
    %237 = math.exp %236 : vector<8x128xf32>
    %cst_53 = arith.constant 1.000000e+00 : f32
    %238 = vector.broadcast %cst_53 : f32 to vector<8x128xf32>
    %239 = arith.addf %238, %237 : vector<8x128xf32>
    %240 = arith.divf %238, %239 : vector<8x128xf32>
    %241 = arith.mulf %232, %213 : vector<8x128xf32>
    %242 = arith.mulf %226, %234 : vector<8x128xf32>
    %243 = arith.addf %241, %242 : vector<8x128xf32>
    %244 = math.tanh %243 : vector<8x128xf32>
    %245 = arith.mulf %240, %244 : vector<8x128xf32>
    %c8_i32 = arith.constant 8 : i32
    %c0_54 = arith.constant 0 : index
    %c0_55 = arith.constant 0 : index
    %246 = vector.load %arg6[%c0_54, %c0_55] : memref<8x128xf32, #tpu.memory_space<vmem>>, vector<8x128xf32>
    tpu.vector_store %arg6[%c0_54, %c0_55], %245 {strides = array<i32>} : memref<8x128xf32, #tpu.memory_space<vmem>>, vector<8x128xf32>,
    %c0_56 = arith.constant 0 : index
    %c0_57 = arith.constant 0 : index
    %247 = vector.load %arg7[%c0_56, %c0_57] : memref<8x128xf32, #tpu.memory_space<vmem>>, vector<8x128xf32>
    tpu.vector_store %arg7[%c0_56, %c0_57], %243 {strides = array<i32>} : memref<8x128xf32, #tpu.memory_space<vmem>>, vector<8x128xf32>,
    %c0_i32_58 = arith.constant 0 : i32
    %248 = arith.cmpi eq, %arg0, %c0_i32_58 : i32
    %249 = arith.extui %248 : i1 to i32
    %c0_i32_59 = arith.constant 0 : i32
    %250 = arith.cmpi ne, %249, %c0_i32_59 : i32
    scf.if %250 {
      %c0_60 = arith.constant 0 : index
      %c0_61 = arith.constant 0 : index
      %251 = vector.load %arg3[%c0_60, %c0_61] : memref<128x128xf32, #tpu.memory_space<vmem>>, vector<128x128xf32>
      %cst_62 = arith.constant dense<0.000000e+00> : vector<8x128xf32>
      %252 = tpu.matmul %245, %251, %cst_62 {dimension_numbers = #tpu.dot_dimension_numbers<[1], [0], [0], [1], [0, 0, 1, 1], [], []>} : vector<8x128xf32>, vector<128x128xf32>, vector<8x128xf32> -> vector<8x128xf32>
      %c0_63 = arith.constant 0 : index
      %c0_64 = arith.constant 0 : index
      %253 = vector.load %arg4[%c0_63, %c0_64] : memref<1x128xf32, #tpu.memory_space<vmem>>, vector<1x128xf32>
      %254 = vector.broadcast %253 : vector<1x128xf32> to vector<8x128xf32>
      %255 = arith.addf %252, %254 : vector<8x128xf32>
      %c0_65 = arith.constant 0 : index
      %c0_66 = arith.constant 0 : index
      %256 = vector.load %arg5[%c0_65, %c0_66] : memref<8x128xf32, #tpu.memory_space<vmem>>, vector<8x128xf32>
      tpu.vector_store %arg5[%c0_65, %c0_66], %255 {strides = array<i32>} : memref<8x128xf32, #tpu.memory_space<vmem>>, vector<8x128xf32>,
    } else {
    }
    return
  }
  func.func @transform_0(%arg0: i32) -> (i32, i32, i32) {
    %c0_i32 = arith.constant 0 : i32
    %c0_i32_0 = arith.constant 0 : i32
    %c0_i32_1 = arith.constant 0 : i32
    return %arg0, %c0_i32, %c0_i32_0 : i32, i32, i32
  }
  func.func @transform_1(%arg0: i32) -> (i32, i32) {
    %c0_i32 = arith.constant 0 : i32
    %c0_i32_0 = arith.constant 0 : i32
    %c0_i32_1 = arith.constant 0 : i32
    return %c0_i32, %c0_i32_0 : i32, i32
  }
  func.func @transform_2(%arg0: i32) -> (i32, i32) {
    %c0_i32 = arith.constant 0 : i32
    %c0_i32_0 = arith.constant 0 : i32
    %c0_i32_1 = arith.constant 0 : i32
    return %c0_i32, %c0_i32_0 : i32, i32
  }
  func.func @transform_3(%arg0: i32) -> (i32, i32) {
    %c0_i32 = arith.constant 0 : i32
    %c0_i32_0 = arith.constant 0 : i32
    %c0_i32_1 = arith.constant 0 : i32
    return %c0_i32, %c0_i32_0 : i32, i32
  }
  func.func @transform_4(%arg0: i32) -> (i32, i32) {
    %c0_i32 = arith.constant 0 : i32
    %c0_i32_0 = arith.constant 0 : i32
    %c0_i32_1 = arith.constant 0 : i32
    return %c0_i32, %c0_i32_0 : i32, i32
  }
}

</mosaic_0001>

<bundles_post_ra>
// kernel: lstm_forward.4
= control target key start
LH: loop header
LB: loop body
LE: loop exit
PB: predicated region body
PF: predicated region fallthrough
CT: control target
= control target key end

     0   :  { %8 = vsyncpa [#allocation3], 0  ;;  %s342_s15 = smov [#allocation2]   ;;  %s343_s17 = smov 512   ;;  %s531_s0 = inlined_call_operand.vmem [shape: f32[64,128], index: 0, kind: input, shape index: {}]   ;;  %s532_s1 = inlined_call_operand.hbm [shape: f32[128,512], index: 1, kind: input, shape index: {}]   ;;  %s533_s2 = inlined_call_operand.vmem [shape: f32[1,512], index: 2, kind: input, shape index: {}]   ;;  %s534_s3 = inlined_call_operand.vmem [shape: f32[64,512], index: 3, kind: output, shape index: {}]  }
   0x1   :  { %s15_s14 = sshll.u32 %s532_s1, 4  ;;  %s17_s16 = sshll.u32 %s342_s15, 4  ;;  %s16_s14 = int_to_ptr.hbm [resolvable:$true] %s15_s14  ;;  %s18_s16 = int_to_ptr.vmem [resolvable:$true] %s17_s16 }
   0x2   :  { %s344_s18 = smov 32  }
   0x3   :  { %23 = dma.hbm_to_vmem [thread:$0]  %s16_s14, 8192, %s18_s16, [#allocation3], %s343_s17, %s343_s17, %s344_s18  }
   0x4   :  { %340 = dma.done.wait [#allocation3], 8192  }
   0x5   :  { %341 = vsyncadd [#allocation3], 4294959104  ;;  %v100_v0 = vld [vmem:[#allocation2 + $0x1f0] sm:$0xff]  ;;  %v101_v1 = vld [vmem:[#allocation2 + $0x1f8] sm:$0xff] }
   0x6   :  { %v96_v2 = vld [vmem:[#allocation2 + $0x1d0] sm:$0xff]  ;;  %194 = vmatpush.msra.mxu2 %v100_v0  ;;  %235 = vmatpush.msra.mxu3 %v101_v1  ;;  %v97_v3 = vld [vmem:[#allocation2 + $0x1d8] sm:$0xff]  ;;  %v98_v6 = vld [vmem:[#allocation2 + $0x1e0] sm:$0xff] }
   0x7   :  { %v92_v4 = vld [vmem:[#allocation2 + $0x1b0] sm:$0xff]  ;;  %v93_v5 = vld [vmem:[#allocation2 + $0x1b8] sm:$0xff]  ;;  %v99_v7 = vld [vmem:[#allocation2 + $0x1e8] sm:$0xff]  ;;  %112 = vmatpush.msra.mxu0 %v98_v6 }
   0x8   :  { %195 = vmatpush.msra.mxu2 %v96_v2  ;;  %236 = vmatpush.msra.mxu3 %v97_v3  ;;  %v94_v8 = vld [vmem:[#allocation2 + $0x1c0] sm:$0xff]  ;;  %v95_v9 = vld [vmem:[#allocation2 + $0x1c8] sm:$0xff]  ;;  %v88_v10 = vld [vmem:[#allocation2 + $0x190] sm:$0xff] }
   0x9   :  { %153 = vmatpush.msra.mxu1 %v99_v7  ;;  %v89_v11 = vld [vmem:[#allocation2 + $0x198] sm:$0xff]  ;;  %v90_v12 = vld [vmem:[#allocation2 + $0x1a0] sm:$0xff]  ;;  %v91_v13 = vld [vmem:[#allocation2 + $0x1a8] sm:$0xff]  ;;  %113 = vmatpush.msra.mxu0 %v94_v8 }
   0xa   :  { %196 = vmatpush.msra.mxu2 %v92_v4  ;;  %237 = vmatpush.msra.mxu3 %v93_v5  ;;  %v84_v14 = vld [vmem:[#allocation2 + $0x170] sm:$0xff]  ;;  %v85_v15 = vld [vmem:[#allocation2 + $0x178] sm:$0xff]  ;;  %v86_v16 = vld [vmem:[#allocation2 + $0x180] sm:$0xff] }
   0xb   :  { %154 = vmatpush.msra.mxu1 %v95_v9  ;;  %v87_v17 = vld [vmem:[#allocation2 + $0x188] sm:$0xff]  ;;  %114 = vmatpush.msra.mxu0 %v90_v12  ;;  %v80_v18 = vld [vmem:[#allocation2 + $0x150] sm:$0xff]  ;;  %v81_v19 = vld [vmem:[#allocation2 + $0x158] sm:$0xff] }
   0xc   :  { %197 = vmatpush.msra.mxu2 %v88_v10  ;;  %238 = vmatpush.msra.mxu3 %v89_v11  ;;  %v82_v20 = vld [vmem:[#allocation2 + $0x160] sm:$0xff]  ;;  %v83_v21 = vld [vmem:[#allocation2 + $0x168] sm:$0xff]  ;;  %v76_v22 = vld [vmem:[#allocation2 + $0x130] sm:$0xff] }
   0xd   :  { %155 = vmatpush.msra.mxu1 %v91_v13  ;;  %115 = vmatpush.msra.mxu0 %v86_v16  ;;  %v77_v23 = vld [vmem:[#allocation2 + $0x138] sm:$0xff]  ;;  %v78_v24 = vld [vmem:[#allocation2 + $0x140] sm:$0xff]  ;;  %v79_v25 = vld [vmem:[#allocation2 + $0x148] sm:$0xff] }
   0xe   :  { %198 = vmatpush.msra.mxu2 %v84_v14  ;;  %239 = vmatpush.msra.mxu3 %v85_v15  ;;  %v72_v26 = vld [vmem:[#allocation2 + $0x110] sm:$0xff]  ;;  %v73_v27 = vld [vmem:[#allocation2 + $0x118] sm:$0xff]  ;;  %v74_v28 = vld [vmem:[#allocation2 + $0x120] sm:$0xff] }
   0xf   :  { %156 = vmatpush.msra.mxu1 %v87_v17  ;;  %116 = vmatpush.msra.mxu0 %v82_v20  ;;  %v75_v29 = vld [vmem:[#allocation2 + $0x128] sm:$0xff]  ;;  %v68_v30 = vld [vmem:[#allocation2 + $0xf0] sm:$0xff]  ;;  %v69_v31 = vld [vmem:[#allocation2 + $0xf8] sm:$0xff] }
  0x10   :  { %199 = vmatpush.msra.mxu2 %v80_v18  ;;  %240 = vmatpush.msra.mxu3 %v81_v19  ;;  %v70_v32 = vld [vmem:[#allocation2 + $0x100] sm:$0xff]  ;;  %v71_v33 = vld [vmem:[#allocation2 + $0x108] sm:$0xff]  ;;  %v64_v34 = vld [vmem:[#allocation2 + $0xd0] sm:$0xff] }
  0x11   :  { %157 = vmatpush.msra.mxu1 %v83_v21  ;;  %117 = vmatpush.msra.mxu0 %v78_v24  ;;  %v65_v35 = vld [vmem:[#allocation2 + $0xd8] sm:$0xff]  ;;  %v66_v36 = vld [vmem:[#allocation2 + $0xe0] sm:$0xff]  ;;  %v67_v37 = vld [vmem:[#allocation2 + $0xe8] sm:$0xff] }
  0x12   :  { %200 = vmatpush.msra.mxu2 %v76_v22  ;;  %241 = vmatpush.msra.mxu3 %v77_v23  ;;  %v60_v38 = vld [vmem:[#allocation2 + $0xb0] sm:$0xff]  ;;  %v61_v39 = vld [vmem:[#allocation2 + $0xb8] sm:$0xff]  ;;  %v62_v40 = vld [vmem:[#allocation2 + $0xc0] sm:$0xff] }
  0x13   :  { %158 = vmatpush.msra.mxu1 %v79_v25  ;;  %118 = vmatpush.msra.mxu0 %v74_v28  ;;  %v63_v41 = vld [vmem:[#allocation2 + $0xc8] sm:$0xff]  ;;  %v56_v42 = vld [vmem:[#allocation2 + $0x90] sm:$0xff]  ;;  %v57_v43 = vld [vmem:[#allocation2 + $0x98] sm:$0xff] }
  0x14   :  { %201 = vmatpush.msra.mxu2 %v72_v26  ;;  %242 = vmatpush.msra.mxu3 %v73_v27  ;;  %v58_v44 = vld [vmem:[#allocation2 + $0xa0] sm:$0xff]  ;;  %v59_v45 = vld [vmem:[#allocation2 + $0xa8] sm:$0xff]  ;;  %v52_v46 = vld [vmem:[#allocation2 + $0x70] sm:$0xff] }
  0x15   :  { %159 = vmatpush.msra.mxu1 %v75_v29  ;;  %119 = vmatpush.msra.mxu0 %v70_v32  ;;  %v53_v47 = vld [vmem:[#allocation2 + $0x78] sm:$0xff]  ;;  %v54_v48 = vld [vmem:[#allocation2 + $0x80] sm:$0xff]  ;;  %v55_v49 = vld [vmem:[#allocation2 + $0x88] sm:$0xff] }
  0x16   :  { %202 = vmatpush.msra.mxu2 %v68_v30  ;;  %243 = vmatpush.msra.mxu3 %v69_v31  ;;  %v48_v50 = vld [vmem:[#allocation2 + $0x50] sm:$0xff]  ;;  %v49_v51 = vld [vmem:[#allocation2 + $0x58] sm:$0xff]  ;;  %v50_v52 = vld [vmem:[#allocation2 + $0x60] sm:$0xff] }
  0x17   :  { %160 = vmatpush.msra.mxu1 %v71_v33  ;;  %120 = vmatpush.msra.mxu0 %v66_v36  ;;  %v51_v53 = vld [vmem:[#allocation2 + $0x68] sm:$0xff]  ;;  %v44_v54 = vld [vmem:[#allocation2 + $0x30] sm:$0xff]  ;;  %v45_v55 = vld [vmem:[#allocation2 + $0x38] sm:$0xff] }
  0x18   :  { %203 = vmatpush.msra.mxu2 %v64_v34  ;;  %244 = vmatpush.msra.mxu3 %v65_v35  ;;  %v46_v56 = vld [vmem:[#allocation2 + $0x40] sm:$0xff]  ;;  %v47_v57 = vld [vmem:[#allocation2 + $0x48] sm:$0xff]  ;;  %v40_v58 = vld [vmem:[#allocation2 + $0x10] sm:$0xff] }
  0x19   :  { %161 = vmatpush.msra.mxu1 %v67_v37  ;;  %121 = vmatpush.msra.mxu0 %v62_v40  ;;  %v41_v59 = vld [vmem:[#allocation2 + $0x18] sm:$0xff]  ;;  %v30_v60 = vld [vmem:[%s531_s0] sm:$0xff]  ;;  %v43_v62 = vld [vmem:[#allocation2 + $0x28] sm:$0xff] }
  0x1a   :  { %204 = vmatpush.msra.mxu2 %v60_v38  ;;  %245 = vmatpush.msra.mxu3 %v61_v39  ;;  %v42_v61 = vld [vmem:[#allocation2 + $0x20] sm:$0xff]  ;;  %v39_v0 = vld [vmem:[#allocation2 + $0x8] sm:$0xff]  ;;  %v32_v2 = vld [vmem:[%s531_s0 + $0x10] sm:$0xff] }
  0x1b   :  { %162 = vmatpush.msra.mxu1 %v63_v41  ;;  %122 = vmatpush.msra.mxu0 %v58_v44  ;;  %v38_v63 = vld [vmem:[#allocation2] sm:$0xff]  ;;  %v31_v1 = vld [vmem:[%s531_s0 + $0x8] sm:$0xff]  ;;  %v33_v3 = vld [vmem:[%s531_s0 + $0x18] sm:$0xff] }
  0x1c   :  { %205 = vmatpush.msra.mxu2 %v56_v42  ;;  %246 = vmatpush.msra.mxu3 %v57_v43  ;;  %v34_v4 = vld [vmem:[%s531_s0 + $0x20] sm:$0xff]  ;;  %v35_v5 = vld [vmem:[%s531_s0 + $0x28] sm:$0xff]  ;;  %v36_v6 = vld [vmem:[%s531_s0 + $0x30] sm:$0xff] }
  0x1d   :  { %163 = vmatpush.msra.mxu1 %v59_v45  ;;  %123 = vmatpush.msra.mxu0 %v54_v48  ;;  %v37_v7 = vld [vmem:[%s531_s0 + $0x38] sm:$0xff]  ;;  %v102_v8 = vld [vmem:[%s533_s2] sm:$0xf] }
  0x1e   :  { %206 = vmatpush.msra.mxu2 %v52_v46  ;;  %247 = vmatpush.msra.mxu3 %v53_v47  ;;  %v395_v9 = vperm.slane %v102_v8, 0  ;;  %v397_v10 = vperm.slane %v102_v8, 1  ;;  %v399_v11 = vperm.slane %v102_v8, 2  ;;  %v401_v12 = vperm.slane %v102_v8, 3 }
  0x1f   :  { %164 = vmatpush.msra.mxu1 %v55_v49  ;;  %124 = vmatpush.msra.mxu0 %v50_v52 }
  0x20   :  { %207 = vmatpush.msra.mxu2 %v48_v50  ;;  %248 = vmatpush.msra.mxu3 %v49_v51 }
  0x21   :  { %165 = vmatpush.msra.mxu1 %v51_v53  ;;  %125 = vmatpush.msra.mxu0 %v46_v56 }
  0x22   :  { %208 = vmatpush.msra.mxu2 %v44_v54  ;;  %249 = vmatpush.msra.mxu3 %v45_v55 }
  0x23   :  { %166 = vmatpush.msra.mxu1 %v47_v57  ;;  %126 = vmatpush.msra.mxu0 %v42_v61 }
  0x24   :  { %209 = vmatpush.msra.mxu2 %v40_v58  ;;  %250 = vmatpush.msra.mxu3 %v41_v59 }
  0x25   :  { %210 = vmatmul.f32.vlgmr.msra.gmra.mxu2 %v30_v60  ;;  %251 = vmatmul.f32.vlgmr.msra.gmra.mxu3 %v30_v60 }
  0x26   :  { %167 = vmatpush.msra.mxu1 %v43_v62  ;;  %127 = vmatpush.msra.mxu0 %v38_v63 }
  0x27   :  { %128 = vmatmul.f32.vlgmr.msra.gmra.mxu0 %v30_v60 }
  0x28   :  { %168 = vmatpush.msra.mxu1 %v39_v0 }
  0x29   :  { %169 = vmatmul.f32.vlgmr.msra.gmra.mxu1 %v30_v60 }
  0x2d   :  { %213 = vmatmul.f32.gmra.mxu2 %v31_v1  ;;  %254 = vmatmul.f32.gmra.mxu3 %v31_v1 }
  0x2f   :  { %131 = vmatmul.f32.gmra.mxu0 %v31_v1 }
  0x31   :  { %172 = vmatmul.f32.gmra.mxu1 %v31_v1 }
  0x35   :  { %216 = vmatmul.f32.gmra.mxu2 %v32_v2  ;;  %257 = vmatmul.f32.gmra.mxu3 %v32_v2 }
  0x37   :  { %134 = vmatmul.f32.gmra.mxu0 %v32_v2 }
  0x39   :  { %175 = vmatmul.f32.gmra.mxu1 %v32_v2 }
  0x3d   :  { %219 = vmatmul.f32.gmra.mxu2 %v33_v3  ;;  %260 = vmatmul.f32.gmra.mxu3 %v33_v3 }
  0x3f   :  { %137 = vmatmul.f32.gmra.mxu0 %v33_v3 }
  0x41   :  { %178 = vmatmul.f32.gmra.mxu1 %v33_v3 }
  0x45   :  { %222 = vmatmul.f32.gmra.mxu2 %v34_v4  ;;  %263 = vmatmul.f32.gmra.mxu3 %v34_v4 }
  0x47   :  { %140 = vmatmul.f32.gmra.mxu0 %v34_v4 }
  0x49   :  { %181 = vmatmul.f32.gmra.mxu1 %v34_v4 }
  0x4d   :  { %225 = vmatmul.f32.gmra.mxu2 %v35_v5  ;;  %266 = vmatmul.f32.gmra.mxu3 %v35_v5 }
  0x4f   :  { %143 = vmatmul.f32.gmra.mxu0 %v35_v5 }
  0x51   :  { %184 = vmatmul.f32.gmra.mxu1 %v35_v5 }
  0x55   :  { %228 = vmatmul.f32.gmra.mxu2 %v36_v6  ;;  %269 = vmatmul.f32.gmra.mxu3 %v36_v6 }
  0x57   :  { %146 = vmatmul.f32.gmra.mxu0 %v36_v6 }
  0x59   :  { %187 = vmatmul.f32.gmra.mxu1 %v36_v6 }
  0x5d   :  { %231 = vmatmul.f32.gmra.mxu2 %v37_v7  ;;  %272 = vmatmul.f32.gmra.mxu3 %v37_v7 }
  0x5f   :  { %149 = vmatmul.f32.gmra.mxu0 %v37_v7 }
  0x61   :  { %190 = vmatmul.f32.gmra.mxu1 %v37_v7 }
  0xa4   :  { %v129_v13 = vpop.f32.mrf.mxu0 }
  0xa5   :  { %v130_v15 = vadd.f32 %v129_v13, %v395_v9 }
  0xa6   :  { %v170_v14 = vpop.f32.mrf.mxu1 }
  0xa7   :  { %v171_v16 = vadd.f32 %v170_v14, %v397_v10  ;;  %276 = vst [vmem:[%s534_s3] sm:$0xff] %v130_v15 }
  0xa8   :  { %v211_v17 = vpop.f32.mrf.mxu2  ;;  %v252_v18 = vpop.f32.mrf.mxu3 }
  0xa9   :  { %v212_v19 = vadd.f32 %v211_v17, %v399_v11  ;;  %v253_v20 = vadd.f32 %v252_v18, %v401_v12  ;;  %277 = vst [vmem:[%s534_s3 + $0x8] sm:$0xff] %v171_v16 }
  0xab   :  { %278 = vst [vmem:[%s534_s3 + $0x10] sm:$0xff] %v212_v19 }
  0xac   :  { %279 = vst [vmem:[%s534_s3 + $0x18] sm:$0xff] %v253_v20  ;;  %v132_v21 = vpop.f32.mrf.mxu0 }
  0xad   :  { %v133_v23 = vadd.f32 %v132_v21, %v395_v9 }
  0xae   :  { %v173_v22 = vpop.f32.mrf.mxu1 }
  0xaf   :  { %v174_v24 = vadd.f32 %v173_v22, %v397_v10  ;;  %280 = vst [vmem:[%s534_s3 + $0x20] sm:$0xff] %v133_v23 }
  0xb0   :  { %v214_v25 = vpop.f32.mrf.mxu2  ;;  %v255_v26 = vpop.f32.mrf.mxu3 }
  0xb1   :  { %v215_v27 = vadd.f32 %v214_v25, %v399_v11  ;;  %v256_v28 = vadd.f32 %v255_v26, %v401_v12  ;;  %281 = vst [vmem:[%s534_s3 + $0x28] sm:$0xff] %v174_v24 }
  0xb3   :  { %282 = vst [vmem:[%s534_s3 + $0x30] sm:$0xff] %v215_v27 }
  0xb4   :  { %283 = vst [vmem:[%s534_s3 + $0x38] sm:$0xff] %v256_v28  ;;  %v135_v29 = vpop.f32.mrf.mxu0 }
  0xb5   :  { %v136_v31 = vadd.f32 %v135_v29, %v395_v9 }
  0xb6   :  { %v176_v30 = vpop.f32.mrf.mxu1 }
  0xb7   :  { %v177_v32 = vadd.f32 %v176_v30, %v397_v10  ;;  %284 = vst [vmem:[%s534_s3 + $0x40] sm:$0xff] %v136_v31 }
  0xb8   :  { %v217_v33 = vpop.f32.mrf.mxu2  ;;  %v258_v34 = vpop.f32.mrf.mxu3 }
  0xb9   :  { %v218_v35 = vadd.f32 %v217_v33, %v399_v11  ;;  %v259_v36 = vadd.f32 %v258_v34, %v401_v12  ;;  %285 = vst [vmem:[%s534_s3 + $0x48] sm:$0xff] %v177_v32 }
  0xbb   :  { %286 = vst [vmem:[%s534_s3 + $0x50] sm:$0xff] %v218_v35 }
  0xbc   :  { %287 = vst [vmem:[%s534_s3 + $0x58] sm:$0xff] %v259_v36  ;;  %v138_v37 = vpop.f32.mrf.mxu0 }
  0xbd   :  { %v139_v39 = vadd.f32 %v138_v37, %v395_v9 }
  0xbe   :  { %v179_v38 = vpop.f32.mrf.mxu1 }
  0xbf   :  { %v180_v40 = vadd.f32 %v179_v38, %v397_v10  ;;  %288 = vst [vmem:[%s534_s3 + $0x60] sm:$0xff] %v139_v39 }
  0xc0   :  { %v220_v41 = vpop.f32.mrf.mxu2  ;;  %v261_v42 = vpop.f32.mrf.mxu3 }
  0xc1   :  { %v221_v43 = vadd.f32 %v220_v41, %v399_v11  ;;  %v262_v44 = vadd.f32 %v261_v42, %v401_v12  ;;  %289 = vst [vmem:[%s534_s3 + $0x68] sm:$0xff] %v180_v40 }
  0xc3   :  { %290 = vst [vmem:[%s534_s3 + $0x70] sm:$0xff] %v221_v43 }
  0xc4   :  { %291 = vst [vmem:[%s534_s3 + $0x78] sm:$0xff] %v262_v44  ;;  %v141_v45 = vpop.f32.mrf.mxu0 }
  0xc5   :  { %v142_v47 = vadd.f32 %v141_v45, %v395_v9 }
  0xc6   :  { %v182_v46 = vpop.f32.mrf.mxu1 }
  0xc7   :  { %v183_v48 = vadd.f32 %v182_v46, %v397_v10  ;;  %292 = vst [vmem:[%s534_s3 + $0x80] sm:$0xff] %v142_v47 }
  0xc8   :  { %v223_v49 = vpop.f32.mrf.mxu2  ;;  %v264_v50 = vpop.f32.mrf.mxu3 }
  0xc9   :  { %v224_v51 = vadd.f32 %v223_v49, %v399_v11  ;;  %v265_v52 = vadd.f32 %v264_v50, %v401_v12  ;;  %293 = vst [vmem:[%s534_s3 + $0x88] sm:$0xff] %v183_v48 }
  0xcb   :  { %294 = vst [vmem:[%s534_s3 + $0x90] sm:$0xff] %v224_v51 }
  0xcc   :  { %295 = vst [vmem:[%s534_s3 + $0x98] sm:$0xff] %v265_v52  ;;  %v144_v53 = vpop.f32.mrf.mxu0 }
  0xcd   :  { %v145_v55 = vadd.f32 %v144_v53, %v395_v9 }
  0xce   :  { %v185_v54 = vpop.f32.mrf.mxu1 }
  0xcf   :  { %v186_v56 = vadd.f32 %v185_v54, %v397_v10  ;;  %296 = vst [vmem:[%s534_s3 + $0xa0] sm:$0xff] %v145_v55 }
  0xd0   :  { %v226_v57 = vpop.f32.mrf.mxu2  ;;  %v267_v58 = vpop.f32.mrf.mxu3 }
  0xd1   :  { %v227_v59 = vadd.f32 %v226_v57, %v399_v11  ;;  %v268_v60 = vadd.f32 %v267_v58, %v401_v12  ;;  %297 = vst [vmem:[%s534_s3 + $0xa8] sm:$0xff] %v186_v56 }
  0xd3   :  { %298 = vst [vmem:[%s534_s3 + $0xb0] sm:$0xff] %v227_v59 }
  0xd4   :  { %299 = vst [vmem:[%s534_s3 + $0xb8] sm:$0xff] %v268_v60  ;;  %v147_v61 = vpop.f32.mrf.mxu0 }
  0xd5   :  { %v148_v63 = vadd.f32 %v147_v61, %v395_v9 }
  0xd6   :  { %v188_v62 = vpop.f32.mrf.mxu1 }
  0xd7   :  { %v189_v0 = vadd.f32 %v188_v62, %v397_v10  ;;  %300 = vst [vmem:[%s534_s3 + $0xc0] sm:$0xff] %v148_v63 }
  0xd8   :  { %v229_v1 = vpop.f32.mrf.mxu2  ;;  %v270_v2 = vpop.f32.mrf.mxu3 }
  0xd9   :  { %v230_v3 = vadd.f32 %v229_v1, %v399_v11  ;;  %v271_v4 = vadd.f32 %v270_v2, %v401_v12  ;;  %301 = vst [vmem:[%s534_s3 + $0xc8] sm:$0xff] %v189_v0 }
  0xdb   :  { %302 = vst [vmem:[%s534_s3 + $0xd0] sm:$0xff] %v230_v3 }
  0xdc   :  { %303 = vst [vmem:[%s534_s3 + $0xd8] sm:$0xff] %v271_v4  ;;  %v150_v5 = vpop.f32.mrf.mxu0 }
  0xdd   :  { %v151_v7 = vadd.f32 %v150_v5, %v395_v9 }
  0xde   :  { %v191_v6 = vpop.f32.mrf.mxu1 }
  0xdf   :  { %v192_v8 = vadd.f32 %v191_v6, %v397_v10  ;;  %304 = vst [vmem:[%s534_s3 + $0xe0] sm:$0xff] %v151_v7 }
  0xe0   :  { %v232_v13 = vpop.f32.mrf.mxu2  ;;  %v273_v14 = vpop.f32.mrf.mxu3 }
  0xe1   :  { %v233_v15 = vadd.f32 %v232_v13, %v399_v11  ;;  %v274_v16 = vadd.f32 %v273_v14, %v401_v12  ;;  %305 = vst [vmem:[%s534_s3 + $0xe8] sm:$0xff] %v192_v8 }
  0xe3   :  { %306 = vst [vmem:[%s534_s3 + $0xf0] sm:$0xff] %v233_v15 }
  0xe4   :  { %307 = vst [vmem:[%s534_s3 + $0xf8] sm:$0xff] %v274_v16 }
  0xe5   :  { %312 = vsyncpa [#allocation3], 1 }

// kernel: lstm_forward.5
= control target key start
LH: loop header
LB: loop body
LE: loop exit
PB: predicated region body
PF: predicated region fallthrough
CT: control target
= control target key end

     0   :  { %7 = vsyncpa [#allocation5], 0  ;;  %s1617_s12 = smov [#allocation4]   ;;  %s1618_s14 = smov 512   ;;  %s2555_s0 = inlined_call_operand.vmem [shape: f32[8,8,512], index: 0, kind: input, shape index: {}]   ;;  %s2556_s1 = inlined_call_operand.hbm [shape: f32[128,512], index: 1, kind: input, shape index: {}]   ;;  %s2557_s2 = inlined_call_operand.vmem [shape: f32[8,8,128], index: 2, kind: output, shape index: {}]  }
   0x1   :  { %s14_s11 = sshll.u32 %s2556_s1, 4  ;;  %s16_s13 = sshll.u32 %s1617_s12, 4  ;;  %s15_s11 = int_to_ptr.hbm [resolvable:$true] %s14_s11  ;;  %s17_s13 = int_to_ptr.vmem [resolvable:$true] %s16_s13 }
   0x2   :  { %s1619_s15 = smov 32  }
   0x3   :  { %22 = dma.hbm_to_vmem [thread:$0]  %s15_s11, 8192, %s17_s13, [#allocation5], %s1618_s14, %s1618_s14, %s1619_s15  }
   0x4   :  { %1615 = dma.done.wait [#allocation5], 8192  }
   0x5   :  { %1616 = vsyncadd [#allocation5], 4294959104  ;;  %v1639_v0 = vld [vmem:[#allocation4 + $0x1e0] sm:$0xff]  ;;  %v1641_v1 = vld [vmem:[#allocation4 + $0x1e8] sm:$0xff]  ;;  %v1620_v60 = vmov 0.0  }
   0x6   :  { %2664 = vst [vmem:[#allocation7_spill] sm:$0xff] %v1639_v0  ;;  %v1643_v2 = vld [vmem:[#allocation4 + $0x1f8] sm:$0xff]  ;;  %103 = vmatpush.msra.mxu0 %v1639_v0  ;;  %123 = vmatpush.msra.mxu1 %v1641_v1  ;;  %v1647_v3 = vld [vmem:[#allocation4 + $0x1c0] sm:$0xff]  ;;  %v1649_v4 = vld [vmem:[#allocation4 + $0x1c8] sm:$0xff] }
   0x7   :  { %v1651_v5 = vld [vmem:[#allocation4 + $0x1d8] sm:$0xff]  ;;  %163 = vmatpush.msra.mxu3 %v1643_v2  ;;  %v1654_v6 = vld [vmem:[#allocation4 + $0x1a0] sm:$0xff]  ;;  %v1656_v7 = vld [vmem:[#allocation4 + $0x1a8] sm:$0xff] }
   0x8   :  { %104 = vmatpush.msra.mxu0 %v1647_v3  ;;  %124 = vmatpush.msra.mxu1 %v1649_v4  ;;  %v1660_v8 = vld [vmem:[#allocation4 + $0x1b8] sm:$0xff]  ;;  %v1663_v9 = vld [vmem:[#allocation4 + $0x180] sm:$0xff]  ;;  %v1665_v10 = vld [vmem:[#allocation4 + $0x188] sm:$0xff] }
   0x9   :  { %164 = vmatpush.msra.mxu3 %v1651_v5  ;;  %v1669_v11 = vld [vmem:[#allocation4 + $0x198] sm:$0xff]  ;;  %v1672_v12 = vld [vmem:[#allocation4 + $0x160] sm:$0xff]  ;;  %v1674_v13 = vld [vmem:[#allocation4 + $0x168] sm:$0xff] }
   0xa   :  { %105 = vmatpush.msra.mxu0 %v1654_v6  ;;  %125 = vmatpush.msra.mxu1 %v1656_v7  ;;  %v1678_v14 = vld [vmem:[#allocation4 + $0x178] sm:$0xff]  ;;  %v1681_v15 = vld [vmem:[#allocation4 + $0x140] sm:$0xff]  ;;  %v1683_v16 = vld [vmem:[#allocation4 + $0x148] sm:$0xff] }
   0xb   :  { %165 = vmatpush.msra.mxu3 %v1660_v8  ;;  %v1685_v17 = vld [vmem:[#allocation4 + $0x1f0] sm:$0xff]  ;;  %v1689_v18 = vld [vmem:[#allocation4 + $0x158] sm:$0xff]  ;;  %v1694_v20 = vld [vmem:[#allocation4 + $0x120] sm:$0xff] }
   0xc   :  { %106 = vmatpush.msra.mxu0 %v1663_v9  ;;  %126 = vmatpush.msra.mxu1 %v1665_v10  ;;  %v1691_v19 = vld [vmem:[#allocation4 + $0x1d0] sm:$0xff]  ;;  %v1696_v21 = vld [vmem:[#allocation4 + $0x128] sm:$0xff]  ;;  %v1701_v22 = vld [vmem:[#allocation4 + $0x138] sm:$0xff] }
   0xd   :  { %166 = vmatpush.msra.mxu3 %v1669_v11  ;;  %143 = vmatpush.msra.mxu2 %v1685_v17  ;;  %v1703_v23 = vld [vmem:[#allocation4 + $0x1b0] sm:$0xff]  ;;  %v1706_v24 = vld [vmem:[#allocation4 + $0x100] sm:$0xff]  ;;  %v1708_v25 = vld [vmem:[#allocation4 + $0x108] sm:$0xff] }
   0xe   :  { %107 = vmatpush.msra.mxu0 %v1672_v12  ;;  %127 = vmatpush.msra.mxu1 %v1674_v13  ;;  %v1713_v26 = vld [vmem:[#allocation4 + $0x118] sm:$0xff]  ;;  %v1715_v27 = vld [vmem:[#allocation4 + $0x190] sm:$0xff]  ;;  %v1718_v28 = vld [vmem:[#allocation4 + $0xe0] sm:$0xff] }
   0xf   :  { %167 = vmatpush.msra.mxu3 %v1678_v14  ;;  %144 = vmatpush.msra.mxu2 %v1691_v19  ;;  %v1720_v29 = vld [vmem:[#allocation4 + $0xe8] sm:$0xff]  ;;  %v1725_v30 = vld [vmem:[#allocation4 + $0xf8] sm:$0xff]  ;;  %v1727_v31 = vld [vmem:[#allocation4 + $0x170] sm:$0xff] }
  0x10   :  { %108 = vmatpush.msra.mxu0 %v1681_v15  ;;  %128 = vmatpush.msra.mxu1 %v1683_v16  ;;  %v1730_v32 = vld [vmem:[#allocation4 + $0xc0] sm:$0xff]  ;;  %v1732_v33 = vld [vmem:[#allocation4 + $0xc8] sm:$0xff]  ;;  %v1737_v34 = vld [vmem:[#allocation4 + $0xd8] sm:$0xff] }
  0x11   :  { %168 = vmatpush.msra.mxu3 %v1689_v18  ;;  %145 = vmatpush.msra.mxu2 %v1703_v23  ;;  %2665 = vst [vmem:[#allocation8_spill] sm:$0xff] %v1737_v34  ;;  %v1739_v35 = vld [vmem:[#allocation4 + $0x150] sm:$0xff]  ;;  %v1742_v36 = vld [vmem:[#allocation4 + $0xa0] sm:$0xff]  ;;  %v1744_v37 = vld [vmem:[#allocation4 + $0xa8] sm:$0xff] }
  0x12   :  { %109 = vmatpush.msra.mxu0 %v1694_v20  ;;  %129 = vmatpush.msra.mxu1 %v1696_v21  ;;  %2666 = vst [vmem:[#allocation9_spill] sm:$0xff] %v1742_v36  ;;  %v1749_v38 = vld [vmem:[#allocation4 + $0xb8] sm:$0xff]  ;;  %v1751_v39 = vld [vmem:[#allocation4 + $0x130] sm:$0xff]  ;;  %v1754_v40 = vld [vmem:[#allocation4 + $0x80] sm:$0xff] }
  0x13   :  { %169 = vmatpush.msra.mxu3 %v1701_v22  ;;  %146 = vmatpush.msra.mxu2 %v1715_v27  ;;  %2667 = vst [vmem:[#allocation10_spill] sm:$0xff] %v1744_v37  ;;  %v1756_v41 = vld [vmem:[#allocation4 + $0x88] sm:$0xff]  ;;  %v1761_v42 = vld [vmem:[#allocation4 + $0x98] sm:$0xff]  ;;  %v1763_v43 = vld [vmem:[#allocation4 + $0x110] sm:$0xff] }
  0x14   :  { %110 = vmatpush.msra.mxu0 %v1706_v24  ;;  %130 = vmatpush.msra.mxu1 %v1708_v25  ;;  %2668 = vst [vmem:[#allocation11_spill] sm:$0xff] %v1749_v38  ;;  %v1766_v44 = vld [vmem:[#allocation4 + $0x60] sm:$0xff]  ;;  %v1768_v45 = vld [vmem:[#allocation4 + $0x68] sm:$0xff]  ;;  %v1773_v46 = vld [vmem:[#allocation4 + $0x78] sm:$0xff] }
  0x15   :  { %170 = vmatpush.msra.mxu3 %v1713_v26  ;;  %147 = vmatpush.msra.mxu2 %v1727_v31  ;;  %2669 = vst [vmem:[#allocation12_spill] sm:$0xff] %v1754_v40  ;;  %v1775_v47 = vld [vmem:[#allocation4 + $0xf0] sm:$0xff]  ;;  %v1778_v48 = vld [vmem:[#allocation4 + $0x40] sm:$0xff]  ;;  %v1780_v49 = vld [vmem:[#allocation4 + $0x48] sm:$0xff] }
  0x16   :  { %111 = vmatpush.msra.mxu0 %v1718_v28  ;;  %131 = vmatpush.msra.mxu1 %v1720_v29  ;;  %2670 = vst [vmem:[#allocation13_spill] sm:$0xff] %v1756_v41  ;;  %v1785_v50 = vld [vmem:[#allocation4 + $0x58] sm:$0xff]  ;;  %v1787_v51 = vld [vmem:[#allocation4 + $0xd0] sm:$0xff]  ;;  %v1790_v52 = vld [vmem:[#allocation4 + $0x20] sm:$0xff] }
  0x17   :  { %171 = vmatpush.msra.mxu3 %v1725_v30  ;;  %148 = vmatpush.msra.mxu2 %v1739_v35  ;;  %2671 = vst [vmem:[#allocation14_spill] sm:$0xff] %v1761_v42  ;;  %v1792_v53 = vld [vmem:[#allocation4 + $0x28] sm:$0xff]  ;;  %v1797_v54 = vld [vmem:[#allocation4 + $0x38] sm:$0xff]  ;;  %v1799_v55 = vld [vmem:[#allocation4 + $0xb0] sm:$0xff] }
  0x18   :  { %112 = vmatpush.msra.mxu0 %v1730_v32  ;;  %132 = vmatpush.msra.mxu1 %v1732_v33  ;;  %2672 = vst [vmem:[#allocation15_spill] sm:$0xff] %v1766_v44  ;;  %v1802_v56 = vld [vmem:[#allocation4] sm:$0xff]  ;;  %v1804_v57 = vld [vmem:[#allocation4 + $0x8] sm:$0xff]  ;;  %v1809_v58 = vld [vmem:[#allocation4 + $0x18] sm:$0xff] }
  0x19   :  { %172 = vmatpush.msra.mxu3 %v1737_v34  ;;  %2673 = vst [vmem:[#allocation16_spill] sm:$0xff] %v1768_v45  ;;  %149 = vmatpush.msra.mxu2 %v1751_v39  ;;  %v1815_v59 = vld [vmem:[#allocation4 + $0x90] sm:$0xff] }
  0x1a   :  { %113 = vmatpush.msra.mxu0 %v1742_v36  ;;  %133 = vmatpush.msra.mxu1 %v1744_v37  ;;  %2674 = vst [vmem:[#allocation17_spill] sm:$0xff] %v1773_v46  ;;  %v1818_v61 = vld [vmem:[#allocation4 + $0x70] sm:$0xff] }
  0x1b   :  { %173 = vmatpush.msra.mxu3 %v1749_v38  ;;  %2675 = vst [vmem:[#allocation18_spill] sm:$0xff] %v1778_v48  ;;  %150 = vmatpush.msra.mxu2 %v1763_v43  ;;  %v1822_v62 = vld [vmem:[#allocation4 + $0x50] sm:$0xff] }
  0x1c   :  { %114 = vmatpush.msra.mxu0 %v1754_v40  ;;  %134 = vmatpush.msra.mxu1 %v1756_v41  ;;  %2676 = vst [vmem:[#allocation19_spill] sm:$0xff] %v1780_v49  ;;  %v1828_v63 = vld [vmem:[#allocation4 + $0x30] sm:$0xff] }
  0x1d   :  { %174 = vmatpush.msra.mxu3 %v1761_v42  ;;  %2677 = vst [vmem:[#allocation20_spill] sm:$0xff] %v1785_v50  ;;  %151 = vmatpush.msra.mxu2 %v1775_v47 }
  0x1e   :  { %115 = vmatpush.msra.mxu0 %v1766_v44  ;;  %135 = vmatpush.msra.mxu1 %v1768_v45  ;;  %2678 = vst [vmem:[#allocation21_spill] sm:$0xff] %v1787_v51 }
  0x1f   :  { %175 = vmatpush.msra.mxu3 %v1773_v46  ;;  %2679 = vst [vmem:[#allocation22_spill] sm:$0xff] %v1790_v52  ;;  %152 = vmatpush.msra.mxu2 %v1787_v51 }
  0x20   :  { %2680 = vst [vmem:[#allocation23_spill] sm:$0xff] %v1792_v53  ;;  %116 = vmatpush.msra.mxu0 %v1778_v48  ;;  %136 = vmatpush.msra.mxu1 %v1780_v49 }
  0x21   :  { %2681 = vst [vmem:[#allocation24_spill] sm:$0xff] %v1797_v54  ;;  %176 = vmatpush.msra.mxu3 %v1785_v50  ;;  %153 = vmatpush.msra.mxu2 %v1799_v55 }
  0x22   :  { %2682 = vst [vmem:[#allocation25_spill] sm:$0xff] %v1799_v55  ;;  %117 = vmatpush.msra.mxu0 %v1790_v52  ;;  %137 = vmatpush.msra.mxu1 %v1792_v53 }
  0x23   :  { %2683 = vst [vmem:[#allocation26_spill] sm:$0xff] %v1802_v56  ;;  %177 = vmatpush.msra.mxu3 %v1797_v54  ;;  %154 = vmatpush.msra.mxu2 %v1815_v59 }
  0x24   :  { %2684 = vst [vmem:[#allocation27_spill] sm:$0xff] %v1804_v57  ;;  %118 = vmatpush.msra.mxu0 %v1802_v56  ;;  %138 = vmatpush.msra.mxu1 %v1804_v57 }
  0x25   :  { %2685 = vst [vmem:[#allocation28_spill] sm:$0xff] %v1809_v58  ;;  %178 = vmatpush.msra.mxu3 %v1809_v58  ;;  %119 = vmatmul.f32.vlgmr.msra.gmra.mxu0 %v1620_v60 }
  0x26   :  { %2686 = vst [vmem:[#allocation29_spill] sm:$0xff] %v1815_v59  ;;  %139 = vmatmul.f32.vlgmr.msra.gmra.mxu1 %v1620_v60  ;;  %179 = vmatmul.f32.vlgmr.msra.gmra.mxu3 %v1620_v60 }
  0x27   :  { %2687 = vst [vmem:[#allocation30_spill] sm:$0xff] %v1818_v61  ;;  %256 = vmatpush.msrb.mxu0 %v1639_v0  ;;  %276 = vmatpush.msrb.mxu1 %v1641_v1  ;;  %v1834_v0 = vld [vmem:[#allocation4 + $0x10] sm:$0xff] }
  0x28   :  { %2688 = vst [vmem:[#allocation31_spill] sm:$0xff] %v1822_v62  ;;  %316 = vmatpush.msrb.mxu3 %v1643_v2  ;;  %155 = vmatpush.msra.mxu2 %v1818_v61 }
  0x29   :  { %257 = vmatpush.msrb.mxu0 %v1647_v3  ;;  %2689 = vst [vmem:[#allocation32_spill] sm:$0xff] %v1828_v63  ;;  %277 = vmatpush.msrb.mxu1 %v1649_v4 }
  0x2a   :  { %317 = vmatpush.msrb.mxu3 %v1651_v5  ;;  %156 = vmatpush.msra.mxu2 %v1822_v62  ;;  %2690 = vst [vmem:[#allocation33_spill] sm:$0xff] %v1834_v0 }
  0x2b   :  { %258 = vmatpush.msrb.mxu0 %v1654_v6  ;;  %278 = vmatpush.msrb.mxu1 %v1656_v7 }
  0x2c   :  { %318 = vmatpush.msrb.mxu3 %v1660_v8  ;;  %157 = vmatpush.msra.mxu2 %v1828_v63 }
  0x2d   :  { %259 = vmatpush.msrb.mxu0 %v1663_v9  ;;  %279 = vmatpush.msrb.mxu1 %v1665_v10 }
  0x2e   :  { %319 = vmatpush.msrb.mxu3 %v1669_v11  ;;  %158 = vmatpush.msra.mxu2 %v1834_v0 }
  0x2f   :  { %260 = vmatpush.msrb.mxu0 %v1672_v12  ;;  %159 = vmatmul.f32.vlgmr.msra.gmra.mxu2 %v1620_v60  ;;  %v2691_v60 = vld [vmem:[#allocation7_spill] sm:$0xff] }
  0x30   :  { %280 = vmatpush.msrb.mxu1 %v1674_v13  ;;  %296 = vmatpush.msrb.mxu2 %v1685_v17 }
  0x31   :  { %320 = vmatpush.msrb.mxu3 %v1678_v14  ;;  %261 = vmatpush.msrb.mxu0 %v1681_v15 }
  0x32   :  { %281 = vmatpush.msrb.mxu1 %v1683_v16  ;;  %297 = vmatpush.msrb.mxu2 %v1691_v19 }
  0x33   :  { %321 = vmatpush.msrb.mxu3 %v1689_v18  ;;  %262 = vmatpush.msrb.mxu0 %v1694_v20 }
  0x34   :  { %282 = vmatpush.msrb.mxu1 %v1696_v21  ;;  %298 = vmatpush.msrb.mxu2 %v1703_v23 }
  0x35   :  { %322 = vmatpush.msrb.mxu3 %v1701_v22  ;;  %263 = vmatpush.msrb.mxu0 %v1706_v24 }
  0x36   :  { %283 = vmatpush.msrb.mxu1 %v1708_v25  ;;  %299 = vmatpush.msrb.mxu2 %v1715_v27 }
  0x37   :  { %323 = vmatpush.msrb.mxu3 %v1713_v26  ;;  %264 = vmatpush.msrb.mxu0 %v1718_v28 }
  0x38   :  { %284 = vmatpush.msrb.mxu1 %v1720_v29  ;;  %300 = vmatpush.msrb.mxu2 %v1727_v31 }
  0x39   :  { %324 = vmatpush.msrb.mxu3 %v1725_v30  ;;  %265 = vmatpush.msrb.mxu0 %v1730_v32 }
  0x3a   :  { %285 = vmatpush.msrb.mxu1 %v1732_v33  ;;  %301 = vmatpush.msrb.mxu2 %v1739_v35 }
  0x3b   :  { %325 = vmatpush.msrb.mxu3 %v1737_v34  ;;  %266 = vmatpush.msrb.mxu0 %v1742_v36 }
  0x3c   :  { %286 = vmatpush.msrb.mxu1 %v1744_v37  ;;  %302 = vmatpush.msrb.mxu2 %v1751_v39 }
  0x3d   :  { %326 = vmatpush.msrb.mxu3 %v1749_v38  ;;  %267 = vmatpush.msrb.mxu0 %v1754_v40 }
  0x3e   :  { %287 = vmatpush.msrb.mxu1 %v1756_v41  ;;  %303 = vmatpush.msrb.mxu2 %v1763_v43 }
  0x3f   :  { %327 = vmatpush.msrb.mxu3 %v1761_v42  ;;  %268 = vmatpush.msrb.mxu0 %v1766_v44 }
  0x40   :  { %288 = vmatpush.msrb.mxu1 %v1768_v45  ;;  %304 = vmatpush.msrb.mxu2 %v1775_v47 }
  0x41   :  { %328 = vmatpush.msrb.mxu3 %v1773_v46  ;;  %269 = vmatpush.msrb.mxu0 %v1778_v48 }
  0x42   :  { %289 = vmatpush.msrb.mxu1 %v1780_v49  ;;  %305 = vmatpush.msrb.mxu2 %v1787_v51 }
  0x43   :  { %329 = vmatpush.msrb.mxu3 %v1785_v50  ;;  %270 = vmatpush.msrb.mxu0 %v1790_v52 }
  0x44   :  { %290 = vmatpush.msrb.mxu1 %v1792_v53  ;;  %306 = vmatpush.msrb.mxu2 %v1799_v55 }
  0x45   :  { %330 = vmatpush.msrb.mxu3 %v1797_v54  ;;  %271 = vmatpush.msrb.mxu0 %v1802_v56 }
  0x46   :  { %291 = vmatpush.msrb.mxu1 %v1804_v57  ;;  %307 = vmatpush.msrb.mxu2 %v1815_v59 }
  0x47   :  { %331 = vmatpush.msrb.mxu3 %v1809_v58  ;;  %410 = vmatpush.msra.mxu0 %v2691_v60 }
  0x48   :  { %430 = vmatpush.msra.mxu1 %v1641_v1  ;;  %308 = vmatpush.msrb.mxu2 %v1818_v61 }
  0x49   :  { %470 = vmatpush.msra.mxu3 %v1643_v2  ;;  %411 = vmatpush.msra.mxu0 %v1647_v3 }
  0x4a   :  { %431 = vmatpush.msra.mxu1 %v1649_v4  ;;  %309 = vmatpush.msrb.mxu2 %v1822_v62 }
  0x4b   :  { %471 = vmatpush.msra.mxu3 %v1651_v5  ;;  %412 = vmatpush.msra.mxu0 %v1654_v6 }
  0x4c   :  { %432 = vmatpush.msra.mxu1 %v1656_v7  ;;  %310 = vmatpush.msrb.mxu2 %v1828_v63 }
  0x4d   :  { %472 = vmatpush.msra.mxu3 %v1660_v8  ;;  %413 = vmatpush.msra.mxu0 %v1663_v9 }
  0x4e   :  { %433 = vmatpush.msra.mxu1 %v1665_v10  ;;  %311 = vmatpush.msrb.mxu2 %v1834_v0 }
  0x4f   :  { %473 = vmatpush.msra.mxu3 %v1669_v11  ;;  %414 = vmatpush.msra.mxu0 %v1672_v12 }
  0x50   :  { %450 = vmatpush.msra.mxu2 %v1685_v17  ;;  %434 = vmatpush.msra.mxu1 %v1674_v13 }
  0x51   :  { %474 = vmatpush.msra.mxu3 %v1678_v14  ;;  %415 = vmatpush.msra.mxu0 %v1681_v15 }
  0x52   :  { %451 = vmatpush.msra.mxu2 %v1691_v19  ;;  %435 = vmatpush.msra.mxu1 %v1683_v16 }
  0x53   :  { %475 = vmatpush.msra.mxu3 %v1689_v18  ;;  %416 = vmatpush.msra.mxu0 %v1694_v20 }
  0x54   :  { %452 = vmatpush.msra.mxu2 %v1703_v23  ;;  %436 = vmatpush.msra.mxu1 %v1696_v21 }
  0x55   :  { %476 = vmatpush.msra.mxu3 %v1701_v22  ;;  %417 = vmatpush.msra.mxu0 %v1706_v24 }
  0x56   :  { %453 = vmatpush.msra.mxu2 %v1715_v27  ;;  %437 = vmatpush.msra.mxu1 %v1708_v25 }
  0x57   :  { %477 = vmatpush.msra.mxu3 %v1713_v26  ;;  %418 = vmatpush.msra.mxu0 %v1718_v28 }
  0x58   :  { %454 = vmatpush.msra.mxu2 %v1727_v31  ;;  %438 = vmatpush.msra.mxu1 %v1720_v29 }
  0x59   :  { %478 = vmatpush.msra.mxu3 %v1725_v30  ;;  %419 = vmatpush.msra.mxu0 %v1730_v32 }
  0x5a   :  { %455 = vmatpush.msra.mxu2 %v1739_v35  ;;  %439 = vmatpush.msra.mxu1 %v1732_v33 }
  0x5b   :  { %479 = vmatpush.msra.mxu3 %v1737_v34  ;;  %420 = vmatpush.msra.mxu0 %v1742_v36 }
  0x5c   :  { %456 = vmatpush.msra.mxu2 %v1751_v39  ;;  %440 = vmatpush.msra.mxu1 %v1744_v37 }
  0x5d   :  { %480 = vmatpush.msra.mxu3 %v1749_v38  ;;  %421 = vmatpush.msra.mxu0 %v1754_v40 }
  0x5e   :  { %457 = vmatpush.msra.mxu2 %v1763_v43  ;;  %441 = vmatpush.msra.mxu1 %v1756_v41 }
  0x5f   :  { %481 = vmatpush.msra.mxu3 %v1761_v42  ;;  %422 = vmatpush.msra.mxu0 %v1766_v44 }
  0x60   :  { %458 = vmatpush.msra.mxu2 %v1775_v47  ;;  %442 = vmatpush.msra.mxu1 %v1768_v45 }
  0x61   :  { %482 = vmatpush.msra.mxu3 %v1773_v46  ;;  %423 = vmatpush.msra.mxu0 %v1778_v48 }
  0x62   :  { %459 = vmatpush.msra.mxu2 %v1787_v51  ;;  %443 = vmatpush.msra.mxu1 %v1780_v49 }
  0x63   :  { %483 = vmatpush.msra.mxu3 %v1785_v50  ;;  %424 = vmatpush.msra.mxu0 %v1790_v52 }
  0x64   :  { %460 = vmatpush.msra.mxu2 %v1799_v55  ;;  %444 = vmatpush.msra.mxu1 %v1792_v53 }
  0x65   :  { %484 = vmatpush.msra.mxu3 %v1797_v54  ;;  %425 = vmatpush.msra.mxu0 %v1802_v56  ;;  %v99_v54 = vld [vmem:[%s2555_s0] sm:$0xff]  ;;  %v100_v56 = vld [vmem:[%s2555_s0 + $0x8] sm:$0xff] }
  0x66   :  { %461 = vmatpush.msra.mxu2 %v1815_v59  ;;  %445 = vmatpush.msra.mxu1 %v1804_v57 }
  0x67   :  { %485 = vmatpush.msra.mxu3 %v1809_v58 }
  0x68   :  { %462 = vmatpush.msra.mxu2 %v1818_v61 }
  0x6a   :  { %463 = vmatpush.msra.mxu2 %v1822_v62 }
  0x6c   :  { %464 = vmatpush.msra.mxu2 %v1828_v63  ;;  %v102_v63 = vld [vmem:[%s2555_s0 + $0x18] sm:$0xff] }
  0x6e   :  { %465 = vmatpush.msra.mxu2 %v1834_v0 }
  0xa2   :  { %v120_v53 = vpop.f32.mrf.mxu0 }
  0xa3   :  { %v183_v57 = vadd.f32 %v120_v53, %v99_v54  ;;  %v140_v52 = vpop.f32.mrf.mxu1 }
  0xa4   :  { %v184_v58 = vadd.f32 %v140_v52, %v100_v56  ;;  %v101_v52 = vld [vmem:[%s2555_s0 + $0x10] sm:$0xff] }
  0xa5   :  { %v1336_v50 = vmul.f32 -1.442695, %v183_v57 }
  0xa6   :  { %v1337_v49 = vmul.f32 -1.442695, %v184_v58 }
  0xa7   :  { %1399 = vpow2.f32 %v1336_v50 }
  0xa8   :  { %1401 = vpow2.f32 %v1337_v49 }
  0xa9   :  { %v180_v0 = vpop.f32.mrf.mxu3 }
  0xaa   :  { %v186_v62 = vadd.f32 %v180_v0, %v102_v63 }
  0xac   :  { %v1338_v48 = vmul.f32 -1.442695, %v186_v62 }
  0xad   :  { %v1400_v46 = vpop.eup %1399 }
  0xae   :  { %v1402_v61 = vpop.eup %1401  ;;  %v190_v45 = vadd.f32 1.0, %v1400_v46  ;;  %1403 = vpow2.f32 %v1338_v48 }
  0xaf   :  { %v209_v44 = vadd.f32 1.0, %v1402_v61 }
  0xb0   :  { %1405 = vrcp.f32 %v190_v45  ;;  %v202_v48 = vand.u32 2147483648, %v190_v45  ;;  %v200_v42 = vand.u32 2147483647, %v190_v45  ;;  %vm196_vm2 = vweird.f32 %v190_v45 }
  0xb1   :  { %1407 = vrcp.f32 %v209_v44  ;;  %v221_v61 = vand.u32 2147483648, %v209_v44  ;;  %v219_v41 = vand.u32 2147483647, %v209_v44  ;;  %vm215_vm3 = vweird.f32 %v209_v44 }
  0xb2   :  { %v160_v50 = vpop.f32.mrf.mxu2  ;;  %vm201_vm5 = vcmp.eq.f32.partialorder %v200_v42, 8.507059e+37 }
  0xb3   :  { %v185_v54 = vadd.f32 %v160_v50, %v101_v52  ;;  %vm220_vm7 = vcmp.eq.f32.partialorder %v219_v41, 8.507059e+37 }
  0xb4   :  { %v1404_v53 = vpop.eup %1403 }
  0xb5   :  { %v229_v56 = vadd.f32 1.0, %v1404_v53  ;;  %v203_v53 = vor.u32 1.1754944e-38, %v202_v48  ;;  %v2699_v48 = vld [vmem:[#allocation13_spill] sm:$0xff] }
  0xb6   :  { %v1406_v57 = vpop.eup %1405 }
  0xb7   :  { %v1408_v49 = vpop.eup %1407  ;;  %v192_v58 = vmul.f32 %v1406_v57, %v190_v45  ;;  %1409 = vrcp.f32 %v229_v56  ;;  %vm197_vm0 = vweird.f32 %v1406_v57  ;;  %v241_v45 = vand.u32 2147483648, %v229_v56 }
  0xb8   :  { %v211_v0 = vmul.f32 %v1408_v49, %v209_v44  ;;  %1411 = vtanh.f32 %v185_v54  ;;  %vm216_vm1 = vweird.f32 %v1408_v49  ;;  %vm198_vm4 = vmor %vm196_vm2, %vm197_vm0  ;;  %v222_v54 = vor.u32 1.1754944e-38, %v221_v61  ;;  %v2700_v61 = vld [vmem:[#allocation29_spill] sm:$0xff] }
  0xb9   :  { %v193_v62 = vsub.f32 1.0, %v192_v58  ;;  %vm217_vm6 = vmor %vm215_vm3, %vm216_vm1  ;;  %vm235_vm9 = vweird.f32 %v229_v56  ;;  %v242_v42 = vor.u32 1.1754944e-38, %v241_v45  ;;  %v2710_v45 = vld [vmem:[#allocation22_spill] sm:$0xff] }
  0xba   :  { %v212_v46 = vsub.f32 1.0, %v211_v0 }
  0xbb   :  { %v194_v63 = vmul.f32 %v1406_v57, %v193_v62 }
  0xbc   :  { %v213_v59 = vmul.f32 %v1408_v49, %v212_v46 }
  0xbd   :  { %v1410_v40 = vpop.eup %1409  ;;  %v195_v38 = vadd.f32 %v1406_v57, %v194_v63 }
  0xbe   :  { %v1412_v52 = vpop.eup %1411  ;;  %v231_v50 = vmul.f32 %v1410_v40, %v229_v56  ;;  %v214_v55 = vadd.f32 %v1408_v49, %v213_v59  ;;  %vm236_vm8 = vweird.f32 %v1410_v40  ;;  %v239_v59 = vand.u32 2147483647, %v229_v56  ;;  %v2697_v56 = vld [vmem:[#allocation11_spill] sm:$0xff] }
  0xbf   :  { %v199_v58 = vsel %vm198_vm4, %v1406_v57, %v195_v38  ;;  %vm237_vm10 = vmor %vm235_vm9, %vm236_vm8 }
  0xc0   :  { %v232_v0 = vsub.f32 1.0, %v231_v50  ;;  %v204_v62 = vsel %vm201_vm5, %v203_v53, %v199_v58  ;;  %v218_v37 = vsel %vm217_vm6, %v1408_v49, %v214_v55  ;;  %vm240_vm11 = vcmp.eq.f32.partialorder %v239_v59, 8.507059e+37  ;;  %v2698_v49 = vld [vmem:[#allocation12_spill] sm:$0xff]  ;;  %v2702_v50 = vld [vmem:[#allocation15_spill] sm:$0xff]  ;;  %v2705_v58 = vld [vmem:[#allocation17_spill] sm:$0xff] }
  0xc1   :  { %v223_v46 = vsel %vm220_vm7, %v222_v54, %v218_v37  ;;  %v246_v36 = vmul.f32 %v1412_v52, %v204_v62  ;;  %v2694_v37 = vld [vmem:[#allocation9_spill] sm:$0xff]  ;;  %v2701_v52 = vld [vmem:[#allocation14_spill] sm:$0xff]  ;;  %v2703_v53 = vld [vmem:[#allocation16_spill] sm:$0xff] }
  0xc2   :  { %v233_v34 = vmul.f32 %v1410_v40, %v232_v0  ;;  %v245_v51 = vmul.f32 0.0, %v223_v46  ;;  %v2704_v54 = vld [vmem:[#allocation30_spill] sm:$0xff]  ;;  %v2707_v62 = vld [vmem:[#allocation19_spill] sm:$0xff] }
  0xc3   :  { %v2706_v0 = vld [vmem:[#allocation18_spill] sm:$0xff]  ;;  %v2708_v46 = vld [vmem:[#allocation31_spill] sm:$0xff] }
  0xc4   :  { %v1971_v63 = vadd.f32 %v246_v36, %v245_v51  ;;  %v234_v44 = vadd.f32 %v1410_v40, %v233_v34  ;;  %v2692_v34 = vld [vmem:[#allocation21_spill] sm:$0xff]  ;;  %v2693_v36 = vld [vmem:[#allocation8_spill] sm:$0xff]  ;;  %v2711_v59 = vld [vmem:[#allocation23_spill] sm:$0xff] }
  0xc5   :  { %v2696_v51 = vld [vmem:[#allocation25_spill] sm:$0xff] }
  0xc6   :  { %1413 = vtanh.f32 %v1971_v63  ;;  %v238_v38 = vsel %vm237_vm10, %v1410_v40, %v234_v44  ;;  %v2695_v40 = vld [vmem:[#allocation10_spill] sm:$0xff]  ;;  %v2709_v44 = vld [vmem:[#allocation20_spill] sm:$0xff] }
  0xc7   :  { %v243_v55 = vsel %vm240_vm11, %v242_v42, %v238_v38  ;;  %v2712_v38 = vld [vmem:[#allocation32_spill] sm:$0xff] }
  0xc8   :  { %v2713_v42 = vld [vmem:[#allocation24_spill] sm:$0xff] }
  0xcc   :  { %v1414_v57 = vpop.eup %1413 }
  0xcd   :  { %v249_v41 = vmul.f32 %v1414_v57, %v243_v55  ;;  %v2714_v57 = vld [vmem:[#allocation26_spill] sm:$0xff]  ;;  %v2715_v55 = vld [vmem:[#allocation27_spill] sm:$0xff] }
  0xcf   :  { %250 = vst [vmem:[%s2557_s2] sm:$0xff] %v249_v41  ;;  %272 = vmatmul.f32.vlgmr.msrb.gmra.mxu0 %v249_v41  ;;  %292 = vmatmul.f32.vlgmr.msrb.gmra.mxu1 %v249_v41 }
  0xd0   :  { %312 = vmatmul.f32.vlgmr.msrb.gmra.mxu2 %v249_v41  ;;  %332 = vmatmul.f32.vlgmr.msrb.gmra.mxu3 %v249_v41  ;;  %v2716_v41 = vld [vmem:[#allocation33_spill] sm:$0xff] }
  0xd1   :  { %564 = vmatpush.msrb.mxu0 %v2691_v60  ;;  %584 = vmatpush.msrb.mxu1 %v1641_v1 }
  0xd2   :  { %604 = vmatpush.msrb.mxu2 %v1685_v17  ;;  %624 = vmatpush.msrb.mxu3 %v1643_v2 }
  0xd3   :  { %565 = vmatpush.msrb.mxu0 %v1647_v3  ;;  %585 = vmatpush.msrb.mxu1 %v1649_v4 }
  0xd4   :  { %605 = vmatpush.msrb.mxu2 %v1691_v19  ;;  %625 = vmatpush.msrb.mxu3 %v1651_v5 }
  0xd5   :  { %566 = vmatpush.msrb.mxu0 %v1654_v6  ;;  %586 = vmatpush.msrb.mxu1 %v1656_v7 }
  0xd6   :  { %606 = vmatpush.msrb.mxu2 %v1703_v23  ;;  %626 = vmatpush.msrb.mxu3 %v1660_v8 }
  0xd7   :  { %567 = vmatpush.msrb.mxu0 %v1663_v9  ;;  %587 = vmatpush.msrb.mxu1 %v1665_v10 }
  0xd8   :  { %607 = vmatpush.msrb.mxu2 %v1715_v27  ;;  %627 = vmatpush.msrb.mxu3 %v1669_v11 }
  0xd9   :  { %568 = vmatpush.msrb.mxu0 %v1672_v12  ;;  %588 = vmatpush.msrb.mxu1 %v1674_v13 }
  0xda   :  { %608 = vmatpush.msrb.mxu2 %v1727_v31  ;;  %628 = vmatpush.msrb.mxu3 %v1678_v14 }
  0xdb   :  { %569 = vmatpush.msrb.mxu0 %v1681_v15  ;;  %589 = vmatpush.msrb.mxu1 %v1683_v16 }
  0xdc   :  { %609 = vmatpush.msrb.mxu2 %v1739_v35  ;;  %629 = vmatpush.msrb.mxu3 %v1689_v18 }
  0xdd   :  { %570 = vmatpush.msrb.mxu0 %v1694_v20  ;;  %590 = vmatpush.msrb.mxu1 %v1696_v21 }
  0xde   :  { %610 = vmatpush.msrb.mxu2 %v1751_v39  ;;  %630 = vmatpush.msrb.mxu3 %v1701_v22 }
  0xdf   :  { %571 = vmatpush.msrb.mxu0 %v1706_v24  ;;  %591 = vmatpush.msrb.mxu1 %v1708_v25 }
  0xe0   :  { %611 = vmatpush.msrb.mxu2 %v1763_v43  ;;  %631 = vmatpush.msrb.mxu3 %v1713_v26 }
  0xe1   :  { %572 = vmatpush.msrb.mxu0 %v1718_v28  ;;  %592 = vmatpush.msrb.mxu1 %v1720_v29 }
  0xe2   :  { %612 = vmatpush.msrb.mxu2 %v1775_v47  ;;  %632 = vmatpush.msrb.mxu3 %v1725_v30 }
  0xe3   :  { %573 = vmatpush.msrb.mxu0 %v1730_v32  ;;  %593 = vmatpush.msrb.mxu1 %v1732_v33 }
  0xe4   :  { %613 = vmatpush.msrb.mxu2 %v2692_v34  ;;  %633 = vmatpush.msrb.mxu3 %v2693_v36 }
  0xe5   :  { %574 = vmatpush.msrb.mxu0 %v2694_v37  ;;  %594 = vmatpush.msrb.mxu1 %v2695_v40 }
  0xe6   :  { %614 = vmatpush.msrb.mxu2 %v2696_v51  ;;  %634 = vmatpush.msrb.mxu3 %v2697_v56 }
  0xe7   :  { %575 = vmatpush.msrb.mxu0 %v2698_v49  ;;  %595 = vmatpush.msrb.mxu1 %v2699_v48 }
  0xe8   :  { %615 = vmatpush.msrb.mxu2 %v2700_v61  ;;  %635 = vmatpush.msrb.mxu3 %v2701_v52 }
  0xe9   :  { %576 = vmatpush.msrb.mxu0 %v2702_v50  ;;  %596 = vmatpush.msrb.mxu1 %v2703_v53 }
  0xea   :  { %616 = vmatpush.msrb.mxu2 %v2704_v54  ;;  %636 = vmatpush.msrb.mxu3 %v2705_v58 }
  0xeb   :  { %577 = vmatpush.msrb.mxu0 %v2706_v0  ;;  %597 = vmatpush.msrb.mxu1 %v2707_v62  ;;  %v2717_v0 = vld [vmem:[#allocation28_spill] sm:$0xff] }
  0xec   :  { %617 = vmatpush.msrb.mxu2 %v2708_v46  ;;  %637 = vmatpush.msrb.mxu3 %v2709_v44  ;;  %v1339_v44 = vld [vmem:[%s2555_s0 + $0x20] sm:$0xff] }
  0xed   :  { %578 = vmatpush.msrb.mxu0 %v2710_v45  ;;  %598 = vmatpush.msrb.mxu1 %v2711_v59  ;;  %v1340_v59 = vld [vmem:[%s2555_s0 + $0x28] sm:$0xff] }
  0xee   :  { %618 = vmatpush.msrb.mxu2 %v2712_v38  ;;  %638 = vmatpush.msrb.mxu3 %v2713_v42 }
  0xef   :  { %579 = vmatpush.msrb.mxu0 %v2714_v57  ;;  %599 = vmatpush.msrb.mxu1 %v2715_v55 }
  0xf0   :  { %619 = vmatpush.msrb.mxu2 %v2716_v41  ;;  %639 = vmatpush.msrb.mxu3 %v2717_v0  ;;  %v1342_v41 = vld [vmem:[%s2555_s0 + $0x38] sm:$0xff] }
 0x14c   :  { %v273_v45 = vpop.f32.mrf.mxu0  ;;  %v293_v38 = vpop.f32.mrf.mxu1 }
 0x14d   :  { %v336_v46 = vadd.f32 %v1339_v44, %v273_v45  ;;  %v337_v42 = vadd.f32 %v1340_v59, %v293_v38 }
 0x14f   :  { %v1343_v62 = vmul.f32 -1.442695, %v336_v46  ;;  %v1344_v57 = vmul.f32 -1.442695, %v337_v42  ;;  %v1341_v46 = vld [vmem:[%s2555_s0 + $0x30] sm:$0xff] }
 0x151   :  { %1415 = vpow2.f32 %v1343_v62 }
 0x152   :  { %1417 = vpow2.f32 %v1344_v57 }
 0x153   :  { %v333_v0 = vpop.f32.mrf.mxu3  ;;  %v313_v62 = vpop.f32.mrf.mxu2 }
 0x154   :  { %v339_v55 = vadd.f32 %v1342_v41, %v333_v0  ;;  %v338_v38 = vadd.f32 %v1341_v46, %v313_v62 }
 0x156   :  { %v1345_v58 = vmul.f32 -1.442695, %v339_v55 }
 0x157   :  { %v1416_v54 = vpop.eup %1415 }
 0x158   :  { %v1418_v53 = vpop.eup %1417  ;;  %v343_v50 = vadd.f32 1.0, %v1416_v54  ;;  %1419 = vpow2.f32 %v1345_v58 }
 0x159   :  { %v362_v52 = vadd.f32 1.0, %v1418_v53 }
 0x15a   :  { %1421 = vrcp.f32 %v343_v50  ;;  %v355_v54 = vand.u32 2147483648, %v343_v50  ;;  %v353_v61 = vand.u32 2147483647, %v343_v50  ;;  %vm349_vm14 = vweird.f32 %v343_v50 }
 0x15b   :  { %1423 = vrcp.f32 %v362_v52  ;;  %v374_v53 = vand.u32 2147483648, %v362_v52  ;;  %v372_v49 = vand.u32 2147483647, %v362_v52  ;;  %vm368_vm15 = vweird.f32 %v362_v52 }
 0x15c   :  { %v356_v46 = vor.u32 1.1754944e-38, %v355_v54  ;;  %vm354_vm2 = vcmp.eq.f32.partialorder %v353_v61, 8.507059e+37 }
 0x15d   :  { %vm373_vm3 = vcmp.eq.f32.partialorder %v372_v49, 8.507059e+37 }
 0x15e   :  { %v1420_v44 = vpop.eup %1419 }
 0x15f   :  { %v382_v45 = vadd.f32 1.0, %v1420_v44 }
 0x160   :  { %v1422_v59 = vpop.eup %1421 }
 0x161   :  { %v1424_v42 = vpop.eup %1423  ;;  %v345_v57 = vmul.f32 %v1422_v59, %v343_v50  ;;  %1425 = vrcp.f32 %v382_v45  ;;  %vm350_vm12 = vweird.f32 %v1422_v59  ;;  %vm388_vm5 = vweird.f32 %v382_v45 }
 0x162   :  { %v364_v0 = vmul.f32 %v1424_v42, %v362_v52  ;;  %1427 = vtanh.f32 %v338_v38  ;;  %vm369_vm13 = vweird.f32 %v1424_v42  ;;  %vm351_vm0 = vmor %vm349_vm14, %vm350_vm12 }
 0x163   :  { %v346_v55 = vsub.f32 1.0, %v345_v57  ;;  %vm370_vm1 = vmor %vm368_vm15, %vm369_vm13  ;;  %v375_v57 = vor.u32 1.1754944e-38, %v374_v53 }
 0x164   :  { %v365_v41 = vsub.f32 1.0, %v364_v0 }
 0x165   :  { %v347_v58 = vmul.f32 %v1422_v59, %v346_v55 }
 0x166   :  { %v366_v48 = vmul.f32 %v1424_v42, %v365_v41 }
 0x167   :  { %v1426_v56 = vpop.eup %1425  ;;  %v348_v51 = vadd.f32 %v1422_v59, %v347_v58 }
 0x168   :  { %v367_v62 = vadd.f32 %v1424_v42, %v366_v48  ;;  %v384_v44 = vmul.f32 %v1426_v56, %v382_v45  ;;  %v1428_v38 = vpop.eup %1427  ;;  %vm389_vm4 = vweird.f32 %v1426_v56  ;;  %v394_v48 = vand.u32 2147483648, %v382_v45 }
 0x169   :  { %v352_v0 = vsel %vm351_vm0, %v1422_v59, %v348_v51  ;;  %v392_v51 = vand.u32 2147483647, %v382_v45  ;;  %vm390_vm6 = vmor %vm388_vm5, %vm389_vm4 }
 0x16a   :  { %v357_v40 = vsel %vm354_vm2, %v356_v46, %v352_v0  ;;  %v371_v55 = vsel %vm370_vm1, %v1424_v42, %v367_v62  ;;  %v385_v37 = vsub.f32 1.0, %v384_v44  ;;  %v395_v59 = vor.u32 1.1754944e-38, %v394_v48 }
 0x16b   :  { %v376_v41 = vsel %vm373_vm3, %v375_v57, %v371_v55  ;;  %v399_v36 = vmul.f32 %v1428_v38, %v357_v40  ;;  %vm393_vm7 = vcmp.eq.f32.partialorder %v392_v51, 8.507059e+37  ;;  %v1349_v40 = vld [vmem:[%s2555_s0 + $0x50] sm:$0xff] }
 0x16c   :  { %v398_v34 = vmul.f32 %v376_v41, %v1971_v63  ;;  %v386_v58 = vmul.f32 %v1426_v56, %v385_v37 }
 0x16e   :  { %v2054_v50 = vadd.f32 %v399_v36, %v398_v34  ;;  %v387_v52 = vadd.f32 %v1426_v56, %v386_v58 }
 0x170   :  { %1429 = vtanh.f32 %v2054_v50  ;;  %v391_v61 = vsel %vm390_vm6, %v1426_v56, %v387_v52 }
 0x171   :  { %v396_v42 = vsel %vm393_vm7, %v395_v59, %v391_v61 }
 0x176   :  { %v1430_v49 = vpop.eup %1429 }
 0x177   :  { %v402_v54 = vmul.f32 %v1430_v49, %v396_v42 }
 0x179   :  { %1346 = vst [vmem:[%s2557_s2 + $0x8] sm:$0xff] %v402_v54  ;;  %426 = vmatmul.f32.vlgmr.msra.gmra.mxu0 %v402_v54  ;;  %446 = vmatmul.f32.vlgmr.msra.gmra.mxu1 %v402_v54 }
 0x17a   :  { %466 = vmatmul.f32.vlgmr.msra.gmra.mxu2 %v402_v54  ;;  %486 = vmatmul.f32.vlgmr.msra.gmra.mxu3 %v402_v54 }
 0x17b   :  { %718 = vmatpush.msra.mxu0 %v2691_v60  ;;  %738 = vmatpush.msra.mxu1 %v1641_v1  ;;  %v2718_v1 = vld [vmem:[#allocation21_spill] sm:$0xff] }
 0x17c   :  { %758 = vmatpush.msra.mxu2 %v1685_v17  ;;  %778 = vmatpush.msra.mxu3 %v1643_v2  ;;  %v2719_v2 = vld [vmem:[#allocation8_spill] sm:$0xff]  ;;  %v2734_v17 = vld [vmem:[#allocation31_spill] sm:$0xff] }
 0x17d   :  { %719 = vmatpush.msra.mxu0 %v1647_v3  ;;  %739 = vmatpush.msra.mxu1 %v1649_v4  ;;  %v2720_v3 = vld [vmem:[#allocation9_spill] sm:$0xff]  ;;  %v2721_v4 = vld [vmem:[#allocation10_spill] sm:$0xff] }
 0x17e   :  { %759 = vmatpush.msra.mxu2 %v1691_v19  ;;  %779 = vmatpush.msra.mxu3 %v1651_v5  ;;  %v2722_v5 = vld [vmem:[#allocation25_spill] sm:$0xff]  ;;  %v2736_v19 = vld [vmem:[#allocation22_spill] sm:$0xff] }
 0x17f   :  { %720 = vmatpush.msra.mxu0 %v1654_v6  ;;  %740 = vmatpush.msra.mxu1 %v1656_v7  ;;  %v2723_v6 = vld [vmem:[#allocation11_spill] sm:$0xff]  ;;  %v2724_v7 = vld [vmem:[#allocation12_spill] sm:$0xff] }
 0x180   :  { %760 = vmatpush.msra.mxu2 %v1703_v23  ;;  %780 = vmatpush.msra.mxu3 %v1660_v8  ;;  %v2725_v8 = vld [vmem:[#allocation13_spill] sm:$0xff]  ;;  %v2740_v23 = vld [vmem:[#allocation26_spill] sm:$0xff] }
 0x181   :  { %721 = vmatpush.msra.mxu0 %v1663_v9  ;;  %741 = vmatpush.msra.mxu1 %v1665_v10  ;;  %v2726_v9 = vld [vmem:[#allocation29_spill] sm:$0xff]  ;;  %v2727_v10 = vld [vmem:[#allocation14_spill] sm:$0xff] }
 0x182   :  { %761 = vmatpush.msra.mxu2 %v1715_v27  ;;  %781 = vmatpush.msra.mxu3 %v1669_v11  ;;  %v2728_v11 = vld [vmem:[#allocation15_spill] sm:$0xff] }
 0x183   :  { %722 = vmatpush.msra.mxu0 %v1672_v12  ;;  %742 = vmatpush.msra.mxu1 %v1674_v13  ;;  %v2729_v12 = vld [vmem:[#allocation16_spill] sm:$0xff]  ;;  %v2730_v13 = vld [vmem:[#allocation30_spill] sm:$0xff]  ;;  %v1347_v27 = vld [vmem:[%s2555_s0 + $0x40] sm:$0xff] }
 0x184   :  { %762 = vmatpush.msra.mxu2 %v1727_v31  ;;  %782 = vmatpush.msra.mxu3 %v1678_v14  ;;  %v2731_v14 = vld [vmem:[#allocation17_spill] sm:$0xff] }
 0x185   :  { %723 = vmatpush.msra.mxu0 %v1681_v15  ;;  %743 = vmatpush.msra.mxu1 %v1683_v16  ;;  %v2732_v15 = vld [vmem:[#allocation18_spill] sm:$0xff]  ;;  %v2733_v16 = vld [vmem:[#allocation19_spill] sm:$0xff] }
 0x186   :  { %763 = vmatpush.msra.mxu2 %v1739_v35  ;;  %783 = vmatpush.msra.mxu3 %v1689_v18  ;;  %v2735_v18 = vld [vmem:[#allocation20_spill] sm:$0xff] }
 0x187   :  { %724 = vmatpush.msra.mxu0 %v1694_v20  ;;  %744 = vmatpush.msra.mxu1 %v1696_v21  ;;  %v2737_v20 = vld [vmem:[#allocation23_spill] sm:$0xff]  ;;  %v2738_v21 = vld [vmem:[#allocation32_spill] sm:$0xff] }
 0x188   :  { %764 = vmatpush.msra.mxu2 %v1751_v39  ;;  %784 = vmatpush.msra.mxu3 %v1701_v22  ;;  %v2739_v22 = vld [vmem:[#allocation24_spill] sm:$0xff]  ;;  %v1350_v39 = vld [vmem:[%s2555_s0 + $0x58] sm:$0xff] }
 0x189   :  { %725 = vmatpush.msra.mxu0 %v1706_v24  ;;  %745 = vmatpush.msra.mxu1 %v1708_v25  ;;  %v2741_v24 = vld [vmem:[#allocation27_spill] sm:$0xff]  ;;  %v2742_v25 = vld [vmem:[#allocation33_spill] sm:$0xff] }
 0x18a   :  { %765 = vmatpush.msra.mxu2 %v1763_v43  ;;  %785 = vmatpush.msra.mxu3 %v1713_v26  ;;  %v2743_v26 = vld [vmem:[#allocation28_spill] sm:$0xff] }
 0x18b   :  { %726 = vmatpush.msra.mxu0 %v1718_v28  ;;  %746 = vmatpush.msra.mxu1 %v1720_v29  ;;  %v1348_v28 = vld [vmem:[%s2555_s0 + $0x48] sm:$0xff] }
 0x18c   :  { %766 = vmatpush.msra.mxu2 %v1775_v47  ;;  %786 = vmatpush.msra.mxu3 %v1725_v30 }
 0x18d   :  { %727 = vmatpush.msra.mxu0 %v1730_v32  ;;  %747 = vmatpush.msra.mxu1 %v1732_v33 }
 0x18e   :  { %767 = vmatpush.msra.mxu2 %v2718_v1  ;;  %787 = vmatpush.msra.mxu3 %v2719_v2 }
 0x18f   :  { %728 = vmatpush.msra.mxu0 %v2720_v3  ;;  %748 = vmatpush.msra.mxu1 %v2721_v4 }
 0x190   :  { %768 = vmatpush.msra.mxu2 %v2722_v5  ;;  %788 = vmatpush.msra.mxu3 %v2723_v6 }
 0x191   :  { %729 = vmatpush.msra.mxu0 %v2724_v7  ;;  %749 = vmatpush.msra.mxu1 %v2725_v8 }
 0x192   :  { %769 = vmatpush.msra.mxu2 %v2726_v9  ;;  %789 = vmatpush.msra.mxu3 %v2727_v10 }
 0x193   :  { %730 = vmatpush.msra.mxu0 %v2728_v11  ;;  %750 = vmatpush.msra.mxu1 %v2729_v12 }
 0x194   :  { %770 = vmatpush.msra.mxu2 %v2730_v13  ;;  %790 = vmatpush.msra.mxu3 %v2731_v14 }
 0x195   :  { %731 = vmatpush.msra.mxu0 %v2732_v15  ;;  %751 = vmatpush.msra.mxu1 %v2733_v16 }
 0x196   :  { %771 = vmatpush.msra.mxu2 %v2734_v17  ;;  %791 = vmatpush.msra.mxu3 %v2735_v18 }
 0x197   :  { %732 = vmatpush.msra.mxu0 %v2736_v19  ;;  %752 = vmatpush.msra.mxu1 %v2737_v20 }
 0x198   :  { %772 = vmatpush.msra.mxu2 %v2738_v21  ;;  %792 = vmatpush.msra.mxu3 %v2739_v22  ;;  %v2146_v21 = vld [vmem:[#allocation4 + $0x1e8] sm:$0xff]  ;;  %v2149_v22 = vld [vmem:[#allocation4 + $0x1f0] sm:$0xff] }
 0x199   :  { %733 = vmatpush.msra.mxu0 %v2740_v23  ;;  %753 = vmatpush.msra.mxu1 %v2741_v24  ;;  %v2152_v23 = vld [vmem:[#allocation4 + $0x1f8] sm:$0xff]  ;;  %v2155_v24 = vld [vmem:[#allocation4 + $0x1c0] sm:$0xff] }
 0x19a   :  { %773 = vmatpush.msra.mxu2 %v2742_v25  ;;  %793 = vmatpush.msra.mxu3 %v2743_v26  ;;  %v2158_v25 = vld [vmem:[#allocation4 + $0x1c8] sm:$0xff]  ;;  %v2161_v26 = vld [vmem:[#allocation4 + $0x1d0] sm:$0xff] }
 0x1f6   :  { %v427_v29 = vpop.f32.mrf.mxu0  ;;  %v447_v30 = vpop.f32.mrf.mxu1 }
 0x1f7   :  { %v490_v31 = vadd.f32 %v1347_v27, %v427_v29  ;;  %v491_v32 = vadd.f32 %v1348_v28, %v447_v30  ;;  %v2164_v27 = vld [vmem:[#allocation4 + $0x1d8] sm:$0xff]  ;;  %v2167_v28 = vld [vmem:[#allocation4 + $0x1a0] sm:$0xff]  ;;  %v2170_v29 = vld [vmem:[#allocation4 + $0x1a8] sm:$0xff] }
 0x1f8   :  { %v2173_v30 = vld [vmem:[#allocation4 + $0x1b0] sm:$0xff] }
 0x1f9   :  { %v1351_v33 = vmul.f32 -1.442695, %v490_v31  ;;  %v1352_v35 = vmul.f32 -1.442695, %v491_v32  ;;  %v2176_v31 = vld [vmem:[#allocation4 + $0x1b8] sm:$0xff]  ;;  %v2179_v32 = vld [vmem:[#allocation4 + $0x180] sm:$0xff] }
 0x1fb   :  { %1431 = vpow2.f32 %v1351_v33  ;;  %v2182_v33 = vld [vmem:[#allocation4 + $0x188] sm:$0xff] }
 0x1fc   :  { %1433 = vpow2.f32 %v1352_v35  ;;  %v2185_v35 = vld [vmem:[#allocation4 + $0x190] sm:$0xff] }
 0x1fd   :  { %v487_v43 = vpop.f32.mrf.mxu3  ;;  %v467_v56 = vpop.f32.mrf.mxu2 }
 0x1fe   :  { %v493_v47 = vadd.f32 %v1350_v39, %v487_v43  ;;  %v492_v62 = vadd.f32 %v1349_v40, %v467_v56  ;;  %v2188_v39 = vld [vmem:[#allocation4 + $0x198] sm:$0xff]  ;;  %v2191_v43 = vld [vmem:[#allocation4 + $0x160] sm:$0xff] }
 0x1ff   :  { %v2212_v40 = vld [vmem:[#allocation4 + $0x158] sm:$0xff]  ;;  %v2215_v56 = vld [vmem:[#allocation4 + $0x120] sm:$0xff] }
 0x200   :  { %v1353_v60 = vmul.f32 -1.442695, %v493_v47  ;;  %v2194_v47 = vld [vmem:[#allocation4 + $0x168] sm:$0xff] }
 0x201   :  { %v1432_v63 = vpop.eup %1431 }
 0x202   :  { %v1434_v34 = vpop.eup %1433  ;;  %v497_v36 = vadd.f32 1.0, %v1432_v63  ;;  %1435 = vpow2.f32 %v1353_v60  ;;  %v2197_v60 = vld [vmem:[#allocation4 + $0x170] sm:$0xff]  ;;  %v2200_v63 = vld [vmem:[#allocation4 + $0x178] sm:$0xff] }
 0x203   :  { %v516_v37 = vadd.f32 1.0, %v1434_v34  ;;  %v2203_v34 = vld [vmem:[#allocation4 + $0x140] sm:$0xff] }
 0x204   :  { %1437 = vrcp.f32 %v497_v36  ;;  %v509_v41 = vand.u32 2147483648, %v497_v36  ;;  %v507_v48 = vand.u32 2147483647, %v497_v36  ;;  %vm503_vm10 = vweird.f32 %v497_v36 }
 0x205   :  { %1439 = vrcp.f32 %v516_v37  ;;  %v528_v58 = vand.u32 2147483648, %v516_v37  ;;  %v526_v61 = vand.u32 2147483647, %v516_v37  ;;  %vm522_vm11 = vweird.f32 %v516_v37 }
 0x206   :  { %v510_v42 = vor.u32 1.1754944e-38, %v509_v41  ;;  %vm508_vm14 = vcmp.eq.f32.partialorder %v507_v48, 8.507059e+37  ;;  %v2245_v41 = vld [vmem:[#allocation4 + $0xf0] sm:$0xff]  ;;  %v2254_v48 = vld [vmem:[#allocation4 + $0xc8] sm:$0xff] }
 0x207   :  { %v529_v2 = vor.u32 1.1754944e-38, %v528_v58  ;;  %vm527_vm15 = vcmp.eq.f32.partialorder %v526_v61, 8.507059e+37  ;;  %v2248_v58 = vld [vmem:[#allocation4 + $0xf8] sm:$0xff] }
 0x208   :  { %v1436_v45 = vpop.eup %1435  ;;  %v2260_v61 = vld [vmem:[#allocation4 + $0xd8] sm:$0xff] }
 0x209   :  { %v536_v53 = vadd.f32 1.0, %v1436_v45  ;;  %v2218_v45 = vld [vmem:[#allocation4 + $0x128] sm:$0xff]  ;;  %2745 = vst [vmem:[#allocation21_spill] sm:$0xff] %v2260_v61 }
 0x20a   :  { %v1438_v46 = vpop.eup %1437 }
 0x20b   :  { %v1440_v44 = vpop.eup %1439  ;;  %v499_v57 = vmul.f32 %v1438_v46, %v497_v36  ;;  %1441 = vrcp.f32 %v536_v53  ;;  %vm504_vm8 = vweird.f32 %v1438_v46  ;;  %v548_v14 = vand.u32 2147483648, %v536_v53  ;;  %v2206_v36 = vld [vmem:[#allocation4 + $0x148] sm:$0xff] }
 0x20c   :  { %v518_v0 = vmul.f32 %v1440_v44, %v516_v37  ;;  %1443 = vtanh.f32 %v492_v62  ;;  %vm523_vm9 = vweird.f32 %v1440_v44  ;;  %vm505_vm12 = vmor %vm503_vm10, %vm504_vm8  ;;  %vm542_vm1 = vweird.f32 %v536_v53  ;;  %v2209_v37 = vld [vmem:[#allocation4 + $0x150] sm:$0xff]  ;;  %v2227_v62 = vld [vmem:[#allocation4 + $0x100] sm:$0xff] }
 0x20d   :  { %v500_v38 = vsub.f32 1.0, %v499_v57  ;;  %vm524_vm13 = vmor %vm522_vm11, %vm523_vm9  ;;  %v546_v15 = vand.u32 2147483647, %v536_v53  ;;  %v549_v17 = vor.u32 1.1754944e-38, %v548_v14  ;;  %v2233_v57 = vld [vmem:[#allocation4 + $0x110] sm:$0xff]  ;;  %v2311_v14 = vld [vmem:[#allocation4 + $0x20] sm:$0xff] }
 0x20e   :  { %v519_v55 = vsub.f32 1.0, %v518_v0  ;;  %v2236_v0 = vld [vmem:[#allocation4 + $0x118] sm:$0xff]  ;;  %2762 = vst [vmem:[#allocation20_spill] sm:$0xff] %v2311_v14 }
 0x20f   :  { %v501_v52 = vmul.f32 %v1438_v46, %v500_v38  ;;  %vm547_vm3 = vcmp.eq.f32.partialorder %v546_v15, 8.507059e+37  ;;  %v2239_v38 = vld [vmem:[#allocation4 + $0xe0] sm:$0xff]  ;;  %v2314_v15 = vld [vmem:[#allocation4 + $0x28] sm:$0xff] }
 0x210   :  { %v520_v51 = vmul.f32 %v1440_v44, %v519_v55  ;;  %v2242_v55 = vld [vmem:[#allocation4 + $0xe8] sm:$0xff]  ;;  %2763 = vst [vmem:[#allocation22_spill] sm:$0xff] %v2314_v15 }
 0x211   :  { %v1442_v59 = vpop.eup %1441  ;;  %v502_v49 = vadd.f32 %v1438_v46, %v501_v52  ;;  %v2251_v52 = vld [vmem:[#allocation4 + $0xc0] sm:$0xff] }
 0x212   :  { %v521_v54 = vadd.f32 %v1440_v44, %v520_v51  ;;  %v538_v1 = vmul.f32 %v1442_v59, %v536_v53  ;;  %v1444_v4 = vpop.eup %1443  ;;  %vm543_vm0 = vweird.f32 %v1442_v59  ;;  %v2221_v53 = vld [vmem:[#allocation4 + $0x130] sm:$0xff] }
 0x213   :  { %v506_v3 = vsel %vm505_vm12, %v1438_v46, %v502_v49  ;;  %vm544_vm2 = vmor %vm542_vm1, %vm543_vm0  ;;  %v2224_v46 = vld [vmem:[#allocation4 + $0x138] sm:$0xff]  ;;  %v2257_v51 = vld [vmem:[#allocation4 + $0xd0] sm:$0xff] }
 0x214   :  { %v511_v5 = vsel %vm508_vm14, %v510_v42, %v506_v3  ;;  %v525_v6 = vsel %vm524_vm13, %v1440_v44, %v521_v54  ;;  %v539_v7 = vsub.f32 1.0, %v538_v1  ;;  %v2230_v44 = vld [vmem:[#allocation4 + $0x108] sm:$0xff]  ;;  %2744 = vst [vmem:[#allocation7_spill] sm:$0xff] %v2257_v51  ;;  %v2269_v42 = vld [vmem:[#allocation4 + $0xb0] sm:$0xff]  ;;  %v2272_v54 = vld [vmem:[#allocation4 + $0xb8] sm:$0xff] }
 0x215   :  { %v530_v8 = vsel %vm527_vm15, %v529_v2, %v525_v6  ;;  %v553_v9 = vmul.f32 %v1444_v4, %v511_v5  ;;  %v2266_v49 = vld [vmem:[#allocation4 + $0xa8] sm:$0xff]  ;;  %2748 = vst [vmem:[#allocation10_spill] sm:$0xff] %v2269_v42  ;;  %v2275_v1 = vld [vmem:[#allocation4 + $0x80] sm:$0xff]  ;;  %v2281_v3 = vld [vmem:[#allocation4 + $0x90] sm:$0xff] }
 0x216   :  { %v552_v10 = vmul.f32 %v530_v8, %v2054_v50  ;;  %v540_v11 = vmul.f32 %v1442_v59, %v539_v7  ;;  %v2143_v50 = vld [vmem:[#allocation4 + $0x1e0] sm:$0xff]  ;;  %2747 = vst [vmem:[#allocation9_spill] sm:$0xff] %v2266_v49  ;;  %v2278_v2 = vld [vmem:[#allocation4 + $0x88] sm:$0xff]  ;;  %v2284_v4 = vld [vmem:[#allocation4 + $0x98] sm:$0xff] }
 0x217   :  { %2749 = vst [vmem:[#allocation25_spill] sm:$0xff] %v2272_v54  ;;  %v2287_v5 = vld [vmem:[#allocation4 + $0x60] sm:$0xff]  ;;  %v2290_v6 = vld [vmem:[#allocation4 + $0x68] sm:$0xff]  ;;  %v2293_v7 = vld [vmem:[#allocation4 + $0x70] sm:$0xff] }
 0x218   :  { %v2137_v12 = vadd.f32 %v553_v9, %v552_v10  ;;  %v541_v13 = vadd.f32 %v1442_v59, %v540_v11  ;;  %2750 = vst [vmem:[#allocation11_spill] sm:$0xff] %v2275_v1  ;;  %v2296_v8 = vld [vmem:[#allocation4 + $0x78] sm:$0xff]  ;;  %v2299_v9 = vld [vmem:[#allocation4 + $0x40] sm:$0xff]  ;;  %v2302_v10 = vld [vmem:[#allocation4 + $0x48] sm:$0xff] }
 0x219   :  { %2751 = vst [vmem:[#allocation12_spill] sm:$0xff] %v2278_v2  ;;  %v2305_v11 = vld [vmem:[#allocation4 + $0x50] sm:$0xff] }
 0x21a   :  { %1445 = vtanh.f32 %v2137_v12  ;;  %v545_v16 = vsel %vm544_vm2, %v1442_v59, %v541_v13  ;;  %v2263_v59 = vld [vmem:[#allocation4 + $0xa0] sm:$0xff]  ;;  %2752 = vst [vmem:[#allocation13_spill] sm:$0xff] %v2281_v3  ;;  %v2308_v13 = vld [vmem:[#allocation4 + $0x58] sm:$0xff] }
 0x21b   :  { %v550_v19 = vsel %vm547_vm3, %v549_v17, %v545_v16  ;;  %2746 = vst [vmem:[#allocation8_spill] sm:$0xff] %v2263_v59  ;;  %v2317_v16 = vld [vmem:[#allocation4 + $0x30] sm:$0xff]  ;;  %v2320_v17 = vld [vmem:[#allocation4 + $0x38] sm:$0xff] }
 0x21c   :  { %2753 = vst [vmem:[#allocation29_spill] sm:$0xff] %v2284_v4 }
 0x21d   :  { %2754 = vst [vmem:[#allocation14_spill] sm:$0xff] %v2287_v5 }
 0x21e   :  { %2755 = vst [vmem:[#allocation15_spill] sm:$0xff] %v2290_v6 }
 0x21f   :  { %2756 = vst [vmem:[#allocation16_spill] sm:$0xff] %v2293_v7 }
 0x220   :  { %v1446_v18 = vpop.eup %1445  ;;  %2757 = vst [vmem:[#allocation30_spill] sm:$0xff] %v2296_v8 }
 0x221   :  { %v556_v20 = vmul.f32 %v1446_v18, %v550_v19  ;;  %2758 = vst [vmem:[#allocation17_spill] sm:$0xff] %v2299_v9  ;;  %v2323_v18 = vld [vmem:[#allocation4] sm:$0xff]  ;;  %v2326_v19 = vld [vmem:[#allocation4 + $0x8] sm:$0xff] }
 0x222   :  { %2759 = vst [vmem:[#allocation18_spill] sm:$0xff] %v2302_v10 }
 0x223   :  { %1354 = vst [vmem:[%s2557_s2 + $0x10] sm:$0xff] %v556_v20  ;;  %580 = vmatmul.f32.vlgmr.msrb.gmra.mxu0 %v556_v20  ;;  %600 = vmatmul.f32.vlgmr.msrb.gmra.mxu1 %v556_v20 }
 0x224   :  { %620 = vmatmul.f32.vlgmr.msrb.gmra.mxu2 %v556_v20  ;;  %640 = vmatmul.f32.vlgmr.msrb.gmra.mxu3 %v556_v20  ;;  %2760 = vst [vmem:[#allocation19_spill] sm:$0xff] %v2305_v11  ;;  %v2329_v20 = vld [vmem:[#allocation4 + $0x10] sm:$0xff] }
 0x225   :  { %872 = vmatpush.msrb.mxu0 %v2143_v50  ;;  %892 = vmatpush.msrb.mxu1 %v2146_v21  ;;  %2761 = vst [vmem:[#allocation31_spill] sm:$0xff] %v2308_v13 }
 0x226   :  { %912 = vmatpush.msrb.mxu2 %v2149_v22  ;;  %932 = vmatpush.msrb.mxu3 %v2152_v23  ;;  %2764 = vst [vmem:[#allocation23_spill] sm:$0xff] %v2317_v16 }
 0x227   :  { %873 = vmatpush.msrb.mxu0 %v2155_v24  ;;  %893 = vmatpush.msrb.mxu1 %v2158_v25  ;;  %2765 = vst [vmem:[#allocation32_spill] sm:$0xff] %v2320_v17 }
 0x228   :  { %913 = vmatpush.msrb.mxu2 %v2161_v26  ;;  %933 = vmatpush.msrb.mxu3 %v2164_v27  ;;  %2766 = vst [vmem:[#allocation24_spill] sm:$0xff] %v2323_v18 }
 0x229   :  { %874 = vmatpush.msrb.mxu0 %v2167_v28  ;;  %894 = vmatpush.msrb.mxu1 %v2170_v29  ;;  %2767 = vst [vmem:[#allocation26_spill] sm:$0xff] %v2326_v19 }
 0x22a   :  { %914 = vmatpush.msrb.mxu2 %v2173_v30  ;;  %934 = vmatpush.msrb.mxu3 %v2176_v31  ;;  %2768 = vst [vmem:[#allocation27_spill] sm:$0xff] %v2329_v20 }
 0x22b   :  { %875 = vmatpush.msrb.mxu0 %v2179_v32  ;;  %895 = vmatpush.msrb.mxu1 %v2182_v33 }
 0x22c   :  { %915 = vmatpush.msrb.mxu2 %v2185_v35  ;;  %935 = vmatpush.msrb.mxu3 %v2188_v39 }
 0x22d   :  { %876 = vmatpush.msrb.mxu0 %v2191_v43  ;;  %896 = vmatpush.msrb.mxu1 %v2194_v47 }
 0x22e   :  { %916 = vmatpush.msrb.mxu2 %v2197_v60  ;;  %936 = vmatpush.msrb.mxu3 %v2200_v63 }
 0x22f   :  { %877 = vmatpush.msrb.mxu0 %v2203_v34  ;;  %897 = vmatpush.msrb.mxu1 %v2206_v36 }
 0x230   :  { %917 = vmatpush.msrb.mxu2 %v2209_v37  ;;  %937 = vmatpush.msrb.mxu3 %v2212_v40 }
 0x231   :  { %878 = vmatpush.msrb.mxu0 %v2215_v56  ;;  %898 = vmatpush.msrb.mxu1 %v2218_v45 }
 0x232   :  { %918 = vmatpush.msrb.mxu2 %v2221_v53  ;;  %938 = vmatpush.msrb.mxu3 %v2224_v46 }
 0x233   :  { %879 = vmatpush.msrb.mxu0 %v2227_v62  ;;  %899 = vmatpush.msrb.mxu1 %v2230_v44 }
 0x234   :  { %919 = vmatpush.msrb.mxu2 %v2233_v57  ;;  %939 = vmatpush.msrb.mxu3 %v2236_v0 }
 0x235   :  { %880 = vmatpush.msrb.mxu0 %v2239_v38  ;;  %900 = vmatpush.msrb.mxu1 %v2242_v55 }
 0x236   :  { %920 = vmatpush.msrb.mxu2 %v2245_v41  ;;  %940 = vmatpush.msrb.mxu3 %v2248_v58 }
 0x237   :  { %881 = vmatpush.msrb.mxu0 %v2251_v52  ;;  %901 = vmatpush.msrb.mxu1 %v2254_v48 }
 0x238   :  { %921 = vmatpush.msrb.mxu2 %v2257_v51  ;;  %941 = vmatpush.msrb.mxu3 %v2260_v61 }
 0x239   :  { %882 = vmatpush.msrb.mxu0 %v2263_v59  ;;  %902 = vmatpush.msrb.mxu1 %v2266_v49 }
 0x23a   :  { %922 = vmatpush.msrb.mxu2 %v2269_v42  ;;  %942 = vmatpush.msrb.mxu3 %v2272_v54 }
 0x23b   :  { %883 = vmatpush.msrb.mxu0 %v2275_v1  ;;  %903 = vmatpush.msrb.mxu1 %v2278_v2 }
 0x23c   :  { %923 = vmatpush.msrb.mxu2 %v2281_v3  ;;  %943 = vmatpush.msrb.mxu3 %v2284_v4 }
 0x23d   :  { %884 = vmatpush.msrb.mxu0 %v2287_v5  ;;  %904 = vmatpush.msrb.mxu1 %v2290_v6 }
 0x23e   :  { %924 = vmatpush.msrb.mxu2 %v2293_v7  ;;  %944 = vmatpush.msrb.mxu3 %v2296_v8 }
 0x23f   :  { %885 = vmatpush.msrb.mxu0 %v2299_v9  ;;  %905 = vmatpush.msrb.mxu1 %v2302_v10 }
 0x240   :  { %925 = vmatpush.msrb.mxu2 %v2305_v11  ;;  %945 = vmatpush.msrb.mxu3 %v2308_v13 }
 0x241   :  { %886 = vmatpush.msrb.mxu0 %v2311_v14  ;;  %906 = vmatpush.msrb.mxu1 %v2314_v15  ;;  %v2332_v15 = vld [vmem:[#allocation4 + $0x18] sm:$0xff] }
 0x242   :  { %926 = vmatpush.msrb.mxu2 %v2317_v16  ;;  %946 = vmatpush.msrb.mxu3 %v2320_v17  ;;  %2769 = vst [vmem:[#allocation33_spill] sm:$0xff] %v2332_v15  ;;  %v1355_v17 = vld [vmem:[%s2555_s0 + $0x60] sm:$0xff] }
 0x243   :  { %887 = vmatpush.msrb.mxu0 %v2323_v18  ;;  %907 = vmatpush.msrb.mxu1 %v2326_v19  ;;  %v1356_v18 = vld [vmem:[%s2555_s0 + $0x68] sm:$0xff] }
 0x244   :  { %927 = vmatpush.msrb.mxu2 %v2329_v20  ;;  %947 = vmatpush.msrb.mxu3 %v2332_v15  ;;  %v1358_v20 = vld [vmem:[%s2555_s0 + $0x78] sm:$0xff] }
 0x2a0   :  { %v581_v16 = vpop.f32.mrf.mxu0  ;;  %v601_v14 = vpop.f32.mrf.mxu1 }
 0x2a1   :  { %v644_v13 = vadd.f32 %v1355_v17, %v581_v16  ;;  %v645_v19 = vadd.f32 %v1356_v18, %v601_v14 }
 0x2a3   :  { %v1359_v11 = vmul.f32 -1.442695, %v644_v13  ;;  %v1360_v10 = vmul.f32 -1.442695, %v645_v19  ;;  %v1357_v13 = vld [vmem:[%s2555_s0 + $0x70] sm:$0xff] }
 0x2a5   :  { %1447 = vpow2.f32 %v1359_v11 }
 0x2a6   :  { %1449 = vpow2.f32 %v1360_v10 }
 0x2a7   :  { %v641_v15 = vpop.f32.mrf.mxu3  ;;  %v621_v11 = vpop.f32.mrf.mxu2 }
 0x2a8   :  { %v647_v9 = vadd.f32 %v1358_v20, %v641_v15  ;;  %v646_v18 = vadd.f32 %v1357_v13, %v621_v11 }
 0x2aa   :  { %v1361_v8 = vmul.f32 -1.442695, %v647_v9 }
 0x2ab   :  { %v1448_v7 = vpop.eup %1447 }
 0x2ac   :  { %v1450_v6 = vpop.eup %1449  ;;  %v651_v5 = vadd.f32 1.0, %v1448_v7  ;;  %1451 = vpow2.f32 %v1361_v8 }
 0x2ad   :  { %v670_v4 = vadd.f32 1.0, %v1450_v6 }
 0x2ae   :  { %1453 = vrcp.f32 %v651_v5  ;;  %v663_v7 = vand.u32 2147483648, %v651_v5  ;;  %v661_v3 = vand.u32 2147483647, %v651_v5  ;;  %vm657_vm6 = vweird.f32 %v651_v5 }
 0x2af   :  { %1455 = vrcp.f32 %v670_v4  ;;  %v682_v6 = vand.u32 2147483648, %v670_v4  ;;  %v680_v1 = vand.u32 2147483647, %v670_v4  ;;  %vm676_vm7 = vweird.f32 %v670_v4 }
 0x2b0   :  { %v664_v13 = vor.u32 1.1754944e-38, %v663_v7  ;;  %vm662_vm10 = vcmp.eq.f32.partialorder %v661_v3, 8.507059e+37 }
 0x2b1   :  { %vm681_vm11 = vcmp.eq.f32.partialorder %v680_v1, 8.507059e+37 }
 0x2b2   :  { %v1452_v14 = vpop.eup %1451 }
 0x2b3   :  { %v690_v16 = vadd.f32 1.0, %v1452_v14 }
 0x2b4   :  { %v1454_v17 = vpop.eup %1453 }
 0x2b5   :  { %v1456_v10 = vpop.eup %1455  ;;  %v653_v19 = vmul.f32 %v1454_v17, %v651_v5  ;;  %1457 = vrcp.f32 %v690_v16  ;;  %vm658_vm4 = vweird.f32 %v1454_v17  ;;  %vm696_vm13 = vweird.f32 %v690_v16 }
 0x2b6   :  { %v672_v9 = vmul.f32 %v1456_v10, %v670_v4  ;;  %1459 = vtanh.f32 %v646_v18  ;;  %vm677_vm5 = vweird.f32 %v1456_v10  ;;  %vm659_vm8 = vmor %vm657_vm6, %vm658_vm4 }
 0x2b7   :  { %v654_v15 = vsub.f32 1.0, %v653_v19  ;;  %vm678_vm9 = vmor %vm676_vm7, %vm677_vm5  ;;  %v683_v19 = vor.u32 1.1754944e-38, %v682_v6  ;;  %v2777_v6 = vld [vmem:[#allocation12_spill] sm:$0xff] }
 0x2b8   :  { %v673_v20 = vsub.f32 1.0, %v672_v9 }
 0x2b9   :  { %v655_v8 = vmul.f32 %v1454_v17, %v654_v15 }
 0x2ba   :  { %v674_v2 = vmul.f32 %v1456_v10, %v673_v20 }
 0x2bb   :  { %v1458_v54 = vpop.eup %1457  ;;  %v656_v42 = vadd.f32 %v1454_v17, %v655_v8 }
 0x2bc   :  { %v675_v11 = vadd.f32 %v1456_v10, %v674_v2  ;;  %v692_v14 = vmul.f32 %v1458_v54, %v690_v16  ;;  %v1460_v18 = vpop.eup %1459  ;;  %vm697_vm12 = vweird.f32 %v1458_v54  ;;  %v702_v2 = vand.u32 2147483648, %v690_v16 }
 0x2bd   :  { %v660_v9 = vsel %vm659_vm8, %v1454_v17, %v656_v42  ;;  %v700_v42 = vand.u32 2147483647, %v690_v16  ;;  %vm698_vm14 = vmor %vm696_vm13, %vm697_vm12  ;;  %v2776_v16 = vld [vmem:[#allocation11_spill] sm:$0xff] }
 0x2be   :  { %v665_v49 = vsel %vm662_vm10, %v664_v13, %v660_v9  ;;  %v679_v15 = vsel %vm678_vm9, %v1456_v10, %v675_v11  ;;  %v693_v59 = vsub.f32 1.0, %v692_v14  ;;  %v703_v17 = vor.u32 1.1754944e-38, %v702_v2  ;;  %v2778_v13 = vld [vmem:[#allocation13_spill] sm:$0xff]  ;;  %v2780_v14 = vld [vmem:[#allocation14_spill] sm:$0xff]  ;;  %v2782_v9 = vld [vmem:[#allocation16_spill] sm:$0xff] }
 0x2bf   :  { %v684_v20 = vsel %vm681_vm11, %v683_v19, %v679_v15  ;;  %v707_v61 = vmul.f32 %v1460_v18, %v665_v49  ;;  %vm701_vm15 = vcmp.eq.f32.partialorder %v700_v42, 8.507059e+37  ;;  %v2774_v49 = vld [vmem:[#allocation10_spill] sm:$0xff]  ;;  %v2779_v11 = vld [vmem:[#allocation29_spill] sm:$0xff]  ;;  %v2781_v19 = vld [vmem:[#allocation15_spill] sm:$0xff] }
 0x2c0   :  { %v706_v51 = vmul.f32 %v684_v20, %v2137_v12  ;;  %v694_v8 = vmul.f32 %v1458_v54, %v693_v59  ;;  %v2770_v12 = vld [vmem:[#allocation7_spill] sm:$0xff]  ;;  %v2773_v59 = vld [vmem:[#allocation9_spill] sm:$0xff]  ;;  %v2783_v18 = vld [vmem:[#allocation30_spill] sm:$0xff] }
 0x2c1   :  { %v2784_v15 = vld [vmem:[#allocation17_spill] sm:$0xff]  ;;  %v2785_v20 = vld [vmem:[#allocation18_spill] sm:$0xff]  ;;  %v2788_v2 = vld [vmem:[#allocation20_spill] sm:$0xff] }
 0x2c2   :  { %v2348_v5 = vadd.f32 %v707_v61, %v706_v51  ;;  %v695_v4 = vadd.f32 %v1458_v54, %v694_v8  ;;  %v2771_v51 = vld [vmem:[#allocation21_spill] sm:$0xff]  ;;  %v2772_v61 = vld [vmem:[#allocation8_spill] sm:$0xff]  ;;  %v2786_v8 = vld [vmem:[#allocation19_spill] sm:$0xff] }
 0x2c3   :  { %v2789_v42 = vld [vmem:[#allocation22_spill] sm:$0xff] }
 0x2c4   :  { %1461 = vtanh.f32 %v2348_v5  ;;  %v699_v3 = vsel %vm698_vm14, %v1458_v54, %v695_v4  ;;  %v2775_v54 = vld [vmem:[#allocation25_spill] sm:$0xff]  ;;  %v2787_v4 = vld [vmem:[#allocation31_spill] sm:$0xff] }
 0x2c5   :  { %v704_v10 = vsel %vm701_vm15, %v703_v17, %v699_v3  ;;  %v2790_v3 = vld [vmem:[#allocation23_spill] sm:$0xff]  ;;  %v2791_v17 = vld [vmem:[#allocation32_spill] sm:$0xff] }
 0x2ca   :  { %v1462_v1 = vpop.eup %1461 }
 0x2cb   :  { %v710_v7 = vmul.f32 %v1462_v1, %v704_v10  ;;  %v2792_v1 = vld [vmem:[#allocation24_spill] sm:$0xff]  ;;  %v2793_v10 = vld [vmem:[#allocation26_spill] sm:$0xff] }
 0x2cd   :  { %1362 = vst [vmem:[%s2557_s2 + $0x18] sm:$0xff] %v710_v7  ;;  %734 = vmatmul.f32.vlgmr.msra.gmra.mxu0 %v710_v7  ;;  %754 = vmatmul.f32.vlgmr.msra.gmra.mxu1 %v710_v7 }
 0x2ce   :  { %774 = vmatmul.f32.vlgmr.msra.gmra.mxu2 %v710_v7  ;;  %794 = vmatmul.f32.vlgmr.msra.gmra.mxu3 %v710_v7  ;;  %v2794_v7 = vld [vmem:[#allocation27_spill] sm:$0xff] }
 0x2cf   :  { %1026 = vmatpush.msra.mxu0 %v2143_v50  ;;  %1046 = vmatpush.msra.mxu1 %v2146_v21 }
 0x2d0   :  { %1066 = vmatpush.msra.mxu2 %v2149_v22  ;;  %1086 = vmatpush.msra.mxu3 %v2152_v23 }
 0x2d1   :  { %1027 = vmatpush.msra.mxu0 %v2155_v24  ;;  %1047 = vmatpush.msra.mxu1 %v2158_v25 }
 0x2d2   :  { %1067 = vmatpush.msra.mxu2 %v2161_v26  ;;  %1087 = vmatpush.msra.mxu3 %v2164_v27 }
 0x2d3   :  { %1028 = vmatpush.msra.mxu0 %v2167_v28  ;;  %1048 = vmatpush.msra.mxu1 %v2170_v29 }
 0x2d4   :  { %1068 = vmatpush.msra.mxu2 %v2173_v30  ;;  %1088 = vmatpush.msra.mxu3 %v2176_v31 }
 0x2d5   :  { %1029 = vmatpush.msra.mxu0 %v2179_v32  ;;  %1049 = vmatpush.msra.mxu1 %v2182_v33 }
 0x2d6   :  { %1069 = vmatpush.msra.mxu2 %v2185_v35  ;;  %1089 = vmatpush.msra.mxu3 %v2188_v39 }
 0x2d7   :  { %1030 = vmatpush.msra.mxu0 %v2191_v43  ;;  %1050 = vmatpush.msra.mxu1 %v2194_v47 }
 0x2d8   :  { %1070 = vmatpush.msra.mxu2 %v2197_v60  ;;  %1090 = vmatpush.msra.mxu3 %v2200_v63 }
 0x2d9   :  { %1031 = vmatpush.msra.mxu0 %v2203_v34  ;;  %1051 = vmatpush.msra.mxu1 %v2206_v36 }
 0x2da   :  { %1071 = vmatpush.msra.mxu2 %v2209_v37  ;;  %1091 = vmatpush.msra.mxu3 %v2212_v40 }
 0x2db   :  { %1032 = vmatpush.msra.mxu0 %v2215_v56  ;;  %1052 = vmatpush.msra.mxu1 %v2218_v45 }
 0x2dc   :  { %1072 = vmatpush.msra.mxu2 %v2221_v53  ;;  %1092 = vmatpush.msra.mxu3 %v2224_v46 }
 0x2dd   :  { %1033 = vmatpush.msra.mxu0 %v2227_v62  ;;  %1053 = vmatpush.msra.mxu1 %v2230_v44 }
 0x2de   :  { %1073 = vmatpush.msra.mxu2 %v2233_v57  ;;  %1093 = vmatpush.msra.mxu3 %v2236_v0 }
 0x2df   :  { %1034 = vmatpush.msra.mxu0 %v2239_v38  ;;  %1054 = vmatpush.msra.mxu1 %v2242_v55 }
 0x2e0   :  { %1074 = vmatpush.msra.mxu2 %v2245_v41  ;;  %1094 = vmatpush.msra.mxu3 %v2248_v58 }
 0x2e1   :  { %1035 = vmatpush.msra.mxu0 %v2251_v52  ;;  %1055 = vmatpush.msra.mxu1 %v2254_v48 }
 0x2e2   :  { %1075 = vmatpush.msra.mxu2 %v2770_v12  ;;  %1095 = vmatpush.msra.mxu3 %v2771_v51 }
 0x2e3   :  { %1036 = vmatpush.msra.mxu0 %v2772_v61  ;;  %1056 = vmatpush.msra.mxu1 %v2773_v59 }
 0x2e4   :  { %1076 = vmatpush.msra.mxu2 %v2774_v49  ;;  %1096 = vmatpush.msra.mxu3 %v2775_v54 }
 0x2e5   :  { %1037 = vmatpush.msra.mxu0 %v2776_v16  ;;  %1057 = vmatpush.msra.mxu1 %v2777_v6 }
 0x2e6   :  { %1077 = vmatpush.msra.mxu2 %v2778_v13  ;;  %1097 = vmatpush.msra.mxu3 %v2779_v11 }
 0x2e7   :  { %1038 = vmatpush.msra.mxu0 %v2780_v14  ;;  %1058 = vmatpush.msra.mxu1 %v2781_v19 }
 0x2e8   :  { %1078 = vmatpush.msra.mxu2 %v2782_v9  ;;  %1098 = vmatpush.msra.mxu3 %v2783_v18 }
 0x2e9   :  { %1039 = vmatpush.msra.mxu0 %v2784_v15  ;;  %1059 = vmatpush.msra.mxu1 %v2785_v20  ;;  %v2795_v15 = vld [vmem:[#allocation33_spill] sm:$0xff] }
 0x2ea   :  { %1079 = vmatpush.msra.mxu2 %v2786_v8  ;;  %1099 = vmatpush.msra.mxu3 %v2787_v4  ;;  %v1363_v4 = vld [vmem:[%s2555_s0 + $0x80] sm:$0xff] }
 0x2eb   :  { %1040 = vmatpush.msra.mxu0 %v2788_v2  ;;  %1060 = vmatpush.msra.mxu1 %v2789_v42  ;;  %v1364_v42 = vld [vmem:[%s2555_s0 + $0x88] sm:$0xff] }
 0x2ec   :  { %1080 = vmatpush.msra.mxu2 %v2790_v3  ;;  %1100 = vmatpush.msra.mxu3 %v2791_v17 }
 0x2ed   :  { %1041 = vmatpush.msra.mxu0 %v2792_v1  ;;  %1061 = vmatpush.msra.mxu1 %v2793_v10 }
 0x2ee   :  { %1081 = vmatpush.msra.mxu2 %v2794_v7  ;;  %1101 = vmatpush.msra.mxu3 %v2795_v15  ;;  %v1366_v7 = vld [vmem:[%s2555_s0 + $0x98] sm:$0xff] }
 0x34a   :  { %v735_v2 = vpop.f32.mrf.mxu0  ;;  %v755_v3 = vpop.f32.mrf.mxu1 }
 0x34b   :  { %v798_v8 = vadd.f32 %v1363_v4, %v735_v2  ;;  %v799_v17 = vadd.f32 %v1364_v42, %v755_v3 }
 0x34d   :  { %v1367_v20 = vmul.f32 -1.442695, %v798_v8  ;;  %v1368_v1 = vmul.f32 -1.442695, %v799_v17  ;;  %v1365_v8 = vld [vmem:[%s2555_s0 + $0x90] sm:$0xff] }
 0x34f   :  { %1463 = vpow2.f32 %v1367_v20 }
 0x350   :  { %1465 = vpow2.f32 %v1368_v1 }
 0x351   :  { %v795_v15 = vpop.f32.mrf.mxu3  ;;  %v775_v20 = vpop.f32.mrf.mxu2 }
 0x352   :  { %v801_v10 = vadd.f32 %v1366_v7, %v795_v15  ;;  %v800_v3 = vadd.f32 %v1365_v8, %v775_v20 }
 0x354   :  { %v1369_v18 = vmul.f32 -1.442695, %v801_v10 }
 0x355   :  { %v1464_v9 = vpop.eup %1463 }
 0x356   :  { %v1466_v19 = vpop.eup %1465  ;;  %v805_v14 = vadd.f32 1.0, %v1464_v9  ;;  %1467 = vpow2.f32 %v1369_v18 }
 0x357   :  { %v824_v11 = vadd.f32 1.0, %v1466_v19 }
 0x358   :  { %1469 = vrcp.f32 %v805_v14  ;;  %v817_v9 = vand.u32 2147483648, %v805_v14  ;;  %v815_v13 = vand.u32 2147483647, %v805_v14  ;;  %vm811_vm2 = vweird.f32 %v805_v14 }
 0x359   :  { %1471 = vrcp.f32 %v824_v11  ;;  %v836_v19 = vand.u32 2147483648, %v824_v11  ;;  %v834_v16 = vand.u32 2147483647, %v824_v11  ;;  %vm830_vm3 = vweird.f32 %v824_v11 }
 0x35a   :  { %v818_v8 = vor.u32 1.1754944e-38, %v817_v9  ;;  %vm816_vm6 = vcmp.eq.f32.partialorder %v815_v13, 8.507059e+37 }
 0x35b   :  { %vm835_vm7 = vcmp.eq.f32.partialorder %v834_v16, 8.507059e+37 }
 0x35c   :  { %v1468_v4 = vpop.eup %1467 }
 0x35d   :  { %v844_v2 = vadd.f32 1.0, %v1468_v4 }
 0x35e   :  { %v1470_v42 = vpop.eup %1469 }
 0x35f   :  { %v1472_v17 = vpop.eup %1471  ;;  %v807_v1 = vmul.f32 %v1470_v42, %v805_v14  ;;  %1473 = vrcp.f32 %v844_v2  ;;  %vm812_vm0 = vweird.f32 %v1470_v42  ;;  %vm850_vm9 = vweird.f32 %v844_v2 }
 0x360   :  { %v826_v15 = vmul.f32 %v1472_v17, %v824_v11  ;;  %1475 = vtanh.f32 %v800_v3  ;;  %vm831_vm1 = vweird.f32 %v1472_v17  ;;  %vm813_vm4 = vmor %vm811_vm2, %vm812_vm0 }
 0x361   :  { %v808_v10 = vsub.f32 1.0, %v807_v1  ;;  %vm832_vm5 = vmor %vm830_vm3, %vm831_vm1  ;;  %v837_v1 = vor.u32 1.1754944e-38, %v836_v19 }
 0x362   :  { %v827_v7 = vsub.f32 1.0, %v826_v15 }
 0x363   :  { %v809_v18 = vmul.f32 %v1470_v42, %v808_v10 }
 0x364   :  { %v828_v6 = vmul.f32 %v1472_v17, %v827_v7 }
 0x365   :  { %v1474_v54 = vpop.eup %1473  ;;  %v810_v49 = vadd.f32 %v1470_v42, %v809_v18 }
 0x366   :  { %v829_v20 = vadd.f32 %v1472_v17, %v828_v6  ;;  %v846_v4 = vmul.f32 %v1474_v54, %v844_v2  ;;  %v1476_v3 = vpop.eup %1475  ;;  %vm851_vm8 = vweird.f32 %v1474_v54  ;;  %v856_v6 = vand.u32 2147483648, %v844_v2 }
 0x367   :  { %v814_v15 = vsel %vm813_vm4, %v1470_v42, %v810_v49  ;;  %v854_v49 = vand.u32 2147483647, %v844_v2  ;;  %vm852_vm10 = vmor %vm850_vm9, %vm851_vm8 }
 0x368   :  { %v819_v59 = vsel %vm816_vm6, %v818_v8, %v814_v15  ;;  %v833_v10 = vsel %vm832_vm5, %v1472_v17, %v829_v20  ;;  %v847_v61 = vsub.f32 1.0, %v846_v4  ;;  %v857_v42 = vor.u32 1.1754944e-38, %v856_v6 }
 0x369   :  { %v838_v7 = vsel %vm835_vm7, %v837_v1, %v833_v10  ;;  %v861_v51 = vmul.f32 %v1476_v3, %v819_v59  ;;  %vm855_vm11 = vcmp.eq.f32.partialorder %v854_v49, 8.507059e+37  ;;  %v1373_v59 = vld [vmem:[%s2555_s0 + $0xb0] sm:$0xff] }
 0x36a   :  { %v860_v12 = vmul.f32 %v838_v7, %v2348_v5  ;;  %v848_v18 = vmul.f32 %v1474_v54, %v847_v61 }
 0x36c   :  { %v2431_v14 = vadd.f32 %v861_v51, %v860_v12  ;;  %v849_v11 = vadd.f32 %v1474_v54, %v848_v18 }
 0x36e   :  { %1477 = vtanh.f32 %v2431_v14  ;;  %v853_v13 = vsel %vm852_vm10, %v1474_v54, %v849_v11 }
 0x36f   :  { %v858_v17 = vsel %vm855_vm11, %v857_v42, %v853_v13 }
 0x374   :  { %v1478_v16 = vpop.eup %1477 }
 0x375   :  { %v864_v9 = vmul.f32 %v1478_v16, %v858_v17 }
 0x377   :  { %1370 = vst [vmem:[%s2557_s2 + $0x20] sm:$0xff] %v864_v9  ;;  %888 = vmatmul.f32.vlgmr.msrb.gmra.mxu0 %v864_v9  ;;  %908 = vmatmul.f32.vlgmr.msrb.gmra.mxu1 %v864_v9 }
 0x378   :  { %928 = vmatmul.f32.vlgmr.msrb.gmra.mxu2 %v864_v9  ;;  %948 = vmatmul.f32.vlgmr.msrb.gmra.mxu3 %v864_v9 }
 0x379   :  { %1180 = vmatpush.msrb.mxu0 %v2143_v50  ;;  %1200 = vmatpush.msrb.mxu1 %v2146_v21  ;;  %v2796_v50 = vld [vmem:[#allocation7_spill] sm:$0xff]  ;;  %v2797_v21 = vld [vmem:[#allocation21_spill] sm:$0xff] }
 0x37a   :  { %1220 = vmatpush.msrb.mxu2 %v2149_v22  ;;  %1240 = vmatpush.msrb.mxu3 %v2152_v23  ;;  %v2798_v22 = vld [vmem:[#allocation8_spill] sm:$0xff]  ;;  %v2799_v23 = vld [vmem:[#allocation9_spill] sm:$0xff] }
 0x37b   :  { %1181 = vmatpush.msrb.mxu0 %v2155_v24  ;;  %1201 = vmatpush.msrb.mxu1 %v2158_v25  ;;  %v2800_v24 = vld [vmem:[#allocation10_spill] sm:$0xff]  ;;  %v2801_v25 = vld [vmem:[#allocation25_spill] sm:$0xff] }
 0x37c   :  { %1221 = vmatpush.msrb.mxu2 %v2161_v26  ;;  %1241 = vmatpush.msrb.mxu3 %v2164_v27  ;;  %v2802_v26 = vld [vmem:[#allocation11_spill] sm:$0xff]  ;;  %v2803_v27 = vld [vmem:[#allocation12_spill] sm:$0xff] }
 0x37d   :  { %1182 = vmatpush.msrb.mxu0 %v2167_v28  ;;  %1202 = vmatpush.msrb.mxu1 %v2170_v29  ;;  %v2804_v28 = vld [vmem:[#allocation13_spill] sm:$0xff] }
 0x37e   :  { %1222 = vmatpush.msrb.mxu2 %v2173_v30  ;;  %1242 = vmatpush.msrb.mxu3 %v2176_v31  ;;  %v2805_v29 = vld [vmem:[#allocation29_spill] sm:$0xff]  ;;  %v2806_v30 = vld [vmem:[#allocation14_spill] sm:$0xff]  ;;  %v2807_v31 = vld [vmem:[#allocation15_spill] sm:$0xff] }
 0x37f   :  { %1183 = vmatpush.msrb.mxu0 %v2179_v32  ;;  %1203 = vmatpush.msrb.mxu1 %v2182_v33  ;;  %v2808_v32 = vld [vmem:[#allocation16_spill] sm:$0xff]  ;;  %v2809_v33 = vld [vmem:[#allocation30_spill] sm:$0xff] }
 0x380   :  { %1223 = vmatpush.msrb.mxu2 %v2185_v35  ;;  %1243 = vmatpush.msrb.mxu3 %v2188_v39  ;;  %v2810_v35 = vld [vmem:[#allocation17_spill] sm:$0xff]  ;;  %v2811_v39 = vld [vmem:[#allocation18_spill] sm:$0xff] }
 0x381   :  { %1184 = vmatpush.msrb.mxu0 %v2191_v43  ;;  %1204 = vmatpush.msrb.mxu1 %v2194_v47  ;;  %v2812_v43 = vld [vmem:[#allocation19_spill] sm:$0xff] }
 0x382   :  { %1224 = vmatpush.msrb.mxu2 %v2197_v60  ;;  %1244 = vmatpush.msrb.mxu3 %v2200_v63  ;;  %v2813_v47 = vld [vmem:[#allocation31_spill] sm:$0xff]  ;;  %v2814_v60 = vld [vmem:[#allocation20_spill] sm:$0xff]  ;;  %v2815_v63 = vld [vmem:[#allocation22_spill] sm:$0xff] }
 0x383   :  { %1185 = vmatpush.msrb.mxu0 %v2203_v34  ;;  %1205 = vmatpush.msrb.mxu1 %v2206_v36  ;;  %v2816_v34 = vld [vmem:[#allocation23_spill] sm:$0xff]  ;;  %v2817_v36 = vld [vmem:[#allocation32_spill] sm:$0xff] }
 0x384   :  { %1225 = vmatpush.msrb.mxu2 %v2209_v37  ;;  %1245 = vmatpush.msrb.mxu3 %v2212_v40  ;;  %v2818_v37 = vld [vmem:[#allocation24_spill] sm:$0xff]  ;;  %v2819_v40 = vld [vmem:[#allocation26_spill] sm:$0xff] }
 0x385   :  { %1186 = vmatpush.msrb.mxu0 %v2215_v56  ;;  %1206 = vmatpush.msrb.mxu1 %v2218_v45  ;;  %v2820_v56 = vld [vmem:[#allocation27_spill] sm:$0xff]  ;;  %v2821_v45 = vld [vmem:[#allocation33_spill] sm:$0xff] }
 0x386   :  { %1226 = vmatpush.msrb.mxu2 %v2221_v53  ;;  %1246 = vmatpush.msrb.mxu3 %v2224_v46  ;;  %v1371_v53 = vld [vmem:[%s2555_s0 + $0xa0] sm:$0xff]  ;;  %v1372_v46 = vld [vmem:[%s2555_s0 + $0xa8] sm:$0xff] }
 0x387   :  { %1187 = vmatpush.msrb.mxu0 %v2227_v62  ;;  %1207 = vmatpush.msrb.mxu1 %v2230_v44 }
 0x388   :  { %1227 = vmatpush.msrb.mxu2 %v2233_v57  ;;  %1247 = vmatpush.msrb.mxu3 %v2236_v0 }
 0x389   :  { %1188 = vmatpush.msrb.mxu0 %v2239_v38  ;;  %1208 = vmatpush.msrb.mxu1 %v2242_v55 }
 0x38a   :  { %1228 = vmatpush.msrb.mxu2 %v2245_v41  ;;  %1248 = vmatpush.msrb.mxu3 %v2248_v58  ;;  %v1374_v41 = vld [vmem:[%s2555_s0 + $0xb8] sm:$0xff] }
 0x38b   :  { %1189 = vmatpush.msrb.mxu0 %v2251_v52  ;;  %1209 = vmatpush.msrb.mxu1 %v2254_v48 }
 0x38c   :  { %1229 = vmatpush.msrb.mxu2 %v2796_v50  ;;  %1249 = vmatpush.msrb.mxu3 %v2797_v21 }
 0x38d   :  { %1190 = vmatpush.msrb.mxu0 %v2798_v22  ;;  %1210 = vmatpush.msrb.mxu1 %v2799_v23 }
 0x38e   :  { %1230 = vmatpush.msrb.mxu2 %v2800_v24  ;;  %1250 = vmatpush.msrb.mxu3 %v2801_v25 }
 0x38f   :  { %1191 = vmatpush.msrb.mxu0 %v2802_v26  ;;  %1211 = vmatpush.msrb.mxu1 %v2803_v27 }
 0x390   :  { %1231 = vmatpush.msrb.mxu2 %v2804_v28  ;;  %1251 = vmatpush.msrb.mxu3 %v2805_v29 }
 0x391   :  { %1192 = vmatpush.msrb.mxu0 %v2806_v30  ;;  %1212 = vmatpush.msrb.mxu1 %v2807_v31 }
 0x392   :  { %1232 = vmatpush.msrb.mxu2 %v2808_v32  ;;  %1252 = vmatpush.msrb.mxu3 %v2809_v33 }
 0x393   :  { %1193 = vmatpush.msrb.mxu0 %v2810_v35  ;;  %1213 = vmatpush.msrb.mxu1 %v2811_v39 }
 0x394   :  { %1233 = vmatpush.msrb.mxu2 %v2812_v43  ;;  %1253 = vmatpush.msrb.mxu3 %v2813_v47 }
 0x395   :  { %1194 = vmatpush.msrb.mxu0 %v2814_v60  ;;  %1214 = vmatpush.msrb.mxu1 %v2815_v63 }
 0x396   :  { %1234 = vmatpush.msrb.mxu2 %v2816_v34  ;;  %1254 = vmatpush.msrb.mxu3 %v2817_v36  ;;  %v1380_v34 = vld [vmem:[%s2555_s0 + $0xc8] sm:$0xff] }
 0x397   :  { %1195 = vmatpush.msrb.mxu0 %v2818_v37  ;;  %1215 = vmatpush.msrb.mxu1 %v2819_v40 }
 0x398   :  { %1235 = vmatpush.msrb.mxu2 %v2820_v56  ;;  %1255 = vmatpush.msrb.mxu3 %v2821_v45 }
 0x3f4   :  { %v889_v62 = vpop.f32.mrf.mxu0  ;;  %v909_v44 = vpop.f32.mrf.mxu1 }
 0x3f5   :  { %v952_v57 = vadd.f32 %v1371_v53, %v889_v62  ;;  %v953_v0 = vadd.f32 %v1372_v46, %v909_v44  ;;  %v1382_v46 = vld [vmem:[%s2555_s0 + $0xd8] sm:$0xff] }
 0x3f7   :  { %v1375_v38 = vmul.f32 -1.442695, %v952_v57  ;;  %v1376_v55 = vmul.f32 -1.442695, %v953_v0 }
 0x3f9   :  { %1479 = vpow2.f32 %v1375_v38 }
 0x3fa   :  { %1481 = vpow2.f32 %v1376_v55 }
 0x3fb   :  { %v949_v58 = vpop.f32.mrf.mxu3  ;;  %v929_v54 = vpop.f32.mrf.mxu2 }
 0x3fc   :  { %v955_v52 = vadd.f32 %v1374_v41, %v949_v58  ;;  %v954_v20 = vadd.f32 %v1373_v59, %v929_v54  ;;  %v1381_v58 = vld [vmem:[%s2555_s0 + $0xd0] sm:$0xff] }
 0x3fe   :  { %v1377_v48 = vmul.f32 -1.442695, %v955_v52 }
 0x3ff   :  { %v1480_v5 = vpop.eup %1479 }
 0x400   :  { %v1482_v12 = vpop.eup %1481  ;;  %v959_v51 = vadd.f32 1.0, %v1480_v5  ;;  %1483 = vpow2.f32 %v1377_v48 }
 0x401   :  { %v978_v61 = vadd.f32 1.0, %v1482_v12 }
 0x402   :  { %1485 = vrcp.f32 %v959_v51  ;;  %v971_v7 = vand.u32 2147483648, %v959_v51  ;;  %v969_v6 = vand.u32 2147483647, %v959_v51  ;;  %vm965_vm14 = vweird.f32 %v959_v51 }
 0x403   :  { %1487 = vrcp.f32 %v978_v61  ;;  %v990_v18 = vand.u32 2147483648, %v978_v61  ;;  %v988_v13 = vand.u32 2147483647, %v978_v61  ;;  %vm984_vm15 = vweird.f32 %v978_v61 }
 0x404   :  { %v972_v17 = vor.u32 1.1754944e-38, %v971_v7  ;;  %vm970_vm2 = vcmp.eq.f32.partialorder %v969_v6, 8.507059e+37 }
 0x405   :  { %v991_v21 = vor.u32 1.1754944e-38, %v990_v18  ;;  %vm989_vm3 = vcmp.eq.f32.partialorder %v988_v13, 8.507059e+37 }
 0x406   :  { %v1484_v2 = vpop.eup %1483 }
 0x407   :  { %v998_v19 = vadd.f32 1.0, %v1484_v2 }
 0x408   :  { %v1486_v8 = vpop.eup %1485 }
 0x409   :  { %v1488_v4 = vpop.eup %1487  ;;  %v961_v1 = vmul.f32 %v1486_v8, %v959_v51  ;;  %1489 = vrcp.f32 %v998_v19  ;;  %vm966_vm12 = vweird.f32 %v1486_v8  ;;  %v1010_v33 = vand.u32 2147483648, %v998_v19 }
 0x40a   :  { %v980_v15 = vmul.f32 %v1488_v4, %v978_v61  ;;  %1491 = vtanh.f32 %v954_v20  ;;  %vm985_vm13 = vweird.f32 %v1488_v4  ;;  %vm967_vm0 = vmor %vm965_vm14, %vm966_vm12  ;;  %vm1004_vm5 = vweird.f32 %v998_v19 }
 0x40b   :  { %v962_v3 = vsub.f32 1.0, %v961_v1  ;;  %vm986_vm1 = vmor %vm984_vm15, %vm985_vm13  ;;  %v1008_v35 = vand.u32 2147483647, %v998_v19  ;;  %v1011_v43 = vor.u32 1.1754944e-38, %v1010_v33 }
 0x40c   :  { %v981_v10 = vsub.f32 1.0, %v980_v15 }
 0x40d   :  { %v963_v11 = vmul.f32 %v1486_v8, %v962_v3  ;;  %vm1009_vm7 = vcmp.eq.f32.partialorder %v1008_v35, 8.507059e+37  ;;  %v1388_v35 = vld [vmem:[%s2555_s0 + $0xe8] sm:$0xff] }
 0x40e   :  { %v982_v49 = vmul.f32 %v1488_v4, %v981_v10 }
 0x40f   :  { %v1490_v42 = vpop.eup %1489  ;;  %v964_v16 = vadd.f32 %v1486_v8, %v963_v11 }
 0x410   :  { %v983_v9 = vadd.f32 %v1488_v4, %v982_v49  ;;  %v1000_v50 = vmul.f32 %v1490_v42, %v998_v19  ;;  %v1492_v23 = vpop.eup %1491  ;;  %vm1005_vm4 = vweird.f32 %v1490_v42 }
 0x411   :  { %v968_v22 = vsel %vm967_vm0, %v1486_v8, %v964_v16  ;;  %vm1006_vm6 = vmor %vm1004_vm5, %vm1005_vm4 }
 0x412   :  { %v973_v24 = vsel %vm970_vm2, %v972_v17, %v968_v22  ;;  %v987_v25 = vsel %vm986_vm1, %v1488_v4, %v983_v9  ;;  %v1001_v26 = vsub.f32 1.0, %v1000_v50 }
 0x413   :  { %v992_v27 = vsel %vm989_vm3, %v991_v21, %v987_v25  ;;  %v1015_v28 = vmul.f32 %v1492_v23, %v973_v24 }
 0x414   :  { %v1014_v29 = vmul.f32 %v992_v27, %v2431_v14  ;;  %v1002_v30 = vmul.f32 %v1490_v42, %v1001_v26  ;;  %v1379_v14 = vld [vmem:[%s2555_s0 + $0xc0] sm:$0xff] }
 0x416   :  { %v2514_v31 = vadd.f32 %v1015_v28, %v1014_v29  ;;  %v1003_v32 = vadd.f32 %v1490_v42, %v1002_v30 }
 0x418   :  { %1493 = vtanh.f32 %v2514_v31  ;;  %v1007_v39 = vsel %vm1006_vm6, %v1490_v42, %v1003_v32 }
 0x419   :  { %v1012_v60 = vsel %vm1009_vm7, %v1011_v43, %v1007_v39 }
 0x41e   :  { %v1494_v47 = vpop.eup %1493 }
 0x41f   :  { %v1018_v63 = vmul.f32 %v1494_v47, %v1012_v60 }
 0x421   :  { %1378 = vst [vmem:[%s2557_s2 + $0x28] sm:$0xff] %v1018_v63  ;;  %1042 = vmatmul.f32.vlgmr.msra.gmra.mxu0 %v1018_v63  ;;  %1062 = vmatmul.f32.vlgmr.msra.gmra.mxu1 %v1018_v63 }
 0x422   :  { %1082 = vmatmul.f32.vlgmr.msra.gmra.mxu2 %v1018_v63  ;;  %1102 = vmatmul.f32.vlgmr.msra.gmra.mxu3 %v1018_v63 }
 0x49e   :  { %v1043_v36 = vpop.f32.mrf.mxu0  ;;  %v1063_v37 = vpop.f32.mrf.mxu1 }
 0x49f   :  { %v1106_v40 = vadd.f32 %v1379_v14, %v1043_v36  ;;  %v1107_v56 = vadd.f32 %v1380_v34, %v1063_v37  ;;  %v1390_v34 = vld [vmem:[%s2555_s0 + $0xf8] sm:$0xff] }
 0x4a1   :  { %v1383_v45 = vmul.f32 -1.442695, %v1106_v40  ;;  %v1384_v53 = vmul.f32 -1.442695, %v1107_v56 }
 0x4a3   :  { %1495 = vpow2.f32 %v1383_v45 }
 0x4a4   :  { %1497 = vpow2.f32 %v1384_v53 }
 0x4a5   :  { %v1103_v62 = vpop.f32.mrf.mxu3  ;;  %v1083_v52 = vpop.f32.mrf.mxu2 }
 0x4a6   :  { %v1109_v44 = vadd.f32 %v1382_v46, %v1103_v62  ;;  %v1108_v51 = vadd.f32 %v1381_v58, %v1083_v52  ;;  %v1389_v62 = vld [vmem:[%s2555_s0 + $0xf0] sm:$0xff] }
 0x4a8   :  { %v1385_v57 = vmul.f32 -1.442695, %v1109_v44 }
 0x4a9   :  { %v1496_v0 = vpop.eup %1495 }
 0x4aa   :  { %v1498_v38 = vpop.eup %1497  ;;  %v1113_v55 = vadd.f32 1.0, %v1496_v0  ;;  %1499 = vpow2.f32 %v1385_v57 }
 0x4ab   :  { %v1132_v41 = vadd.f32 1.0, %v1498_v38 }
 0x4ac   :  { %1501 = vrcp.f32 %v1113_v55  ;;  %v1125_v8 = vand.u32 2147483648, %v1113_v55  ;;  %v1123_v1 = vand.u32 2147483647, %v1113_v55  ;;  %vm1119_vm10 = vweird.f32 %v1113_v55 }
 0x4ad   :  { %1503 = vrcp.f32 %v1132_v41  ;;  %v1144_v20 = vand.u32 2147483648, %v1132_v41  ;;  %v1142_v3 = vand.u32 2147483647, %v1132_v41  ;;  %vm1138_vm11 = vweird.f32 %v1132_v41 }
 0x4ae   :  { %v1126_v18 = vor.u32 1.1754944e-38, %v1125_v8  ;;  %vm1124_vm14 = vcmp.eq.f32.partialorder %v1123_v1, 8.507059e+37 }
 0x4af   :  { %v1145_v49 = vor.u32 1.1754944e-38, %v1144_v20  ;;  %vm1143_vm15 = vcmp.eq.f32.partialorder %v1142_v3, 8.507059e+37 }
 0x4b0   :  { %v1500_v48 = vpop.eup %1499 }
 0x4b1   :  { %v1152_v5 = vadd.f32 1.0, %v1500_v48 }
 0x4b2   :  { %v1502_v12 = vpop.eup %1501 }
 0x4b3   :  { %v1504_v61 = vpop.eup %1503  ;;  %v1115_v59 = vmul.f32 %v1502_v12, %v1113_v55  ;;  %1505 = vrcp.f32 %v1152_v5  ;;  %vm1120_vm8 = vweird.f32 %v1502_v12  ;;  %v1164_v26 = vand.u32 2147483648, %v1152_v5 }
 0x4b4   :  { %v1134_v54 = vmul.f32 %v1504_v61, %v1132_v41  ;;  %1507 = vtanh.f32 %v1108_v51  ;;  %vm1139_vm9 = vweird.f32 %v1504_v61  ;;  %vm1121_vm12 = vmor %vm1119_vm10, %vm1120_vm8  ;;  %vm1158_vm1 = vweird.f32 %v1152_v5 }
 0x4b5   :  { %v1116_v2 = vsub.f32 1.0, %v1115_v59  ;;  %vm1140_vm13 = vmor %vm1138_vm11, %vm1139_vm9  ;;  %v1162_v27 = vand.u32 2147483647, %v1152_v5  ;;  %v1165_v29 = vor.u32 1.1754944e-38, %v1164_v26 }
 0x4b6   :  { %v1135_v19 = vsub.f32 1.0, %v1134_v54 }
 0x4b7   :  { %v1117_v4 = vmul.f32 %v1502_v12, %v1116_v2  ;;  %vm1163_vm3 = vcmp.eq.f32.partialorder %v1162_v27, 8.507059e+37 }
 0x4b8   :  { %v1136_v15 = vmul.f32 %v1504_v61, %v1135_v19 }
 0x4b9   :  { %v1506_v10 = vpop.eup %1505  ;;  %v1118_v7 = vadd.f32 %v1502_v12, %v1117_v4 }
 0x4ba   :  { %v1137_v11 = vadd.f32 %v1504_v61, %v1136_v15  ;;  %v1154_v6 = vmul.f32 %v1506_v10, %v1152_v5  ;;  %v1508_v42 = vpop.eup %1507  ;;  %vm1159_vm0 = vweird.f32 %v1506_v10 }
 0x4bb   :  { %v1122_v13 = vsel %vm1121_vm12, %v1502_v12, %v1118_v7  ;;  %vm1160_vm2 = vmor %vm1158_vm1, %vm1159_vm0 }
 0x4bc   :  { %v1127_v16 = vsel %vm1124_vm14, %v1126_v18, %v1122_v13  ;;  %v1141_v17 = vsel %vm1140_vm13, %v1504_v61, %v1137_v11  ;;  %v1155_v9 = vsub.f32 1.0, %v1154_v6 }
 0x4bd   :  { %v1146_v50 = vsel %vm1143_vm15, %v1145_v49, %v1141_v17  ;;  %v1169_v21 = vmul.f32 %v1508_v42, %v1127_v16 }
 0x4be   :  { %v1168_v22 = vmul.f32 %v1146_v50, %v2514_v31  ;;  %v1156_v23 = vmul.f32 %v1506_v10, %v1155_v9  ;;  %v1387_v31 = vld [vmem:[%s2555_s0 + $0xe0] sm:$0xff] }
 0x4c0   :  { %v2533_v24 = vadd.f32 %v1169_v21, %v1168_v22  ;;  %v1157_v25 = vadd.f32 %v1506_v10, %v1156_v23 }
 0x4c2   :  { %1509 = vtanh.f32 %v2533_v24  ;;  %v1161_v28 = vsel %vm1160_vm2, %v1506_v10, %v1157_v25 }
 0x4c3   :  { %v1166_v32 = vsel %vm1163_vm3, %v1165_v29, %v1161_v28 }
 0x4c8   :  { %v1510_v30 = vpop.eup %1509 }
 0x4c9   :  { %v1172_v33 = vmul.f32 %v1510_v30, %v1166_v32 }
 0x4cb   :  { %1386 = vst [vmem:[%s2557_s2 + $0x30] sm:$0xff] %v1172_v33  ;;  %1196 = vmatmul.f32.vlgmr.msrb.gmra.mxu0 %v1172_v33  ;;  %1216 = vmatmul.f32.vlgmr.msrb.gmra.mxu1 %v1172_v33 }
 0x4cc   :  { %1236 = vmatmul.f32.vlgmr.msrb.gmra.mxu2 %v1172_v33  ;;  %1256 = vmatmul.f32.vlgmr.msrb.gmra.mxu3 %v1172_v33 }
 0x548   :  { %v1197_v39 = vpop.f32.mrf.mxu0  ;;  %v1217_v43 = vpop.f32.mrf.mxu1 }
 0x549   :  { %v1260_v47 = vadd.f32 %v1387_v31, %v1197_v39  ;;  %v1261_v60 = vadd.f32 %v1388_v35, %v1217_v43 }
 0x54b   :  { %v1391_v63 = vmul.f32 -1.442695, %v1260_v47  ;;  %v1392_v14 = vmul.f32 -1.442695, %v1261_v60 }
 0x54d   :  { %1511 = vpow2.f32 %v1391_v63 }
 0x54e   :  { %1513 = vpow2.f32 %v1392_v14 }
 0x54f   :  { %v1257_v36 = vpop.f32.mrf.mxu3  ;;  %v1237_v44 = vpop.f32.mrf.mxu2 }
 0x550   :  { %v1263_v37 = vadd.f32 %v1390_v34, %v1257_v36  ;;  %v1262_v55 = vadd.f32 %v1389_v62, %v1237_v44 }
 0x552   :  { %v1393_v40 = vmul.f32 -1.442695, %v1263_v37 }
 0x553   :  { %v1512_v56 = vpop.eup %1511 }
 0x554   :  { %v1514_v45 = vpop.eup %1513  ;;  %v1267_v53 = vadd.f32 1.0, %v1512_v56  ;;  %1515 = vpow2.f32 %v1393_v40 }
 0x555   :  { %v1286_v46 = vadd.f32 1.0, %v1514_v45 }
 0x556   :  { %1517 = vrcp.f32 %v1267_v53  ;;  %v1279_v12 = vand.u32 2147483648, %v1267_v53  ;;  %v1277_v59 = vand.u32 2147483647, %v1267_v53  ;;  %vm1273_vm6 = vweird.f32 %v1267_v53 }
 0x557   :  { %1519 = vrcp.f32 %v1286_v46  ;;  %v1298_v51 = vand.u32 2147483648, %v1286_v46  ;;  %v1296_v2 = vand.u32 2147483647, %v1286_v46  ;;  %vm1292_vm7 = vweird.f32 %v1286_v46 }
 0x558   :  { %v1280_v20 = vor.u32 1.1754944e-38, %v1279_v12  ;;  %vm1278_vm10 = vcmp.eq.f32.partialorder %v1277_v59, 8.507059e+37 }
 0x559   :  { %v1299_v15 = vor.u32 1.1754944e-38, %v1298_v51  ;;  %vm1297_vm11 = vcmp.eq.f32.partialorder %v1296_v2, 8.507059e+37 }
 0x55a   :  { %v1516_v57 = vpop.eup %1515 }
 0x55b   :  { %v1306_v0 = vadd.f32 1.0, %v1516_v57 }
 0x55c   :  { %v1518_v38 = vpop.eup %1517 }
 0x55d   :  { %v1520_v41 = vpop.eup %1519  ;;  %v1269_v58 = vmul.f32 %v1518_v38, %v1267_v53  ;;  %1521 = vrcp.f32 %v1306_v0  ;;  %vm1274_vm4 = vweird.f32 %v1518_v38  ;;  %v1318_v9 = vand.u32 2147483648, %v1306_v0 }
 0x55e   :  { %v1288_v52 = vmul.f32 %v1520_v41, %v1286_v46  ;;  %1523 = vtanh.f32 %v1262_v55  ;;  %vm1293_vm5 = vweird.f32 %v1520_v41  ;;  %vm1275_vm8 = vmor %vm1273_vm6, %vm1274_vm4  ;;  %vm1312_vm13 = vweird.f32 %v1306_v0 }
 0x55f   :  { %v1270_v48 = vsub.f32 1.0, %v1269_v58  ;;  %vm1294_vm9 = vmor %vm1292_vm7, %vm1293_vm5  ;;  %v1316_v50 = vand.u32 2147483647, %v1306_v0  ;;  %v1319_v22 = vor.u32 1.1754944e-38, %v1318_v9 }
 0x560   :  { %v1289_v5 = vsub.f32 1.0, %v1288_v52 }
 0x561   :  { %v1271_v61 = vmul.f32 %v1518_v38, %v1270_v48  ;;  %vm1317_vm15 = vcmp.eq.f32.partialorder %v1316_v50, 8.507059e+37 }
 0x562   :  { %v1290_v54 = vmul.f32 %v1520_v41, %v1289_v5 }
 0x563   :  { %v1522_v19 = vpop.eup %1521  ;;  %v1272_v8 = vadd.f32 %v1518_v38, %v1271_v61 }
 0x564   :  { %v1291_v4 = vadd.f32 %v1520_v41, %v1290_v54  ;;  %v1308_v1 = vmul.f32 %v1522_v19, %v1306_v0  ;;  %v1524_v10 = vpop.eup %1523  ;;  %vm1313_vm12 = vweird.f32 %v1522_v19 }
 0x565   :  { %v1276_v3 = vsel %vm1275_vm8, %v1518_v38, %v1272_v8  ;;  %vm1314_vm14 = vmor %vm1312_vm13, %vm1313_vm12 }
 0x566   :  { %v1281_v7 = vsel %vm1278_vm10, %v1280_v20, %v1276_v3  ;;  %v1295_v18 = vsel %vm1294_vm9, %v1520_v41, %v1291_v4  ;;  %v1309_v11 = vsub.f32 1.0, %v1308_v1 }
 0x567   :  { %v1300_v6 = vsel %vm1297_vm11, %v1299_v15, %v1295_v18  ;;  %v1323_v49 = vmul.f32 %v1524_v10, %v1281_v7 }
 0x568   :  { %v1322_v13 = vmul.f32 %v1300_v6, %v2533_v24  ;;  %v1310_v42 = vmul.f32 %v1522_v19, %v1309_v11 }
 0x56a   :  { %v1324_v16 = vadd.f32 %v1323_v49, %v1322_v13  ;;  %v1311_v17 = vadd.f32 %v1522_v19, %v1310_v42 }
 0x56c   :  { %1525 = vtanh.f32 %v1324_v16  ;;  %v1315_v21 = vsel %vm1314_vm14, %v1522_v19, %v1311_v17 }
 0x56d   :  { %v1320_v25 = vsel %vm1317_vm15, %v1319_v22, %v1315_v21 }
 0x572   :  { %v1526_v23 = vpop.eup %1525 }
 0x573   :  { %v1326_v26 = vmul.f32 %v1526_v23, %v1320_v25 }
 0x575   :  { %1394 = vst [vmem:[%s2557_s2 + $0x38] sm:$0xff] %v1326_v26 }
 0x576   :  { %1335 = vsyncpa [#allocation5], 1 }

// kernel: lstm_forward.7
= control target key start
LH: loop header
LB: loop body
LE: loop exit
PB: predicated region body
PF: predicated region fallthrough
CT: control target
= control target key end

     0   :  { %9 = vsyncpa [#allocation5], 0  ;;  %s2629_s0 = inlined_call_operand.vmem [shape: f32[8,8,512], index: 0, kind: input, shape index: {}]   ;;  %s2630_s1 = inlined_call_operand.hbm [shape: f32[128,512], index: 1, kind: input, shape index: {}]   ;;  %s2631_s2 = inlined_call_operand.hbm [shape: f32[128,128], index: 2, kind: input, shape index: {}]   ;;  %s2632_s3 = inlined_call_operand.vmem [shape: f32[1,128], index: 3, kind: input, shape index: {}]   ;;  %s2633_s4 = inlined_call_operand.vmem [shape: f32[8,128], index: 4, kind: output, shape index: {}]  }
   0x1   :  { %s17_s17 = sshll.u32 %s2630_s1, 4  ;;  %s18_s17 = int_to_ptr.hbm [resolvable:$true] %s17_s17 }
   0x2   :  { %10 = vsyncpa [#allocation7], 0  ;;  %s1693_s18 = smov [#allocation4]   ;;  %s30_s22 = sshll.u32 %s2631_s2, 4  ;;  %s31_s22 = int_to_ptr.hbm [resolvable:$true] %s30_s22 }
   0x3   :  { %s19_s19 = sshll.u32 %s1693_s18, 4  ;;  %s1694_s23 = smov 512   ;;  %s20_s19 = int_to_ptr.vmem [resolvable:$true] %s19_s19 }
   0x4   :  { %s1695_s24 = smov 32   ;;  %s1696_s25 = smov [#allocation6]  }
   0x5   :  { %25 = dma.hbm_to_vmem [thread:$0]  %s18_s17, 8192, %s20_s19, [#allocation5], %s1694_s23, %s1694_s23, %s1695_s24  }
   0x6   :  { %s32_s26 = sshll.u32 %s1696_s25, 4  ;;  %s1697_s27 = smov 128   ;;  %s33_s26 = int_to_ptr.vmem [resolvable:$true] %s32_s26 }
   0x7   :  { %s1698_s28 = smov 8  }
   0x8   :  { %38 = dma.hbm_to_vmem [thread:$0]  %s31_s22, 2048, %s33_s26, [#allocation7], %s1697_s27, %s1697_s27, %s1698_s28  }
   0x9   :  { %1689 = dma.done.wait [#allocation5], 8192  }
   0xa   :  { %1690 = vsyncadd [#allocation5], 4294959104 }
   0xb   :  { %1691 = dma.done.wait [#allocation7], 2048  }
   0xc   :  { %1692 = vsyncadd [#allocation7], 4294965248  ;;  %v1731_v0 = vld [vmem:[#allocation4 + $0x1e0] sm:$0xff]  ;;  %v1733_v1 = vld [vmem:[#allocation4 + $0x1e8] sm:$0xff]  ;;  %v1699_v60 = vmov 0.0  }
   0xd   :  { %2740 = vst [vmem:[#allocation10_spill] sm:$0xff] %v1731_v0  ;;  %v1735_v2 = vld [vmem:[#allocation4 + $0x1f8] sm:$0xff]  ;;  %126 = vmatpush.msra.mxu0 %v1731_v0  ;;  %146 = vmatpush.msra.mxu1 %v1733_v1  ;;  %v1739_v3 = vld [vmem:[#allocation4 + $0x1c0] sm:$0xff]  ;;  %v1741_v4 = vld [vmem:[#allocation4 + $0x1c8] sm:$0xff] }
   0xe   :  { %v1743_v5 = vld [vmem:[#allocation4 + $0x1d8] sm:$0xff]  ;;  %186 = vmatpush.msra.mxu3 %v1735_v2  ;;  %v1746_v6 = vld [vmem:[#allocation4 + $0x1a0] sm:$0xff]  ;;  %v1748_v7 = vld [vmem:[#allocation4 + $0x1a8] sm:$0xff] }
   0xf   :  { %127 = vmatpush.msra.mxu0 %v1739_v3  ;;  %147 = vmatpush.msra.mxu1 %v1741_v4  ;;  %v1752_v8 = vld [vmem:[#allocation4 + $0x1b8] sm:$0xff]  ;;  %v1755_v9 = vld [vmem:[#allocation4 + $0x180] sm:$0xff]  ;;  %v1757_v10 = vld [vmem:[#allocation4 + $0x188] sm:$0xff] }
  0x10   :  { %187 = vmatpush.msra.mxu3 %v1743_v5  ;;  %v1761_v11 = vld [vmem:[#allocation4 + $0x198] sm:$0xff]  ;;  %v1764_v12 = vld [vmem:[#allocation4 + $0x160] sm:$0xff]  ;;  %v1766_v13 = vld [vmem:[#allocation4 + $0x168] sm:$0xff] }
  0x11   :  { %128 = vmatpush.msra.mxu0 %v1746_v6  ;;  %148 = vmatpush.msra.mxu1 %v1748_v7  ;;  %v1770_v14 = vld [vmem:[#allocation4 + $0x178] sm:$0xff]  ;;  %v1773_v15 = vld [vmem:[#allocation4 + $0x140] sm:$0xff]  ;;  %v1775_v16 = vld [vmem:[#allocation4 + $0x148] sm:$0xff] }
  0x12   :  { %188 = vmatpush.msra.mxu3 %v1752_v8  ;;  %v1777_v17 = vld [vmem:[#allocation4 + $0x1f0] sm:$0xff]  ;;  %v1781_v18 = vld [vmem:[#allocation4 + $0x158] sm:$0xff]  ;;  %v1786_v20 = vld [vmem:[#allocation4 + $0x120] sm:$0xff] }
  0x13   :  { %129 = vmatpush.msra.mxu0 %v1755_v9  ;;  %149 = vmatpush.msra.mxu1 %v1757_v10  ;;  %v1783_v19 = vld [vmem:[#allocation4 + $0x1d0] sm:$0xff]  ;;  %v1788_v21 = vld [vmem:[#allocation4 + $0x128] sm:$0xff]  ;;  %v1793_v22 = vld [vmem:[#allocation4 + $0x138] sm:$0xff] }
  0x14   :  { %189 = vmatpush.msra.mxu3 %v1761_v11  ;;  %166 = vmatpush.msra.mxu2 %v1777_v17  ;;  %v1795_v23 = vld [vmem:[#allocation4 + $0x1b0] sm:$0xff]  ;;  %v1798_v24 = vld [vmem:[#allocation4 + $0x100] sm:$0xff]  ;;  %v1800_v25 = vld [vmem:[#allocation4 + $0x108] sm:$0xff] }
  0x15   :  { %130 = vmatpush.msra.mxu0 %v1764_v12  ;;  %150 = vmatpush.msra.mxu1 %v1766_v13  ;;  %v1805_v26 = vld [vmem:[#allocation4 + $0x118] sm:$0xff]  ;;  %v1807_v27 = vld [vmem:[#allocation4 + $0x190] sm:$0xff]  ;;  %v1810_v28 = vld [vmem:[#allocation4 + $0xe0] sm:$0xff] }
  0x16   :  { %190 = vmatpush.msra.mxu3 %v1770_v14  ;;  %167 = vmatpush.msra.mxu2 %v1783_v19  ;;  %v1812_v29 = vld [vmem:[#allocation4 + $0xe8] sm:$0xff]  ;;  %v1817_v30 = vld [vmem:[#allocation4 + $0xf8] sm:$0xff]  ;;  %v1819_v31 = vld [vmem:[#allocation4 + $0x170] sm:$0xff] }
  0x17   :  { %131 = vmatpush.msra.mxu0 %v1773_v15  ;;  %151 = vmatpush.msra.mxu1 %v1775_v16  ;;  %v1822_v32 = vld [vmem:[#allocation4 + $0xc0] sm:$0xff]  ;;  %v1824_v33 = vld [vmem:[#allocation4 + $0xc8] sm:$0xff]  ;;  %v1829_v34 = vld [vmem:[#allocation4 + $0xd8] sm:$0xff] }
  0x18   :  { %191 = vmatpush.msra.mxu3 %v1781_v18  ;;  %168 = vmatpush.msra.mxu2 %v1795_v23  ;;  %2741 = vst [vmem:[#allocation11_spill] sm:$0xff] %v1829_v34  ;;  %v1831_v35 = vld [vmem:[#allocation4 + $0x150] sm:$0xff]  ;;  %v1834_v36 = vld [vmem:[#allocation4 + $0xa0] sm:$0xff]  ;;  %v1836_v37 = vld [vmem:[#allocation4 + $0xa8] sm:$0xff] }
  0x19   :  { %132 = vmatpush.msra.mxu0 %v1786_v20  ;;  %152 = vmatpush.msra.mxu1 %v1788_v21  ;;  %2742 = vst [vmem:[#allocation12_spill] sm:$0xff] %v1834_v36  ;;  %v1841_v38 = vld [vmem:[#allocation4 + $0xb8] sm:$0xff]  ;;  %v1843_v39 = vld [vmem:[#allocation4 + $0x130] sm:$0xff]  ;;  %v1846_v40 = vld [vmem:[#allocation4 + $0x80] sm:$0xff] }
  0x1a   :  { %192 = vmatpush.msra.mxu3 %v1793_v22  ;;  %169 = vmatpush.msra.mxu2 %v1807_v27  ;;  %2743 = vst [vmem:[#allocation13_spill] sm:$0xff] %v1836_v37  ;;  %v1848_v41 = vld [vmem:[#allocation4 + $0x88] sm:$0xff]  ;;  %v1853_v42 = vld [vmem:[#allocation4 + $0x98] sm:$0xff]  ;;  %v1855_v43 = vld [vmem:[#allocation4 + $0x110] sm:$0xff] }
  0x1b   :  { %133 = vmatpush.msra.mxu0 %v1798_v24  ;;  %153 = vmatpush.msra.mxu1 %v1800_v25  ;;  %2744 = vst [vmem:[#allocation14_spill] sm:$0xff] %v1841_v38  ;;  %v1858_v44 = vld [vmem:[#allocation4 + $0x60] sm:$0xff]  ;;  %v1860_v45 = vld [vmem:[#allocation4 + $0x68] sm:$0xff]  ;;  %v1865_v46 = vld [vmem:[#allocation4 + $0x78] sm:$0xff] }
  0x1c   :  { %193 = vmatpush.msra.mxu3 %v1805_v26  ;;  %170 = vmatpush.msra.mxu2 %v1819_v31  ;;  %2745 = vst [vmem:[#allocation15_spill] sm:$0xff] %v1846_v40  ;;  %v1867_v47 = vld [vmem:[#allocation4 + $0xf0] sm:$0xff]  ;;  %v1870_v48 = vld [vmem:[#allocation4 + $0x40] sm:$0xff]  ;;  %v1872_v49 = vld [vmem:[#allocation4 + $0x48] sm:$0xff] }
  0x1d   :  { %134 = vmatpush.msra.mxu0 %v1810_v28  ;;  %154 = vmatpush.msra.mxu1 %v1812_v29  ;;  %2746 = vst [vmem:[#allocation16_spill] sm:$0xff] %v1848_v41  ;;  %v1877_v50 = vld [vmem:[#allocation4 + $0x58] sm:$0xff]  ;;  %v1879_v51 = vld [vmem:[#allocation4 + $0xd0] sm:$0xff]  ;;  %v1882_v52 = vld [vmem:[#allocation4 + $0x20] sm:$0xff] }
  0x1e   :  { %194 = vmatpush.msra.mxu3 %v1817_v30  ;;  %171 = vmatpush.msra.mxu2 %v1831_v35  ;;  %2747 = vst [vmem:[#allocation17_spill] sm:$0xff] %v1853_v42  ;;  %v1884_v53 = vld [vmem:[#allocation4 + $0x28] sm:$0xff]  ;;  %v1889_v54 = vld [vmem:[#allocation4 + $0x38] sm:$0xff]  ;;  %v1891_v55 = vld [vmem:[#allocation4 + $0xb0] sm:$0xff] }
  0x1f   :  { %135 = vmatpush.msra.mxu0 %v1822_v32  ;;  %155 = vmatpush.msra.mxu1 %v1824_v33  ;;  %2748 = vst [vmem:[#allocation18_spill] sm:$0xff] %v1858_v44  ;;  %v1894_v56 = vld [vmem:[#allocation4] sm:$0xff]  ;;  %v1896_v57 = vld [vmem:[#allocation4 + $0x8] sm:$0xff]  ;;  %v1901_v58 = vld [vmem:[#allocation4 + $0x18] sm:$0xff] }
  0x20   :  { %195 = vmatpush.msra.mxu3 %v1829_v34  ;;  %2749 = vst [vmem:[#allocation19_spill] sm:$0xff] %v1860_v45  ;;  %172 = vmatpush.msra.mxu2 %v1843_v39  ;;  %v1907_v59 = vld [vmem:[#allocation4 + $0x90] sm:$0xff] }
  0x21   :  { %136 = vmatpush.msra.mxu0 %v1834_v36  ;;  %156 = vmatpush.msra.mxu1 %v1836_v37  ;;  %2750 = vst [vmem:[#allocation20_spill] sm:$0xff] %v1865_v46  ;;  %v1910_v61 = vld [vmem:[#allocation4 + $0x70] sm:$0xff] }
  0x22   :  { %196 = vmatpush.msra.mxu3 %v1841_v38  ;;  %2751 = vst [vmem:[#allocation21_spill] sm:$0xff] %v1870_v48  ;;  %173 = vmatpush.msra.mxu2 %v1855_v43  ;;  %v1914_v62 = vld [vmem:[#allocation4 + $0x50] sm:$0xff] }
  0x23   :  { %137 = vmatpush.msra.mxu0 %v1846_v40  ;;  %157 = vmatpush.msra.mxu1 %v1848_v41  ;;  %2752 = vst [vmem:[#allocation22_spill] sm:$0xff] %v1872_v49  ;;  %v1920_v63 = vld [vmem:[#allocation4 + $0x30] sm:$0xff] }
  0x24   :  { %197 = vmatpush.msra.mxu3 %v1853_v42  ;;  %2753 = vst [vmem:[#allocation23_spill] sm:$0xff] %v1877_v50  ;;  %174 = vmatpush.msra.mxu2 %v1867_v47 }
  0x25   :  { %138 = vmatpush.msra.mxu0 %v1858_v44  ;;  %158 = vmatpush.msra.mxu1 %v1860_v45  ;;  %2754 = vst [vmem:[#allocation24_spill] sm:$0xff] %v1879_v51 }
  0x26   :  { %198 = vmatpush.msra.mxu3 %v1865_v46  ;;  %2755 = vst [vmem:[#allocation25_spill] sm:$0xff] %v1882_v52  ;;  %175 = vmatpush.msra.mxu2 %v1879_v51 }
  0x27   :  { %2756 = vst [vmem:[#allocation26_spill] sm:$0xff] %v1884_v53  ;;  %139 = vmatpush.msra.mxu0 %v1870_v48  ;;  %159 = vmatpush.msra.mxu1 %v1872_v49 }
  0x28   :  { %2757 = vst [vmem:[#allocation27_spill] sm:$0xff] %v1889_v54  ;;  %199 = vmatpush.msra.mxu3 %v1877_v50  ;;  %176 = vmatpush.msra.mxu2 %v1891_v55 }
  0x29   :  { %2758 = vst [vmem:[#allocation28_spill] sm:$0xff] %v1891_v55  ;;  %140 = vmatpush.msra.mxu0 %v1882_v52  ;;  %160 = vmatpush.msra.mxu1 %v1884_v53 }
  0x2a   :  { %2759 = vst [vmem:[#allocation29_spill] sm:$0xff] %v1894_v56  ;;  %200 = vmatpush.msra.mxu3 %v1889_v54  ;;  %177 = vmatpush.msra.mxu2 %v1907_v59 }
  0x2b   :  { %2760 = vst [vmem:[#allocation30_spill] sm:$0xff] %v1896_v57  ;;  %141 = vmatpush.msra.mxu0 %v1894_v56  ;;  %161 = vmatpush.msra.mxu1 %v1896_v57 }
  0x2c   :  { %2761 = vst [vmem:[#allocation31_spill] sm:$0xff] %v1901_v58  ;;  %201 = vmatpush.msra.mxu3 %v1901_v58  ;;  %142 = vmatmul.f32.vlgmr.msra.gmra.mxu0 %v1699_v60 }
  0x2d   :  { %2762 = vst [vmem:[#allocation32_spill] sm:$0xff] %v1907_v59  ;;  %162 = vmatmul.f32.vlgmr.msra.gmra.mxu1 %v1699_v60  ;;  %202 = vmatmul.f32.vlgmr.msra.gmra.mxu3 %v1699_v60 }
  0x2e   :  { %2763 = vst [vmem:[#allocation33_spill] sm:$0xff] %v1910_v61  ;;  %278 = vmatpush.msrb.mxu0 %v1731_v0  ;;  %298 = vmatpush.msrb.mxu1 %v1733_v1  ;;  %v1926_v0 = vld [vmem:[#allocation4 + $0x10] sm:$0xff] }
  0x2f   :  { %2764 = vst [vmem:[#allocation34_spill] sm:$0xff] %v1914_v62  ;;  %338 = vmatpush.msrb.mxu3 %v1735_v2  ;;  %178 = vmatpush.msra.mxu2 %v1910_v61 }
  0x30   :  { %279 = vmatpush.msrb.mxu0 %v1739_v3  ;;  %2765 = vst [vmem:[#allocation35_spill] sm:$0xff] %v1920_v63  ;;  %299 = vmatpush.msrb.mxu1 %v1741_v4 }
  0x31   :  { %339 = vmatpush.msrb.mxu3 %v1743_v5  ;;  %179 = vmatpush.msra.mxu2 %v1914_v62  ;;  %2766 = vst [vmem:[#allocation36_spill] sm:$0xff] %v1926_v0 }
  0x32   :  { %280 = vmatpush.msrb.mxu0 %v1746_v6  ;;  %300 = vmatpush.msrb.mxu1 %v1748_v7 }
  0x33   :  { %340 = vmatpush.msrb.mxu3 %v1752_v8  ;;  %180 = vmatpush.msra.mxu2 %v1920_v63 }
  0x34   :  { %281 = vmatpush.msrb.mxu0 %v1755_v9  ;;  %301 = vmatpush.msrb.mxu1 %v1757_v10 }
  0x35   :  { %341 = vmatpush.msrb.mxu3 %v1761_v11  ;;  %181 = vmatpush.msra.mxu2 %v1926_v0 }
  0x36   :  { %282 = vmatpush.msrb.mxu0 %v1764_v12  ;;  %182 = vmatmul.f32.vlgmr.msra.gmra.mxu2 %v1699_v60  ;;  %v2767_v60 = vld [vmem:[#allocation10_spill] sm:$0xff] }
  0x37   :  { %302 = vmatpush.msrb.mxu1 %v1766_v13  ;;  %318 = vmatpush.msrb.mxu2 %v1777_v17 }
  0x38   :  { %342 = vmatpush.msrb.mxu3 %v1770_v14  ;;  %283 = vmatpush.msrb.mxu0 %v1773_v15 }
  0x39   :  { %303 = vmatpush.msrb.mxu1 %v1775_v16  ;;  %319 = vmatpush.msrb.mxu2 %v1783_v19 }
  0x3a   :  { %343 = vmatpush.msrb.mxu3 %v1781_v18  ;;  %284 = vmatpush.msrb.mxu0 %v1786_v20 }
  0x3b   :  { %304 = vmatpush.msrb.mxu1 %v1788_v21  ;;  %320 = vmatpush.msrb.mxu2 %v1795_v23 }
  0x3c   :  { %344 = vmatpush.msrb.mxu3 %v1793_v22  ;;  %285 = vmatpush.msrb.mxu0 %v1798_v24 }
  0x3d   :  { %305 = vmatpush.msrb.mxu1 %v1800_v25  ;;  %321 = vmatpush.msrb.mxu2 %v1807_v27 }
  0x3e   :  { %345 = vmatpush.msrb.mxu3 %v1805_v26  ;;  %286 = vmatpush.msrb.mxu0 %v1810_v28 }
  0x3f   :  { %306 = vmatpush.msrb.mxu1 %v1812_v29  ;;  %322 = vmatpush.msrb.mxu2 %v1819_v31 }
  0x40   :  { %346 = vmatpush.msrb.mxu3 %v1817_v30  ;;  %287 = vmatpush.msrb.mxu0 %v1822_v32 }
  0x41   :  { %307 = vmatpush.msrb.mxu1 %v1824_v33  ;;  %323 = vmatpush.msrb.mxu2 %v1831_v35 }
  0x42   :  { %347 = vmatpush.msrb.mxu3 %v1829_v34  ;;  %288 = vmatpush.msrb.mxu0 %v1834_v36 }
  0x43   :  { %308 = vmatpush.msrb.mxu1 %v1836_v37  ;;  %324 = vmatpush.msrb.mxu2 %v1843_v39 }
  0x44   :  { %348 = vmatpush.msrb.mxu3 %v1841_v38  ;;  %289 = vmatpush.msrb.mxu0 %v1846_v40 }
  0x45   :  { %309 = vmatpush.msrb.mxu1 %v1848_v41  ;;  %325 = vmatpush.msrb.mxu2 %v1855_v43 }
  0x46   :  { %349 = vmatpush.msrb.mxu3 %v1853_v42  ;;  %290 = vmatpush.msrb.mxu0 %v1858_v44 }
  0x47   :  { %310 = vmatpush.msrb.mxu1 %v1860_v45  ;;  %326 = vmatpush.msrb.mxu2 %v1867_v47 }
  0x48   :  { %350 = vmatpush.msrb.mxu3 %v1865_v46  ;;  %291 = vmatpush.msrb.mxu0 %v1870_v48 }
  0x49   :  { %311 = vmatpush.msrb.mxu1 %v1872_v49  ;;  %327 = vmatpush.msrb.mxu2 %v1879_v51 }
  0x4a   :  { %351 = vmatpush.msrb.mxu3 %v1877_v50  ;;  %292 = vmatpush.msrb.mxu0 %v1882_v52 }
  0x4b   :  { %312 = vmatpush.msrb.mxu1 %v1884_v53  ;;  %328 = vmatpush.msrb.mxu2 %v1891_v55 }
  0x4c   :  { %352 = vmatpush.msrb.mxu3 %v1889_v54  ;;  %293 = vmatpush.msrb.mxu0 %v1894_v56 }
  0x4d   :  { %313 = vmatpush.msrb.mxu1 %v1896_v57  ;;  %329 = vmatpush.msrb.mxu2 %v1907_v59 }
  0x4e   :  { %353 = vmatpush.msrb.mxu3 %v1901_v58  ;;  %430 = vmatpush.msra.mxu0 %v2767_v60 }
  0x4f   :  { %450 = vmatpush.msra.mxu1 %v1733_v1  ;;  %330 = vmatpush.msrb.mxu2 %v1910_v61 }
  0x50   :  { %490 = vmatpush.msra.mxu3 %v1735_v2  ;;  %431 = vmatpush.msra.mxu0 %v1739_v3 }
  0x51   :  { %451 = vmatpush.msra.mxu1 %v1741_v4  ;;  %331 = vmatpush.msrb.mxu2 %v1914_v62 }
  0x52   :  { %491 = vmatpush.msra.mxu3 %v1743_v5  ;;  %432 = vmatpush.msra.mxu0 %v1746_v6 }
  0x53   :  { %452 = vmatpush.msra.mxu1 %v1748_v7  ;;  %332 = vmatpush.msrb.mxu2 %v1920_v63 }
  0x54   :  { %492 = vmatpush.msra.mxu3 %v1752_v8  ;;  %433 = vmatpush.msra.mxu0 %v1755_v9 }
  0x55   :  { %453 = vmatpush.msra.mxu1 %v1757_v10  ;;  %333 = vmatpush.msrb.mxu2 %v1926_v0 }
  0x56   :  { %493 = vmatpush.msra.mxu3 %v1761_v11  ;;  %434 = vmatpush.msra.mxu0 %v1764_v12 }
  0x57   :  { %470 = vmatpush.msra.mxu2 %v1777_v17  ;;  %454 = vmatpush.msra.mxu1 %v1766_v13 }
  0x58   :  { %494 = vmatpush.msra.mxu3 %v1770_v14  ;;  %435 = vmatpush.msra.mxu0 %v1773_v15 }
  0x59   :  { %471 = vmatpush.msra.mxu2 %v1783_v19  ;;  %455 = vmatpush.msra.mxu1 %v1775_v16 }
  0x5a   :  { %495 = vmatpush.msra.mxu3 %v1781_v18  ;;  %436 = vmatpush.msra.mxu0 %v1786_v20 }
  0x5b   :  { %472 = vmatpush.msra.mxu2 %v1795_v23  ;;  %456 = vmatpush.msra.mxu1 %v1788_v21 }
  0x5c   :  { %496 = vmatpush.msra.mxu3 %v1793_v22  ;;  %437 = vmatpush.msra.mxu0 %v1798_v24 }
  0x5d   :  { %473 = vmatpush.msra.mxu2 %v1807_v27  ;;  %457 = vmatpush.msra.mxu1 %v1800_v25 }
  0x5e   :  { %497 = vmatpush.msra.mxu3 %v1805_v26  ;;  %438 = vmatpush.msra.mxu0 %v1810_v28 }
  0x5f   :  { %474 = vmatpush.msra.mxu2 %v1819_v31  ;;  %458 = vmatpush.msra.mxu1 %v1812_v29 }
  0x60   :  { %498 = vmatpush.msra.mxu3 %v1817_v30  ;;  %439 = vmatpush.msra.mxu0 %v1822_v32 }
  0x61   :  { %475 = vmatpush.msra.mxu2 %v1831_v35  ;;  %459 = vmatpush.msra.mxu1 %v1824_v33 }
  0x62   :  { %499 = vmatpush.msra.mxu3 %v1829_v34  ;;  %440 = vmatpush.msra.mxu0 %v1834_v36 }
  0x63   :  { %476 = vmatpush.msra.mxu2 %v1843_v39  ;;  %460 = vmatpush.msra.mxu1 %v1836_v37 }
  0x64   :  { %500 = vmatpush.msra.mxu3 %v1841_v38  ;;  %441 = vmatpush.msra.mxu0 %v1846_v40 }
  0x65   :  { %477 = vmatpush.msra.mxu2 %v1855_v43  ;;  %461 = vmatpush.msra.mxu1 %v1848_v41 }
  0x66   :  { %501 = vmatpush.msra.mxu3 %v1853_v42  ;;  %442 = vmatpush.msra.mxu0 %v1858_v44 }
  0x67   :  { %478 = vmatpush.msra.mxu2 %v1867_v47  ;;  %462 = vmatpush.msra.mxu1 %v1860_v45 }
  0x68   :  { %502 = vmatpush.msra.mxu3 %v1865_v46  ;;  %443 = vmatpush.msra.mxu0 %v1870_v48 }
  0x69   :  { %479 = vmatpush.msra.mxu2 %v1879_v51  ;;  %463 = vmatpush.msra.mxu1 %v1872_v49 }
  0x6a   :  { %503 = vmatpush.msra.mxu3 %v1877_v50  ;;  %444 = vmatpush.msra.mxu0 %v1882_v52 }
  0x6b   :  { %480 = vmatpush.msra.mxu2 %v1891_v55  ;;  %464 = vmatpush.msra.mxu1 %v1884_v53 }
  0x6c   :  { %504 = vmatpush.msra.mxu3 %v1889_v54  ;;  %445 = vmatpush.msra.mxu0 %v1894_v56  ;;  %v122_v54 = vld [vmem:[%s2629_s0] sm:$0xff]  ;;  %v123_v56 = vld [vmem:[%s2629_s0 + $0x8] sm:$0xff] }
  0x6d   :  { %481 = vmatpush.msra.mxu2 %v1907_v59  ;;  %465 = vmatpush.msra.mxu1 %v1896_v57 }
  0x6e   :  { %505 = vmatpush.msra.mxu3 %v1901_v58 }
  0x6f   :  { %482 = vmatpush.msra.mxu2 %v1910_v61 }
  0x71   :  { %483 = vmatpush.msra.mxu2 %v1914_v62 }
  0x73   :  { %484 = vmatpush.msra.mxu2 %v1920_v63  ;;  %v125_v63 = vld [vmem:[%s2629_s0 + $0x18] sm:$0xff] }
  0x75   :  { %485 = vmatpush.msra.mxu2 %v1926_v0 }
  0xa9   :  { %v143_v53 = vpop.f32.mrf.mxu0 }
  0xaa   :  { %v206_v57 = vadd.f32 %v143_v53, %v122_v54  ;;  %v163_v52 = vpop.f32.mrf.mxu1 }
  0xab   :  { %v207_v58 = vadd.f32 %v163_v52, %v123_v56  ;;  %v124_v52 = vld [vmem:[%s2629_s0 + $0x10] sm:$0xff] }
  0xac   :  { %v1389_v50 = vmul.f32 -1.442695, %v206_v57 }
  0xad   :  { %v1390_v49 = vmul.f32 -1.442695, %v207_v58 }
  0xae   :  { %1449 = vpow2.f32 %v1389_v50 }
  0xaf   :  { %1451 = vpow2.f32 %v1390_v49 }
  0xb0   :  { %v203_v0 = vpop.f32.mrf.mxu3 }
  0xb1   :  { %v209_v62 = vadd.f32 %v203_v0, %v125_v63 }
  0xb3   :  { %v1391_v48 = vmul.f32 -1.442695, %v209_v62 }
  0xb4   :  { %v1450_v46 = vpop.eup %1449 }
  0xb5   :  { %v1452_v61 = vpop.eup %1451  ;;  %v213_v45 = vadd.f32 1.0, %v1450_v46  ;;  %1453 = vpow2.f32 %v1391_v48 }
  0xb6   :  { %v232_v44 = vadd.f32 1.0, %v1452_v61 }
  0xb7   :  { %1455 = vrcp.f32 %v213_v45  ;;  %v225_v48 = vand.u32 2147483648, %v213_v45  ;;  %v223_v42 = vand.u32 2147483647, %v213_v45  ;;  %vm219_vm2 = vweird.f32 %v213_v45 }
  0xb8   :  { %1457 = vrcp.f32 %v232_v44  ;;  %v244_v61 = vand.u32 2147483648, %v232_v44  ;;  %v242_v41 = vand.u32 2147483647, %v232_v44  ;;  %vm238_vm3 = vweird.f32 %v232_v44 }
  0xb9   :  { %v183_v50 = vpop.f32.mrf.mxu2  ;;  %vm224_vm5 = vcmp.eq.f32.partialorder %v223_v42, 8.507059e+37 }
  0xba   :  { %v208_v54 = vadd.f32 %v183_v50, %v124_v52  ;;  %vm243_vm7 = vcmp.eq.f32.partialorder %v242_v41, 8.507059e+37 }
  0xbb   :  { %v1454_v53 = vpop.eup %1453 }
  0xbc   :  { %v252_v56 = vadd.f32 1.0, %v1454_v53  ;;  %v226_v53 = vor.u32 1.1754944e-38, %v225_v48  ;;  %v2775_v48 = vld [vmem:[#allocation16_spill] sm:$0xff] }
  0xbd   :  { %v1456_v57 = vpop.eup %1455 }
  0xbe   :  { %v1458_v49 = vpop.eup %1457  ;;  %v215_v58 = vmul.f32 %v1456_v57, %v213_v45  ;;  %1459 = vrcp.f32 %v252_v56  ;;  %vm220_vm0 = vweird.f32 %v1456_v57  ;;  %vm258_vm9 = vweird.f32 %v252_v56 }
  0xbf   :  { %v234_v0 = vmul.f32 %v1458_v49, %v232_v44  ;;  %1461 = vtanh.f32 %v208_v54  ;;  %vm239_vm1 = vweird.f32 %v1458_v49  ;;  %vm221_vm4 = vmor %vm219_vm2, %vm220_vm0  ;;  %v245_v54 = vor.u32 1.1754944e-38, %v244_v61  ;;  %v2776_v61 = vld [vmem:[#allocation32_spill] sm:$0xff] }
  0xc0   :  { %v216_v62 = vsub.f32 1.0, %v215_v58  ;;  %vm240_vm6 = vmor %vm238_vm3, %vm239_vm1  ;;  %v264_v44 = vand.u32 2147483648, %v252_v56 }
  0xc1   :  { %v235_v46 = vsub.f32 1.0, %v234_v0 }
  0xc2   :  { %v217_v63 = vmul.f32 %v1456_v57, %v216_v62  ;;  %v265_v42 = vor.u32 1.1754944e-38, %v264_v44  ;;  %v2786_v44 = vld [vmem:[#allocation25_spill] sm:$0xff] }
  0xc3   :  { %v236_v59 = vmul.f32 %v1458_v49, %v235_v46 }
  0xc4   :  { %v1460_v40 = vpop.eup %1459  ;;  %v218_v38 = vadd.f32 %v1456_v57, %v217_v63 }
  0xc5   :  { %v1462_v52 = vpop.eup %1461  ;;  %v254_v50 = vmul.f32 %v1460_v40, %v252_v56  ;;  %v237_v55 = vadd.f32 %v1458_v49, %v236_v59  ;;  %vm259_vm8 = vweird.f32 %v1460_v40  ;;  %v262_v59 = vand.u32 2147483647, %v252_v56  ;;  %v2773_v56 = vld [vmem:[#allocation14_spill] sm:$0xff] }
  0xc6   :  { %v222_v58 = vsel %vm221_vm4, %v1456_v57, %v218_v38  ;;  %vm260_vm10 = vmor %vm258_vm9, %vm259_vm8 }
  0xc7   :  { %v255_v0 = vsub.f32 1.0, %v254_v50  ;;  %v227_v62 = vsel %vm224_vm5, %v226_v53, %v222_v58  ;;  %v241_v37 = vsel %vm240_vm6, %v1458_v49, %v237_v55  ;;  %vm263_vm11 = vcmp.eq.f32.partialorder %v262_v59, 8.507059e+37  ;;  %v2774_v49 = vld [vmem:[#allocation15_spill] sm:$0xff]  ;;  %v2778_v50 = vld [vmem:[#allocation18_spill] sm:$0xff]  ;;  %v2781_v58 = vld [vmem:[#allocation20_spill] sm:$0xff] }
  0xc8   :  { %v246_v46 = vsel %vm243_vm7, %v245_v54, %v241_v37  ;;  %v269_v36 = vmul.f32 %v1462_v52, %v227_v62  ;;  %v2770_v37 = vld [vmem:[#allocation12_spill] sm:$0xff]  ;;  %v2777_v52 = vld [vmem:[#allocation17_spill] sm:$0xff]  ;;  %v2779_v53 = vld [vmem:[#allocation19_spill] sm:$0xff] }
  0xc9   :  { %v268_v34 = vmul.f32 0.0, %v246_v46  ;;  %v256_v51 = vmul.f32 %v1460_v40, %v255_v0  ;;  %v2780_v54 = vld [vmem:[#allocation33_spill] sm:$0xff]  ;;  %v2783_v62 = vld [vmem:[#allocation22_spill] sm:$0xff] }
  0xca   :  { %v2782_v0 = vld [vmem:[#allocation21_spill] sm:$0xff]  ;;  %v2784_v46 = vld [vmem:[#allocation34_spill] sm:$0xff] }
  0xcb   :  { %v2063_v63 = vadd.f32 %v269_v36, %v268_v34  ;;  %v257_v45 = vadd.f32 %v1460_v40, %v256_v51  ;;  %v2768_v34 = vld [vmem:[#allocation24_spill] sm:$0xff]  ;;  %v2769_v36 = vld [vmem:[#allocation11_spill] sm:$0xff]  ;;  %v2787_v59 = vld [vmem:[#allocation26_spill] sm:$0xff] }
  0xcc   :  { %v2772_v51 = vld [vmem:[#allocation28_spill] sm:$0xff] }
  0xcd   :  { %1463 = vtanh.f32 %v2063_v63  ;;  %v261_v38 = vsel %vm260_vm10, %v1460_v40, %v257_v45  ;;  %v2771_v40 = vld [vmem:[#allocation13_spill] sm:$0xff]  ;;  %v2785_v45 = vld [vmem:[#allocation23_spill] sm:$0xff] }
  0xce   :  { %v266_v55 = vsel %vm263_vm11, %v265_v42, %v261_v38  ;;  %v2788_v38 = vld [vmem:[#allocation35_spill] sm:$0xff] }
  0xcf   :  { %v2789_v42 = vld [vmem:[#allocation27_spill] sm:$0xff] }
  0xd3   :  { %v1464_v57 = vpop.eup %1463 }
  0xd4   :  { %v272_v41 = vmul.f32 %v1464_v57, %v266_v55  ;;  %v2790_v57 = vld [vmem:[#allocation29_spill] sm:$0xff]  ;;  %v2791_v55 = vld [vmem:[#allocation30_spill] sm:$0xff] }
  0xd6   :  { %294 = vmatmul.f32.vlgmr.msrb.gmra.mxu0 %v272_v41  ;;  %314 = vmatmul.f32.vlgmr.msrb.gmra.mxu1 %v272_v41 }
  0xd7   :  { %334 = vmatmul.f32.vlgmr.msrb.gmra.mxu2 %v272_v41  ;;  %354 = vmatmul.f32.vlgmr.msrb.gmra.mxu3 %v272_v41  ;;  %v2792_v41 = vld [vmem:[#allocation36_spill] sm:$0xff] }
  0xd8   :  { %582 = vmatpush.msrb.mxu0 %v2767_v60  ;;  %602 = vmatpush.msrb.mxu1 %v1733_v1 }
  0xd9   :  { %622 = vmatpush.msrb.mxu2 %v1777_v17  ;;  %642 = vmatpush.msrb.mxu3 %v1735_v2 }
  0xda   :  { %583 = vmatpush.msrb.mxu0 %v1739_v3  ;;  %603 = vmatpush.msrb.mxu1 %v1741_v4 }
  0xdb   :  { %623 = vmatpush.msrb.mxu2 %v1783_v19  ;;  %643 = vmatpush.msrb.mxu3 %v1743_v5 }
  0xdc   :  { %584 = vmatpush.msrb.mxu0 %v1746_v6  ;;  %604 = vmatpush.msrb.mxu1 %v1748_v7 }
  0xdd   :  { %624 = vmatpush.msrb.mxu2 %v1795_v23  ;;  %644 = vmatpush.msrb.mxu3 %v1752_v8 }
  0xde   :  { %585 = vmatpush.msrb.mxu0 %v1755_v9  ;;  %605 = vmatpush.msrb.mxu1 %v1757_v10 }
  0xdf   :  { %625 = vmatpush.msrb.mxu2 %v1807_v27  ;;  %645 = vmatpush.msrb.mxu3 %v1761_v11 }
  0xe0   :  { %586 = vmatpush.msrb.mxu0 %v1764_v12  ;;  %606 = vmatpush.msrb.mxu1 %v1766_v13 }
  0xe1   :  { %626 = vmatpush.msrb.mxu2 %v1819_v31  ;;  %646 = vmatpush.msrb.mxu3 %v1770_v14 }
  0xe2   :  { %587 = vmatpush.msrb.mxu0 %v1773_v15  ;;  %607 = vmatpush.msrb.mxu1 %v1775_v16 }
  0xe3   :  { %627 = vmatpush.msrb.mxu2 %v1831_v35  ;;  %647 = vmatpush.msrb.mxu3 %v1781_v18 }
  0xe4   :  { %588 = vmatpush.msrb.mxu0 %v1786_v20  ;;  %608 = vmatpush.msrb.mxu1 %v1788_v21 }
  0xe5   :  { %628 = vmatpush.msrb.mxu2 %v1843_v39  ;;  %648 = vmatpush.msrb.mxu3 %v1793_v22 }
  0xe6   :  { %589 = vmatpush.msrb.mxu0 %v1798_v24  ;;  %609 = vmatpush.msrb.mxu1 %v1800_v25 }
  0xe7   :  { %629 = vmatpush.msrb.mxu2 %v1855_v43  ;;  %649 = vmatpush.msrb.mxu3 %v1805_v26 }
  0xe8   :  { %590 = vmatpush.msrb.mxu0 %v1810_v28  ;;  %610 = vmatpush.msrb.mxu1 %v1812_v29 }
  0xe9   :  { %630 = vmatpush.msrb.mxu2 %v1867_v47  ;;  %650 = vmatpush.msrb.mxu3 %v1817_v30 }
  0xea   :  { %591 = vmatpush.msrb.mxu0 %v1822_v32  ;;  %611 = vmatpush.msrb.mxu1 %v1824_v33 }
  0xeb   :  { %631 = vmatpush.msrb.mxu2 %v2768_v34  ;;  %651 = vmatpush.msrb.mxu3 %v2769_v36 }
  0xec   :  { %592 = vmatpush.msrb.mxu0 %v2770_v37  ;;  %612 = vmatpush.msrb.mxu1 %v2771_v40 }
  0xed   :  { %632 = vmatpush.msrb.mxu2 %v2772_v51  ;;  %652 = vmatpush.msrb.mxu3 %v2773_v56 }
  0xee   :  { %593 = vmatpush.msrb.mxu0 %v2774_v49  ;;  %613 = vmatpush.msrb.mxu1 %v2775_v48 }
  0xef   :  { %633 = vmatpush.msrb.mxu2 %v2776_v61  ;;  %653 = vmatpush.msrb.mxu3 %v2777_v52 }
  0xf0   :  { %594 = vmatpush.msrb.mxu0 %v2778_v50  ;;  %614 = vmatpush.msrb.mxu1 %v2779_v53 }
  0xf1   :  { %634 = vmatpush.msrb.mxu2 %v2780_v54  ;;  %654 = vmatpush.msrb.mxu3 %v2781_v58 }
  0xf2   :  { %595 = vmatpush.msrb.mxu0 %v2782_v0  ;;  %615 = vmatpush.msrb.mxu1 %v2783_v62  ;;  %v2793_v0 = vld [vmem:[#allocation31_spill] sm:$0xff] }
  0xf3   :  { %635 = vmatpush.msrb.mxu2 %v2784_v46  ;;  %655 = vmatpush.msrb.mxu3 %v2785_v45  ;;  %v1392_v45 = vld [vmem:[%s2629_s0 + $0x20] sm:$0xff] }
  0xf4   :  { %596 = vmatpush.msrb.mxu0 %v2786_v44  ;;  %616 = vmatpush.msrb.mxu1 %v2787_v59  ;;  %v1393_v59 = vld [vmem:[%s2629_s0 + $0x28] sm:$0xff] }
  0xf5   :  { %636 = vmatpush.msrb.mxu2 %v2788_v38  ;;  %656 = vmatpush.msrb.mxu3 %v2789_v42 }
  0xf6   :  { %597 = vmatpush.msrb.mxu0 %v2790_v57  ;;  %617 = vmatpush.msrb.mxu1 %v2791_v55 }
  0xf7   :  { %637 = vmatpush.msrb.mxu2 %v2792_v41  ;;  %657 = vmatpush.msrb.mxu3 %v2793_v0  ;;  %v1395_v41 = vld [vmem:[%s2629_s0 + $0x38] sm:$0xff] }
 0x153   :  { %v295_v44 = vpop.f32.mrf.mxu0  ;;  %v315_v38 = vpop.f32.mrf.mxu1 }
 0x154   :  { %v358_v46 = vadd.f32 %v1392_v45, %v295_v44  ;;  %v359_v42 = vadd.f32 %v1393_v59, %v315_v38 }
 0x156   :  { %v1396_v62 = vmul.f32 -1.442695, %v358_v46  ;;  %v1397_v57 = vmul.f32 -1.442695, %v359_v42  ;;  %v1394_v46 = vld [vmem:[%s2629_s0 + $0x30] sm:$0xff] }
 0x158   :  { %1465 = vpow2.f32 %v1396_v62 }
 0x159   :  { %1467 = vpow2.f32 %v1397_v57 }
 0x15a   :  { %v355_v0 = vpop.f32.mrf.mxu3  ;;  %v335_v62 = vpop.f32.mrf.mxu2 }
 0x15b   :  { %v361_v55 = vadd.f32 %v1395_v41, %v355_v0  ;;  %v360_v38 = vadd.f32 %v1394_v46, %v335_v62 }
 0x15d   :  { %v1398_v58 = vmul.f32 -1.442695, %v361_v55 }
 0x15e   :  { %v1466_v54 = vpop.eup %1465 }
 0x15f   :  { %v1468_v53 = vpop.eup %1467  ;;  %v365_v50 = vadd.f32 1.0, %v1466_v54  ;;  %1469 = vpow2.f32 %v1398_v58 }
 0x160   :  { %v384_v52 = vadd.f32 1.0, %v1468_v53 }
 0x161   :  { %1471 = vrcp.f32 %v365_v50  ;;  %v377_v54 = vand.u32 2147483648, %v365_v50  ;;  %v375_v61 = vand.u32 2147483647, %v365_v50  ;;  %vm371_vm14 = vweird.f32 %v365_v50 }
 0x162   :  { %1473 = vrcp.f32 %v384_v52  ;;  %v396_v53 = vand.u32 2147483648, %v384_v52  ;;  %v394_v49 = vand.u32 2147483647, %v384_v52  ;;  %vm390_vm15 = vweird.f32 %v384_v52 }
 0x163   :  { %v378_v46 = vor.u32 1.1754944e-38, %v377_v54  ;;  %vm376_vm2 = vcmp.eq.f32.partialorder %v375_v61, 8.507059e+37 }
 0x164   :  { %vm395_vm3 = vcmp.eq.f32.partialorder %v394_v49, 8.507059e+37 }
 0x165   :  { %v1470_v45 = vpop.eup %1469 }
 0x166   :  { %v404_v44 = vadd.f32 1.0, %v1470_v45 }
 0x167   :  { %v1472_v59 = vpop.eup %1471 }
 0x168   :  { %v1474_v42 = vpop.eup %1473  ;;  %v367_v57 = vmul.f32 %v1472_v59, %v365_v50  ;;  %1475 = vrcp.f32 %v404_v44  ;;  %vm372_vm12 = vweird.f32 %v1472_v59  ;;  %vm410_vm5 = vweird.f32 %v404_v44 }
 0x169   :  { %v386_v0 = vmul.f32 %v1474_v42, %v384_v52  ;;  %1477 = vtanh.f32 %v360_v38  ;;  %vm391_vm13 = vweird.f32 %v1474_v42  ;;  %vm373_vm0 = vmor %vm371_vm14, %vm372_vm12 }
 0x16a   :  { %v368_v55 = vsub.f32 1.0, %v367_v57  ;;  %vm392_vm1 = vmor %vm390_vm15, %vm391_vm13  ;;  %v397_v57 = vor.u32 1.1754944e-38, %v396_v53 }
 0x16b   :  { %v387_v41 = vsub.f32 1.0, %v386_v0 }
 0x16c   :  { %v369_v58 = vmul.f32 %v1472_v59, %v368_v55 }
 0x16d   :  { %v388_v48 = vmul.f32 %v1474_v42, %v387_v41 }
 0x16e   :  { %v1476_v56 = vpop.eup %1475  ;;  %v370_v51 = vadd.f32 %v1472_v59, %v369_v58 }
 0x16f   :  { %v389_v62 = vadd.f32 %v1474_v42, %v388_v48  ;;  %v406_v45 = vmul.f32 %v1476_v56, %v404_v44  ;;  %v1478_v38 = vpop.eup %1477  ;;  %vm411_vm4 = vweird.f32 %v1476_v56  ;;  %v416_v48 = vand.u32 2147483648, %v404_v44 }
 0x170   :  { %v374_v0 = vsel %vm373_vm0, %v1472_v59, %v370_v51  ;;  %v414_v51 = vand.u32 2147483647, %v404_v44  ;;  %vm412_vm6 = vmor %vm410_vm5, %vm411_vm4 }
 0x171   :  { %v379_v40 = vsel %vm376_vm2, %v378_v46, %v374_v0  ;;  %v393_v55 = vsel %vm392_vm1, %v1474_v42, %v389_v62  ;;  %v407_v37 = vsub.f32 1.0, %v406_v45  ;;  %v417_v59 = vor.u32 1.1754944e-38, %v416_v48 }
 0x172   :  { %v398_v41 = vsel %vm395_vm3, %v397_v57, %v393_v55  ;;  %v421_v36 = vmul.f32 %v1478_v38, %v379_v40  ;;  %vm415_vm7 = vcmp.eq.f32.partialorder %v414_v51, 8.507059e+37  ;;  %v1401_v40 = vld [vmem:[%s2629_s0 + $0x50] sm:$0xff] }
 0x173   :  { %v420_v34 = vmul.f32 %v398_v41, %v2063_v63  ;;  %v408_v58 = vmul.f32 %v1476_v56, %v407_v37 }
 0x175   :  { %v2143_v50 = vadd.f32 %v421_v36, %v420_v34  ;;  %v409_v52 = vadd.f32 %v1476_v56, %v408_v58 }
 0x177   :  { %1479 = vtanh.f32 %v2143_v50  ;;  %v413_v61 = vsel %vm412_vm6, %v1476_v56, %v409_v52 }
 0x178   :  { %v418_v42 = vsel %vm415_vm7, %v417_v59, %v413_v61 }
 0x17d   :  { %v1480_v49 = vpop.eup %1479 }
 0x17e   :  { %v424_v54 = vmul.f32 %v1480_v49, %v418_v42 }
 0x180   :  { %446 = vmatmul.f32.vlgmr.msra.gmra.mxu0 %v424_v54  ;;  %466 = vmatmul.f32.vlgmr.msra.gmra.mxu1 %v424_v54 }
 0x181   :  { %486 = vmatmul.f32.vlgmr.msra.gmra.mxu2 %v424_v54  ;;  %506 = vmatmul.f32.vlgmr.msra.gmra.mxu3 %v424_v54 }
 0x182   :  { %734 = vmatpush.msra.mxu0 %v2767_v60  ;;  %754 = vmatpush.msra.mxu1 %v1733_v1  ;;  %v2794_v1 = vld [vmem:[#allocation24_spill] sm:$0xff] }
 0x183   :  { %774 = vmatpush.msra.mxu2 %v1777_v17  ;;  %794 = vmatpush.msra.mxu3 %v1735_v2  ;;  %v2795_v2 = vld [vmem:[#allocation11_spill] sm:$0xff]  ;;  %v2810_v17 = vld [vmem:[#allocation34_spill] sm:$0xff] }
 0x184   :  { %735 = vmatpush.msra.mxu0 %v1739_v3  ;;  %755 = vmatpush.msra.mxu1 %v1741_v4  ;;  %v2796_v3 = vld [vmem:[#allocation12_spill] sm:$0xff]  ;;  %v2797_v4 = vld [vmem:[#allocation13_spill] sm:$0xff] }
 0x185   :  { %775 = vmatpush.msra.mxu2 %v1783_v19  ;;  %795 = vmatpush.msra.mxu3 %v1743_v5  ;;  %v2798_v5 = vld [vmem:[#allocation28_spill] sm:$0xff]  ;;  %v2812_v19 = vld [vmem:[#allocation25_spill] sm:$0xff] }
 0x186   :  { %736 = vmatpush.msra.mxu0 %v1746_v6  ;;  %756 = vmatpush.msra.mxu1 %v1748_v7  ;;  %v2799_v6 = vld [vmem:[#allocation14_spill] sm:$0xff]  ;;  %v2800_v7 = vld [vmem:[#allocation15_spill] sm:$0xff] }
 0x187   :  { %776 = vmatpush.msra.mxu2 %v1795_v23  ;;  %796 = vmatpush.msra.mxu3 %v1752_v8  ;;  %v2801_v8 = vld [vmem:[#allocation16_spill] sm:$0xff]  ;;  %v2816_v23 = vld [vmem:[#allocation29_spill] sm:$0xff] }
 0x188   :  { %737 = vmatpush.msra.mxu0 %v1755_v9  ;;  %757 = vmatpush.msra.mxu1 %v1757_v10  ;;  %v2802_v9 = vld [vmem:[#allocation32_spill] sm:$0xff]  ;;  %v2803_v10 = vld [vmem:[#allocation17_spill] sm:$0xff] }
 0x189   :  { %777 = vmatpush.msra.mxu2 %v1807_v27  ;;  %797 = vmatpush.msra.mxu3 %v1761_v11  ;;  %v2804_v11 = vld [vmem:[#allocation18_spill] sm:$0xff] }
 0x18a   :  { %738 = vmatpush.msra.mxu0 %v1764_v12  ;;  %758 = vmatpush.msra.mxu1 %v1766_v13  ;;  %v2805_v12 = vld [vmem:[#allocation19_spill] sm:$0xff]  ;;  %v2806_v13 = vld [vmem:[#allocation33_spill] sm:$0xff]  ;;  %v1399_v27 = vld [vmem:[%s2629_s0 + $0x40] sm:$0xff] }
 0x18b   :  { %778 = vmatpush.msra.mxu2 %v1819_v31  ;;  %798 = vmatpush.msra.mxu3 %v1770_v14  ;;  %v2807_v14 = vld [vmem:[#allocation20_spill] sm:$0xff] }
 0x18c   :  { %739 = vmatpush.msra.mxu0 %v1773_v15  ;;  %759 = vmatpush.msra.mxu1 %v1775_v16  ;;  %v2808_v15 = vld [vmem:[#allocation21_spill] sm:$0xff]  ;;  %v2809_v16 = vld [vmem:[#allocation22_spill] sm:$0xff] }
 0x18d   :  { %779 = vmatpush.msra.mxu2 %v1831_v35  ;;  %799 = vmatpush.msra.mxu3 %v1781_v18  ;;  %v2811_v18 = vld [vmem:[#allocation23_spill] sm:$0xff] }
 0x18e   :  { %740 = vmatpush.msra.mxu0 %v1786_v20  ;;  %760 = vmatpush.msra.mxu1 %v1788_v21  ;;  %v2813_v20 = vld [vmem:[#allocation26_spill] sm:$0xff]  ;;  %v2814_v21 = vld [vmem:[#allocation35_spill] sm:$0xff] }
 0x18f   :  { %780 = vmatpush.msra.mxu2 %v1843_v39  ;;  %800 = vmatpush.msra.mxu3 %v1793_v22  ;;  %v2815_v22 = vld [vmem:[#allocation27_spill] sm:$0xff]  ;;  %v1402_v39 = vld [vmem:[%s2629_s0 + $0x58] sm:$0xff] }
 0x190   :  { %741 = vmatpush.msra.mxu0 %v1798_v24  ;;  %761 = vmatpush.msra.mxu1 %v1800_v25  ;;  %v2817_v24 = vld [vmem:[#allocation30_spill] sm:$0xff]  ;;  %v2818_v25 = vld [vmem:[#allocation36_spill] sm:$0xff] }
 0x191   :  { %781 = vmatpush.msra.mxu2 %v1855_v43  ;;  %801 = vmatpush.msra.mxu3 %v1805_v26  ;;  %v2819_v26 = vld [vmem:[#allocation31_spill] sm:$0xff] }
 0x192   :  { %742 = vmatpush.msra.mxu0 %v1810_v28  ;;  %762 = vmatpush.msra.mxu1 %v1812_v29  ;;  %v1400_v28 = vld [vmem:[%s2629_s0 + $0x48] sm:$0xff] }
 0x193   :  { %782 = vmatpush.msra.mxu2 %v1867_v47  ;;  %802 = vmatpush.msra.mxu3 %v1817_v30 }
 0x194   :  { %743 = vmatpush.msra.mxu0 %v1822_v32  ;;  %763 = vmatpush.msra.mxu1 %v1824_v33 }
 0x195   :  { %783 = vmatpush.msra.mxu2 %v2794_v1  ;;  %803 = vmatpush.msra.mxu3 %v2795_v2 }
 0x196   :  { %744 = vmatpush.msra.mxu0 %v2796_v3  ;;  %764 = vmatpush.msra.mxu1 %v2797_v4 }
 0x197   :  { %784 = vmatpush.msra.mxu2 %v2798_v5  ;;  %804 = vmatpush.msra.mxu3 %v2799_v6 }
 0x198   :  { %745 = vmatpush.msra.mxu0 %v2800_v7  ;;  %765 = vmatpush.msra.mxu1 %v2801_v8 }
 0x199   :  { %785 = vmatpush.msra.mxu2 %v2802_v9  ;;  %805 = vmatpush.msra.mxu3 %v2803_v10 }
 0x19a   :  { %746 = vmatpush.msra.mxu0 %v2804_v11  ;;  %766 = vmatpush.msra.mxu1 %v2805_v12 }
 0x19b   :  { %786 = vmatpush.msra.mxu2 %v2806_v13  ;;  %806 = vmatpush.msra.mxu3 %v2807_v14 }
 0x19c   :  { %747 = vmatpush.msra.mxu0 %v2808_v15  ;;  %767 = vmatpush.msra.mxu1 %v2809_v16 }
 0x19d   :  { %787 = vmatpush.msra.mxu2 %v2810_v17  ;;  %807 = vmatpush.msra.mxu3 %v2811_v18 }
 0x19e   :  { %748 = vmatpush.msra.mxu0 %v2812_v19  ;;  %768 = vmatpush.msra.mxu1 %v2813_v20 }
 0x19f   :  { %788 = vmatpush.msra.mxu2 %v2814_v21  ;;  %808 = vmatpush.msra.mxu3 %v2815_v22  ;;  %v2229_v21 = vld [vmem:[#allocation4 + $0x1e8] sm:$0xff]  ;;  %v2232_v22 = vld [vmem:[#allocation4 + $0x1f0] sm:$0xff] }
 0x1a0   :  { %749 = vmatpush.msra.mxu0 %v2816_v23  ;;  %769 = vmatpush.msra.mxu1 %v2817_v24  ;;  %v2235_v23 = vld [vmem:[#allocation4 + $0x1f8] sm:$0xff]  ;;  %v2238_v24 = vld [vmem:[#allocation4 + $0x1c0] sm:$0xff] }
 0x1a1   :  { %789 = vmatpush.msra.mxu2 %v2818_v25  ;;  %809 = vmatpush.msra.mxu3 %v2819_v26  ;;  %v2241_v25 = vld [vmem:[#allocation4 + $0x1c8] sm:$0xff]  ;;  %v2244_v26 = vld [vmem:[#allocation4 + $0x1d0] sm:$0xff] }
 0x1fd   :  { %v447_v29 = vpop.f32.mrf.mxu0  ;;  %v467_v30 = vpop.f32.mrf.mxu1 }
 0x1fe   :  { %v510_v31 = vadd.f32 %v1399_v27, %v447_v29  ;;  %v511_v32 = vadd.f32 %v1400_v28, %v467_v30  ;;  %v2247_v27 = vld [vmem:[#allocation4 + $0x1d8] sm:$0xff]  ;;  %v2250_v28 = vld [vmem:[#allocation4 + $0x1a0] sm:$0xff]  ;;  %v2253_v29 = vld [vmem:[#allocation4 + $0x1a8] sm:$0xff] }
 0x1ff   :  { %v2256_v30 = vld [vmem:[#allocation4 + $0x1b0] sm:$0xff] }
 0x200   :  { %v1403_v33 = vmul.f32 -1.442695, %v510_v31  ;;  %v1404_v35 = vmul.f32 -1.442695, %v511_v32  ;;  %v2259_v31 = vld [vmem:[#allocation4 + $0x1b8] sm:$0xff]  ;;  %v2262_v32 = vld [vmem:[#allocation4 + $0x180] sm:$0xff] }
 0x202   :  { %1481 = vpow2.f32 %v1403_v33  ;;  %v2265_v33 = vld [vmem:[#allocation4 + $0x188] sm:$0xff] }
 0x203   :  { %1483 = vpow2.f32 %v1404_v35  ;;  %v2268_v35 = vld [vmem:[#allocation4 + $0x190] sm:$0xff] }
 0x204   :  { %v507_v43 = vpop.f32.mrf.mxu3  ;;  %v487_v56 = vpop.f32.mrf.mxu2 }
 0x205   :  { %v513_v47 = vadd.f32 %v1402_v39, %v507_v43  ;;  %v512_v62 = vadd.f32 %v1401_v40, %v487_v56  ;;  %v2271_v39 = vld [vmem:[#allocation4 + $0x198] sm:$0xff]  ;;  %v2274_v43 = vld [vmem:[#allocation4 + $0x160] sm:$0xff] }
 0x206   :  { %v2295_v40 = vld [vmem:[#allocation4 + $0x158] sm:$0xff]  ;;  %v2298_v56 = vld [vmem:[#allocation4 + $0x120] sm:$0xff] }
 0x207   :  { %v1405_v60 = vmul.f32 -1.442695, %v513_v47  ;;  %v2277_v47 = vld [vmem:[#allocation4 + $0x168] sm:$0xff] }
 0x208   :  { %v1482_v63 = vpop.eup %1481 }
 0x209   :  { %v1484_v34 = vpop.eup %1483  ;;  %v517_v36 = vadd.f32 1.0, %v1482_v63  ;;  %1485 = vpow2.f32 %v1405_v60  ;;  %v2280_v60 = vld [vmem:[#allocation4 + $0x170] sm:$0xff]  ;;  %v2283_v63 = vld [vmem:[#allocation4 + $0x178] sm:$0xff] }
 0x20a   :  { %v536_v37 = vadd.f32 1.0, %v1484_v34  ;;  %v2286_v34 = vld [vmem:[#allocation4 + $0x140] sm:$0xff] }
 0x20b   :  { %1487 = vrcp.f32 %v517_v36  ;;  %v529_v41 = vand.u32 2147483648, %v517_v36  ;;  %v527_v48 = vand.u32 2147483647, %v517_v36  ;;  %vm523_vm10 = vweird.f32 %v517_v36 }
 0x20c   :  { %1489 = vrcp.f32 %v536_v37  ;;  %v548_v58 = vand.u32 2147483648, %v536_v37  ;;  %v546_v61 = vand.u32 2147483647, %v536_v37  ;;  %vm542_vm11 = vweird.f32 %v536_v37 }
 0x20d   :  { %v530_v42 = vor.u32 1.1754944e-38, %v529_v41  ;;  %vm528_vm14 = vcmp.eq.f32.partialorder %v527_v48, 8.507059e+37  ;;  %v2328_v41 = vld [vmem:[#allocation4 + $0xf0] sm:$0xff]  ;;  %v2337_v48 = vld [vmem:[#allocation4 + $0xc8] sm:$0xff] }
 0x20e   :  { %v549_v2 = vor.u32 1.1754944e-38, %v548_v58  ;;  %vm547_vm15 = vcmp.eq.f32.partialorder %v546_v61, 8.507059e+37  ;;  %v2331_v58 = vld [vmem:[#allocation4 + $0xf8] sm:$0xff] }
 0x20f   :  { %v1486_v44 = vpop.eup %1485  ;;  %v2343_v61 = vld [vmem:[#allocation4 + $0xd8] sm:$0xff] }
 0x210   :  { %v556_v53 = vadd.f32 1.0, %v1486_v44  ;;  %v2301_v44 = vld [vmem:[#allocation4 + $0x128] sm:$0xff]  ;;  %2821 = vst [vmem:[#allocation24_spill] sm:$0xff] %v2343_v61 }
 0x211   :  { %v1488_v46 = vpop.eup %1487 }
 0x212   :  { %v1490_v45 = vpop.eup %1489  ;;  %v519_v57 = vmul.f32 %v1488_v46, %v517_v36  ;;  %1491 = vrcp.f32 %v556_v53  ;;  %vm524_vm8 = vweird.f32 %v1488_v46  ;;  %v568_v14 = vand.u32 2147483648, %v556_v53  ;;  %v2289_v36 = vld [vmem:[#allocation4 + $0x148] sm:$0xff] }
 0x213   :  { %v538_v0 = vmul.f32 %v1490_v45, %v536_v37  ;;  %1493 = vtanh.f32 %v512_v62  ;;  %vm543_vm9 = vweird.f32 %v1490_v45  ;;  %vm525_vm12 = vmor %vm523_vm10, %vm524_vm8  ;;  %vm562_vm1 = vweird.f32 %v556_v53  ;;  %v2292_v37 = vld [vmem:[#allocation4 + $0x150] sm:$0xff]  ;;  %v2310_v62 = vld [vmem:[#allocation4 + $0x100] sm:$0xff] }
 0x214   :  { %v520_v38 = vsub.f32 1.0, %v519_v57  ;;  %vm544_vm13 = vmor %vm542_vm11, %vm543_vm9  ;;  %v566_v15 = vand.u32 2147483647, %v556_v53  ;;  %v569_v17 = vor.u32 1.1754944e-38, %v568_v14  ;;  %v2316_v57 = vld [vmem:[#allocation4 + $0x110] sm:$0xff]  ;;  %v2394_v14 = vld [vmem:[#allocation4 + $0x20] sm:$0xff] }
 0x215   :  { %v539_v55 = vsub.f32 1.0, %v538_v0  ;;  %v2319_v0 = vld [vmem:[#allocation4 + $0x118] sm:$0xff]  ;;  %2838 = vst [vmem:[#allocation23_spill] sm:$0xff] %v2394_v14 }
 0x216   :  { %v521_v52 = vmul.f32 %v1488_v46, %v520_v38  ;;  %vm567_vm3 = vcmp.eq.f32.partialorder %v566_v15, 8.507059e+37  ;;  %v2322_v38 = vld [vmem:[#allocation4 + $0xe0] sm:$0xff]  ;;  %v2397_v15 = vld [vmem:[#allocation4 + $0x28] sm:$0xff] }
 0x217   :  { %v540_v51 = vmul.f32 %v1490_v45, %v539_v55  ;;  %v2325_v55 = vld [vmem:[#allocation4 + $0xe8] sm:$0xff]  ;;  %2839 = vst [vmem:[#allocation25_spill] sm:$0xff] %v2397_v15 }
 0x218   :  { %v1492_v59 = vpop.eup %1491  ;;  %v522_v49 = vadd.f32 %v1488_v46, %v521_v52  ;;  %v2334_v52 = vld [vmem:[#allocation4 + $0xc0] sm:$0xff] }
 0x219   :  { %v541_v54 = vadd.f32 %v1490_v45, %v540_v51  ;;  %v558_v1 = vmul.f32 %v1492_v59, %v556_v53  ;;  %v1494_v4 = vpop.eup %1493  ;;  %vm563_vm0 = vweird.f32 %v1492_v59  ;;  %v2304_v53 = vld [vmem:[#allocation4 + $0x130] sm:$0xff] }
 0x21a   :  { %v526_v3 = vsel %vm525_vm12, %v1488_v46, %v522_v49  ;;  %vm564_vm2 = vmor %vm562_vm1, %vm563_vm0  ;;  %v2307_v46 = vld [vmem:[#allocation4 + $0x138] sm:$0xff]  ;;  %v2340_v51 = vld [vmem:[#allocation4 + $0xd0] sm:$0xff] }
 0x21b   :  { %v531_v5 = vsel %vm528_vm14, %v530_v42, %v526_v3  ;;  %v545_v6 = vsel %vm544_vm13, %v1490_v45, %v541_v54  ;;  %v559_v7 = vsub.f32 1.0, %v558_v1  ;;  %v2313_v45 = vld [vmem:[#allocation4 + $0x108] sm:$0xff]  ;;  %2820 = vst [vmem:[#allocation10_spill] sm:$0xff] %v2340_v51  ;;  %v2352_v42 = vld [vmem:[#allocation4 + $0xb0] sm:$0xff]  ;;  %v2355_v54 = vld [vmem:[#allocation4 + $0xb8] sm:$0xff] }
 0x21c   :  { %v550_v8 = vsel %vm547_vm15, %v549_v2, %v545_v6  ;;  %v573_v9 = vmul.f32 %v1494_v4, %v531_v5  ;;  %v2349_v49 = vld [vmem:[#allocation4 + $0xa8] sm:$0xff]  ;;  %2824 = vst [vmem:[#allocation13_spill] sm:$0xff] %v2352_v42  ;;  %v2358_v1 = vld [vmem:[#allocation4 + $0x80] sm:$0xff]  ;;  %v2364_v3 = vld [vmem:[#allocation4 + $0x90] sm:$0xff] }
 0x21d   :  { %v572_v10 = vmul.f32 %v550_v8, %v2143_v50  ;;  %v560_v11 = vmul.f32 %v1492_v59, %v559_v7  ;;  %v2226_v50 = vld [vmem:[#allocation4 + $0x1e0] sm:$0xff]  ;;  %2823 = vst [vmem:[#allocation12_spill] sm:$0xff] %v2349_v49  ;;  %v2361_v2 = vld [vmem:[#allocation4 + $0x88] sm:$0xff]  ;;  %v2367_v4 = vld [vmem:[#allocation4 + $0x98] sm:$0xff] }
 0x21e   :  { %2825 = vst [vmem:[#allocation28_spill] sm:$0xff] %v2355_v54  ;;  %v2370_v5 = vld [vmem:[#allocation4 + $0x60] sm:$0xff]  ;;  %v2373_v6 = vld [vmem:[#allocation4 + $0x68] sm:$0xff]  ;;  %v2376_v7 = vld [vmem:[#allocation4 + $0x70] sm:$0xff] }
 0x21f   :  { %v2223_v12 = vadd.f32 %v573_v9, %v572_v10  ;;  %v561_v13 = vadd.f32 %v1492_v59, %v560_v11  ;;  %2826 = vst [vmem:[#allocation14_spill] sm:$0xff] %v2358_v1  ;;  %v2379_v8 = vld [vmem:[#allocation4 + $0x78] sm:$0xff]  ;;  %v2382_v9 = vld [vmem:[#allocation4 + $0x40] sm:$0xff]  ;;  %v2385_v10 = vld [vmem:[#allocation4 + $0x48] sm:$0xff] }
 0x220   :  { %2827 = vst [vmem:[#allocation15_spill] sm:$0xff] %v2361_v2  ;;  %v2388_v11 = vld [vmem:[#allocation4 + $0x50] sm:$0xff] }
 0x221   :  { %1495 = vtanh.f32 %v2223_v12  ;;  %v565_v16 = vsel %vm564_vm2, %v1492_v59, %v561_v13  ;;  %v2346_v59 = vld [vmem:[#allocation4 + $0xa0] sm:$0xff]  ;;  %2828 = vst [vmem:[#allocation16_spill] sm:$0xff] %v2364_v3  ;;  %v2391_v13 = vld [vmem:[#allocation4 + $0x58] sm:$0xff] }
 0x222   :  { %v570_v19 = vsel %vm567_vm3, %v569_v17, %v565_v16  ;;  %2822 = vst [vmem:[#allocation11_spill] sm:$0xff] %v2346_v59  ;;  %v2400_v16 = vld [vmem:[#allocation4 + $0x30] sm:$0xff]  ;;  %v2403_v17 = vld [vmem:[#allocation4 + $0x38] sm:$0xff] }
 0x223   :  { %2829 = vst [vmem:[#allocation32_spill] sm:$0xff] %v2367_v4 }
 0x224   :  { %2830 = vst [vmem:[#allocation17_spill] sm:$0xff] %v2370_v5 }
 0x225   :  { %2831 = vst [vmem:[#allocation18_spill] sm:$0xff] %v2373_v6 }
 0x226   :  { %2832 = vst [vmem:[#allocation19_spill] sm:$0xff] %v2376_v7 }
 0x227   :  { %v1496_v18 = vpop.eup %1495  ;;  %2833 = vst [vmem:[#allocation33_spill] sm:$0xff] %v2379_v8 }
 0x228   :  { %v576_v20 = vmul.f32 %v1496_v18, %v570_v19  ;;  %2834 = vst [vmem:[#allocation20_spill] sm:$0xff] %v2382_v9  ;;  %v2406_v18 = vld [vmem:[#allocation4] sm:$0xff]  ;;  %v2409_v19 = vld [vmem:[#allocation4 + $0x8] sm:$0xff] }
 0x229   :  { %2835 = vst [vmem:[#allocation21_spill] sm:$0xff] %v2385_v10 }
 0x22a   :  { %598 = vmatmul.f32.vlgmr.msrb.gmra.mxu0 %v576_v20  ;;  %618 = vmatmul.f32.vlgmr.msrb.gmra.mxu1 %v576_v20  ;;  %2836 = vst [vmem:[#allocation22_spill] sm:$0xff] %v2388_v11 }
 0x22b   :  { %638 = vmatmul.f32.vlgmr.msrb.gmra.mxu2 %v576_v20  ;;  %658 = vmatmul.f32.vlgmr.msrb.gmra.mxu3 %v576_v20  ;;  %2837 = vst [vmem:[#allocation34_spill] sm:$0xff] %v2391_v13  ;;  %v2412_v20 = vld [vmem:[#allocation4 + $0x10] sm:$0xff] }
 0x22c   :  { %886 = vmatpush.msrb.mxu0 %v2226_v50  ;;  %906 = vmatpush.msrb.mxu1 %v2229_v21  ;;  %2840 = vst [vmem:[#allocation26_spill] sm:$0xff] %v2400_v16 }
 0x22d   :  { %926 = vmatpush.msrb.mxu2 %v2232_v22  ;;  %946 = vmatpush.msrb.mxu3 %v2235_v23  ;;  %2841 = vst [vmem:[#allocation35_spill] sm:$0xff] %v2403_v17 }
 0x22e   :  { %887 = vmatpush.msrb.mxu0 %v2238_v24  ;;  %907 = vmatpush.msrb.mxu1 %v2241_v25  ;;  %2842 = vst [vmem:[#allocation27_spill] sm:$0xff] %v2406_v18 }
 0x22f   :  { %927 = vmatpush.msrb.mxu2 %v2244_v26  ;;  %947 = vmatpush.msrb.mxu3 %v2247_v27  ;;  %2843 = vst [vmem:[#allocation29_spill] sm:$0xff] %v2409_v19 }
 0x230   :  { %888 = vmatpush.msrb.mxu0 %v2250_v28  ;;  %908 = vmatpush.msrb.mxu1 %v2253_v29  ;;  %2844 = vst [vmem:[#allocation30_spill] sm:$0xff] %v2412_v20 }
 0x231   :  { %928 = vmatpush.msrb.mxu2 %v2256_v30  ;;  %948 = vmatpush.msrb.mxu3 %v2259_v31 }
 0x232   :  { %889 = vmatpush.msrb.mxu0 %v2262_v32  ;;  %909 = vmatpush.msrb.mxu1 %v2265_v33 }
 0x233   :  { %929 = vmatpush.msrb.mxu2 %v2268_v35  ;;  %949 = vmatpush.msrb.mxu3 %v2271_v39 }
 0x234   :  { %890 = vmatpush.msrb.mxu0 %v2274_v43  ;;  %910 = vmatpush.msrb.mxu1 %v2277_v47 }
 0x235   :  { %930 = vmatpush.msrb.mxu2 %v2280_v60  ;;  %950 = vmatpush.msrb.mxu3 %v2283_v63 }
 0x236   :  { %891 = vmatpush.msrb.mxu0 %v2286_v34  ;;  %911 = vmatpush.msrb.mxu1 %v2289_v36 }
 0x237   :  { %931 = vmatpush.msrb.mxu2 %v2292_v37  ;;  %951 = vmatpush.msrb.mxu3 %v2295_v40 }
 0x238   :  { %892 = vmatpush.msrb.mxu0 %v2298_v56  ;;  %912 = vmatpush.msrb.mxu1 %v2301_v44 }
 0x239   :  { %932 = vmatpush.msrb.mxu2 %v2304_v53  ;;  %952 = vmatpush.msrb.mxu3 %v2307_v46 }
 0x23a   :  { %893 = vmatpush.msrb.mxu0 %v2310_v62  ;;  %913 = vmatpush.msrb.mxu1 %v2313_v45 }
 0x23b   :  { %933 = vmatpush.msrb.mxu2 %v2316_v57  ;;  %953 = vmatpush.msrb.mxu3 %v2319_v0 }
 0x23c   :  { %894 = vmatpush.msrb.mxu0 %v2322_v38  ;;  %914 = vmatpush.msrb.mxu1 %v2325_v55 }
 0x23d   :  { %934 = vmatpush.msrb.mxu2 %v2328_v41  ;;  %954 = vmatpush.msrb.mxu3 %v2331_v58 }
 0x23e   :  { %895 = vmatpush.msrb.mxu0 %v2334_v52  ;;  %915 = vmatpush.msrb.mxu1 %v2337_v48 }
 0x23f   :  { %935 = vmatpush.msrb.mxu2 %v2340_v51  ;;  %955 = vmatpush.msrb.mxu3 %v2343_v61 }
 0x240   :  { %896 = vmatpush.msrb.mxu0 %v2346_v59  ;;  %916 = vmatpush.msrb.mxu1 %v2349_v49 }
 0x241   :  { %936 = vmatpush.msrb.mxu2 %v2352_v42  ;;  %956 = vmatpush.msrb.mxu3 %v2355_v54 }
 0x242   :  { %897 = vmatpush.msrb.mxu0 %v2358_v1  ;;  %917 = vmatpush.msrb.mxu1 %v2361_v2 }
 0x243   :  { %937 = vmatpush.msrb.mxu2 %v2364_v3  ;;  %957 = vmatpush.msrb.mxu3 %v2367_v4 }
 0x244   :  { %898 = vmatpush.msrb.mxu0 %v2370_v5  ;;  %918 = vmatpush.msrb.mxu1 %v2373_v6 }
 0x245   :  { %938 = vmatpush.msrb.mxu2 %v2376_v7  ;;  %958 = vmatpush.msrb.mxu3 %v2379_v8 }
 0x246   :  { %899 = vmatpush.msrb.mxu0 %v2382_v9  ;;  %919 = vmatpush.msrb.mxu1 %v2385_v10 }
 0x247   :  { %939 = vmatpush.msrb.mxu2 %v2388_v11  ;;  %959 = vmatpush.msrb.mxu3 %v2391_v13 }
 0x248   :  { %900 = vmatpush.msrb.mxu0 %v2394_v14  ;;  %920 = vmatpush.msrb.mxu1 %v2397_v15  ;;  %v2415_v15 = vld [vmem:[#allocation4 + $0x18] sm:$0xff] }
 0x249   :  { %940 = vmatpush.msrb.mxu2 %v2400_v16  ;;  %960 = vmatpush.msrb.mxu3 %v2403_v17  ;;  %2845 = vst [vmem:[#allocation36_spill] sm:$0xff] %v2415_v15  ;;  %v1406_v17 = vld [vmem:[%s2629_s0 + $0x60] sm:$0xff] }
 0x24a   :  { %901 = vmatpush.msrb.mxu0 %v2406_v18  ;;  %921 = vmatpush.msrb.mxu1 %v2409_v19  ;;  %v1407_v18 = vld [vmem:[%s2629_s0 + $0x68] sm:$0xff] }
 0x24b   :  { %941 = vmatpush.msrb.mxu2 %v2412_v20  ;;  %961 = vmatpush.msrb.mxu3 %v2415_v15  ;;  %v1409_v20 = vld [vmem:[%s2629_s0 + $0x78] sm:$0xff] }
 0x2a7   :  { %v599_v16 = vpop.f32.mrf.mxu0  ;;  %v619_v14 = vpop.f32.mrf.mxu1 }
 0x2a8   :  { %v662_v13 = vadd.f32 %v1406_v17, %v599_v16  ;;  %v663_v19 = vadd.f32 %v1407_v18, %v619_v14 }
 0x2aa   :  { %v1410_v11 = vmul.f32 -1.442695, %v662_v13  ;;  %v1411_v10 = vmul.f32 -1.442695, %v663_v19  ;;  %v1408_v13 = vld [vmem:[%s2629_s0 + $0x70] sm:$0xff] }
 0x2ac   :  { %1497 = vpow2.f32 %v1410_v11 }
 0x2ad   :  { %1499 = vpow2.f32 %v1411_v10 }
 0x2ae   :  { %v659_v15 = vpop.f32.mrf.mxu3  ;;  %v639_v11 = vpop.f32.mrf.mxu2 }
 0x2af   :  { %v665_v9 = vadd.f32 %v1409_v20, %v659_v15  ;;  %v664_v18 = vadd.f32 %v1408_v13, %v639_v11 }
 0x2b1   :  { %v1412_v8 = vmul.f32 -1.442695, %v665_v9 }
 0x2b2   :  { %v1498_v7 = vpop.eup %1497 }
 0x2b3   :  { %v1500_v6 = vpop.eup %1499  ;;  %v669_v5 = vadd.f32 1.0, %v1498_v7  ;;  %1501 = vpow2.f32 %v1412_v8 }
 0x2b4   :  { %v688_v4 = vadd.f32 1.0, %v1500_v6 }
 0x2b5   :  { %1503 = vrcp.f32 %v669_v5  ;;  %v681_v7 = vand.u32 2147483648, %v669_v5  ;;  %v679_v3 = vand.u32 2147483647, %v669_v5  ;;  %vm675_vm6 = vweird.f32 %v669_v5 }
 0x2b6   :  { %1505 = vrcp.f32 %v688_v4  ;;  %v700_v6 = vand.u32 2147483648, %v688_v4  ;;  %v698_v1 = vand.u32 2147483647, %v688_v4  ;;  %vm694_vm7 = vweird.f32 %v688_v4 }
 0x2b7   :  { %v682_v13 = vor.u32 1.1754944e-38, %v681_v7  ;;  %vm680_vm10 = vcmp.eq.f32.partialorder %v679_v3, 8.507059e+37 }
 0x2b8   :  { %vm699_vm11 = vcmp.eq.f32.partialorder %v698_v1, 8.507059e+37 }
 0x2b9   :  { %v1502_v14 = vpop.eup %1501 }
 0x2ba   :  { %v708_v16 = vadd.f32 1.0, %v1502_v14 }
 0x2bb   :  { %v1504_v17 = vpop.eup %1503 }
 0x2bc   :  { %v1506_v10 = vpop.eup %1505  ;;  %v671_v19 = vmul.f32 %v1504_v17, %v669_v5  ;;  %1507 = vrcp.f32 %v708_v16  ;;  %vm676_vm4 = vweird.f32 %v1504_v17  ;;  %vm714_vm13 = vweird.f32 %v708_v16 }
 0x2bd   :  { %v690_v9 = vmul.f32 %v1506_v10, %v688_v4  ;;  %1509 = vtanh.f32 %v664_v18  ;;  %vm695_vm5 = vweird.f32 %v1506_v10  ;;  %vm677_vm8 = vmor %vm675_vm6, %vm676_vm4 }
 0x2be   :  { %v672_v15 = vsub.f32 1.0, %v671_v19  ;;  %vm696_vm9 = vmor %vm694_vm7, %vm695_vm5  ;;  %v701_v19 = vor.u32 1.1754944e-38, %v700_v6  ;;  %v2853_v6 = vld [vmem:[#allocation15_spill] sm:$0xff] }
 0x2bf   :  { %v691_v20 = vsub.f32 1.0, %v690_v9 }
 0x2c0   :  { %v673_v8 = vmul.f32 %v1504_v17, %v672_v15 }
 0x2c1   :  { %v692_v2 = vmul.f32 %v1506_v10, %v691_v20 }
 0x2c2   :  { %v1508_v54 = vpop.eup %1507  ;;  %v674_v42 = vadd.f32 %v1504_v17, %v673_v8 }
 0x2c3   :  { %v693_v11 = vadd.f32 %v1506_v10, %v692_v2  ;;  %v710_v14 = vmul.f32 %v1508_v54, %v708_v16  ;;  %v1510_v18 = vpop.eup %1509  ;;  %vm715_vm12 = vweird.f32 %v1508_v54  ;;  %v720_v2 = vand.u32 2147483648, %v708_v16 }
 0x2c4   :  { %v678_v9 = vsel %vm677_vm8, %v1504_v17, %v674_v42  ;;  %v718_v42 = vand.u32 2147483647, %v708_v16  ;;  %vm716_vm14 = vmor %vm714_vm13, %vm715_vm12  ;;  %v2852_v16 = vld [vmem:[#allocation14_spill] sm:$0xff] }
 0x2c5   :  { %v683_v49 = vsel %vm680_vm10, %v682_v13, %v678_v9  ;;  %v697_v15 = vsel %vm696_vm9, %v1506_v10, %v693_v11  ;;  %v711_v59 = vsub.f32 1.0, %v710_v14  ;;  %v721_v17 = vor.u32 1.1754944e-38, %v720_v2  ;;  %v2854_v13 = vld [vmem:[#allocation16_spill] sm:$0xff]  ;;  %v2856_v14 = vld [vmem:[#allocation17_spill] sm:$0xff]  ;;  %v2858_v9 = vld [vmem:[#allocation19_spill] sm:$0xff] }
 0x2c6   :  { %v702_v20 = vsel %vm699_vm11, %v701_v19, %v697_v15  ;;  %v725_v61 = vmul.f32 %v1510_v18, %v683_v49  ;;  %vm719_vm15 = vcmp.eq.f32.partialorder %v718_v42, 8.507059e+37  ;;  %v2850_v49 = vld [vmem:[#allocation13_spill] sm:$0xff]  ;;  %v2855_v11 = vld [vmem:[#allocation32_spill] sm:$0xff]  ;;  %v2857_v19 = vld [vmem:[#allocation18_spill] sm:$0xff] }
 0x2c7   :  { %v724_v51 = vmul.f32 %v702_v20, %v2223_v12  ;;  %v712_v8 = vmul.f32 %v1508_v54, %v711_v59  ;;  %v2846_v12 = vld [vmem:[#allocation10_spill] sm:$0xff]  ;;  %v2849_v59 = vld [vmem:[#allocation12_spill] sm:$0xff]  ;;  %v2859_v18 = vld [vmem:[#allocation33_spill] sm:$0xff] }
 0x2c8   :  { %v2860_v15 = vld [vmem:[#allocation20_spill] sm:$0xff]  ;;  %v2861_v20 = vld [vmem:[#allocation21_spill] sm:$0xff]  ;;  %v2864_v2 = vld [vmem:[#allocation23_spill] sm:$0xff] }
 0x2c9   :  { %v2431_v5 = vadd.f32 %v725_v61, %v724_v51  ;;  %v713_v4 = vadd.f32 %v1508_v54, %v712_v8  ;;  %v2847_v51 = vld [vmem:[#allocation24_spill] sm:$0xff]  ;;  %v2848_v61 = vld [vmem:[#allocation11_spill] sm:$0xff]  ;;  %v2862_v8 = vld [vmem:[#allocation22_spill] sm:$0xff] }
 0x2ca   :  { %v2865_v42 = vld [vmem:[#allocation25_spill] sm:$0xff] }
 0x2cb   :  { %1511 = vtanh.f32 %v2431_v5  ;;  %v717_v3 = vsel %vm716_vm14, %v1508_v54, %v713_v4  ;;  %v2851_v54 = vld [vmem:[#allocation28_spill] sm:$0xff]  ;;  %v2863_v4 = vld [vmem:[#allocation34_spill] sm:$0xff] }
 0x2cc   :  { %v722_v10 = vsel %vm719_vm15, %v721_v17, %v717_v3  ;;  %v2866_v3 = vld [vmem:[#allocation26_spill] sm:$0xff]  ;;  %v2867_v17 = vld [vmem:[#allocation35_spill] sm:$0xff] }
 0x2d1   :  { %v1512_v1 = vpop.eup %1511 }
 0x2d2   :  { %v728_v7 = vmul.f32 %v1512_v1, %v722_v10  ;;  %v2868_v1 = vld [vmem:[#allocation27_spill] sm:$0xff]  ;;  %v2869_v10 = vld [vmem:[#allocation29_spill] sm:$0xff] }
 0x2d4   :  { %750 = vmatmul.f32.vlgmr.msra.gmra.mxu0 %v728_v7  ;;  %770 = vmatmul.f32.vlgmr.msra.gmra.mxu1 %v728_v7 }
 0x2d5   :  { %790 = vmatmul.f32.vlgmr.msra.gmra.mxu2 %v728_v7  ;;  %810 = vmatmul.f32.vlgmr.msra.gmra.mxu3 %v728_v7  ;;  %v2870_v7 = vld [vmem:[#allocation30_spill] sm:$0xff] }
 0x2d6   :  { %1038 = vmatpush.msra.mxu0 %v2226_v50  ;;  %1058 = vmatpush.msra.mxu1 %v2229_v21 }
 0x2d7   :  { %1078 = vmatpush.msra.mxu2 %v2232_v22  ;;  %1098 = vmatpush.msra.mxu3 %v2235_v23 }
 0x2d8   :  { %1039 = vmatpush.msra.mxu0 %v2238_v24  ;;  %1059 = vmatpush.msra.mxu1 %v2241_v25 }
 0x2d9   :  { %1079 = vmatpush.msra.mxu2 %v2244_v26  ;;  %1099 = vmatpush.msra.mxu3 %v2247_v27 }
 0x2da   :  { %1040 = vmatpush.msra.mxu0 %v2250_v28  ;;  %1060 = vmatpush.msra.mxu1 %v2253_v29 }
 0x2db   :  { %1080 = vmatpush.msra.mxu2 %v2256_v30  ;;  %1100 = vmatpush.msra.mxu3 %v2259_v31 }
 0x2dc   :  { %1041 = vmatpush.msra.mxu0 %v2262_v32  ;;  %1061 = vmatpush.msra.mxu1 %v2265_v33 }
 0x2dd   :  { %1081 = vmatpush.msra.mxu2 %v2268_v35  ;;  %1101 = vmatpush.msra.mxu3 %v2271_v39 }
 0x2de   :  { %1042 = vmatpush.msra.mxu0 %v2274_v43  ;;  %1062 = vmatpush.msra.mxu1 %v2277_v47 }
 0x2df   :  { %1082 = vmatpush.msra.mxu2 %v2280_v60  ;;  %1102 = vmatpush.msra.mxu3 %v2283_v63 }
 0x2e0   :  { %1043 = vmatpush.msra.mxu0 %v2286_v34  ;;  %1063 = vmatpush.msra.mxu1 %v2289_v36 }
 0x2e1   :  { %1083 = vmatpush.msra.mxu2 %v2292_v37  ;;  %1103 = vmatpush.msra.mxu3 %v2295_v40 }
 0x2e2   :  { %1044 = vmatpush.msra.mxu0 %v2298_v56  ;;  %1064 = vmatpush.msra.mxu1 %v2301_v44 }
 0x2e3   :  { %1084 = vmatpush.msra.mxu2 %v2304_v53  ;;  %1104 = vmatpush.msra.mxu3 %v2307_v46 }
 0x2e4   :  { %1045 = vmatpush.msra.mxu0 %v2310_v62  ;;  %1065 = vmatpush.msra.mxu1 %v2313_v45 }
 0x2e5   :  { %1085 = vmatpush.msra.mxu2 %v2316_v57  ;;  %1105 = vmatpush.msra.mxu3 %v2319_v0 }
 0x2e6   :  { %1046 = vmatpush.msra.mxu0 %v2322_v38  ;;  %1066 = vmatpush.msra.mxu1 %v2325_v55 }
 0x2e7   :  { %1086 = vmatpush.msra.mxu2 %v2328_v41  ;;  %1106 = vmatpush.msra.mxu3 %v2331_v58 }
 0x2e8   :  { %1047 = vmatpush.msra.mxu0 %v2334_v52  ;;  %1067 = vmatpush.msra.mxu1 %v2337_v48 }
 0x2e9   :  { %1087 = vmatpush.msra.mxu2 %v2846_v12  ;;  %1107 = vmatpush.msra.mxu3 %v2847_v51 }
 0x2ea   :  { %1048 = vmatpush.msra.mxu0 %v2848_v61  ;;  %1068 = vmatpush.msra.mxu1 %v2849_v59 }
 0x2eb   :  { %1088 = vmatpush.msra.mxu2 %v2850_v49  ;;  %1108 = vmatpush.msra.mxu3 %v2851_v54 }
 0x2ec   :  { %1049 = vmatpush.msra.mxu0 %v2852_v16  ;;  %1069 = vmatpush.msra.mxu1 %v2853_v6 }
 0x2ed   :  { %1089 = vmatpush.msra.mxu2 %v2854_v13  ;;  %1109 = vmatpush.msra.mxu3 %v2855_v11 }
 0x2ee   :  { %1050 = vmatpush.msra.mxu0 %v2856_v14  ;;  %1070 = vmatpush.msra.mxu1 %v2857_v19 }
 0x2ef   :  { %1090 = vmatpush.msra.mxu2 %v2858_v9  ;;  %1110 = vmatpush.msra.mxu3 %v2859_v18 }
 0x2f0   :  { %1051 = vmatpush.msra.mxu0 %v2860_v15  ;;  %1071 = vmatpush.msra.mxu1 %v2861_v20  ;;  %v2871_v15 = vld [vmem:[#allocation36_spill] sm:$0xff] }
 0x2f1   :  { %1091 = vmatpush.msra.mxu2 %v2862_v8  ;;  %1111 = vmatpush.msra.mxu3 %v2863_v4  ;;  %v1413_v4 = vld [vmem:[%s2629_s0 + $0x80] sm:$0xff] }
 0x2f2   :  { %1052 = vmatpush.msra.mxu0 %v2864_v2  ;;  %1072 = vmatpush.msra.mxu1 %v2865_v42  ;;  %v1414_v42 = vld [vmem:[%s2629_s0 + $0x88] sm:$0xff] }
 0x2f3   :  { %1092 = vmatpush.msra.mxu2 %v2866_v3  ;;  %1112 = vmatpush.msra.mxu3 %v2867_v17 }
 0x2f4   :  { %1053 = vmatpush.msra.mxu0 %v2868_v1  ;;  %1073 = vmatpush.msra.mxu1 %v2869_v10 }
 0x2f5   :  { %1093 = vmatpush.msra.mxu2 %v2870_v7  ;;  %1113 = vmatpush.msra.mxu3 %v2871_v15  ;;  %v1416_v7 = vld [vmem:[%s2629_s0 + $0x98] sm:$0xff] }
 0x351   :  { %v751_v2 = vpop.f32.mrf.mxu0  ;;  %v771_v3 = vpop.f32.mrf.mxu1 }
 0x352   :  { %v814_v8 = vadd.f32 %v1413_v4, %v751_v2  ;;  %v815_v17 = vadd.f32 %v1414_v42, %v771_v3 }
 0x354   :  { %v1417_v20 = vmul.f32 -1.442695, %v814_v8  ;;  %v1418_v1 = vmul.f32 -1.442695, %v815_v17  ;;  %v1415_v8 = vld [vmem:[%s2629_s0 + $0x90] sm:$0xff] }
 0x356   :  { %1513 = vpow2.f32 %v1417_v20 }
 0x357   :  { %1515 = vpow2.f32 %v1418_v1 }
 0x358   :  { %v811_v15 = vpop.f32.mrf.mxu3  ;;  %v791_v20 = vpop.f32.mrf.mxu2 }
 0x359   :  { %v817_v10 = vadd.f32 %v1416_v7, %v811_v15  ;;  %v816_v3 = vadd.f32 %v1415_v8, %v791_v20 }
 0x35b   :  { %v1419_v18 = vmul.f32 -1.442695, %v817_v10 }
 0x35c   :  { %v1514_v9 = vpop.eup %1513 }
 0x35d   :  { %v1516_v19 = vpop.eup %1515  ;;  %v821_v14 = vadd.f32 1.0, %v1514_v9  ;;  %1517 = vpow2.f32 %v1419_v18 }
 0x35e   :  { %v840_v11 = vadd.f32 1.0, %v1516_v19 }
 0x35f   :  { %1519 = vrcp.f32 %v821_v14  ;;  %v833_v9 = vand.u32 2147483648, %v821_v14  ;;  %v831_v13 = vand.u32 2147483647, %v821_v14  ;;  %vm827_vm2 = vweird.f32 %v821_v14 }
 0x360   :  { %1521 = vrcp.f32 %v840_v11  ;;  %v852_v19 = vand.u32 2147483648, %v840_v11  ;;  %v850_v16 = vand.u32 2147483647, %v840_v11  ;;  %vm846_vm3 = vweird.f32 %v840_v11 }
 0x361   :  { %v834_v8 = vor.u32 1.1754944e-38, %v833_v9  ;;  %vm832_vm6 = vcmp.eq.f32.partialorder %v831_v13, 8.507059e+37 }
 0x362   :  { %vm851_vm7 = vcmp.eq.f32.partialorder %v850_v16, 8.507059e+37 }
 0x363   :  { %v1518_v4 = vpop.eup %1517 }
 0x364   :  { %v860_v2 = vadd.f32 1.0, %v1518_v4 }
 0x365   :  { %v1520_v42 = vpop.eup %1519 }
 0x366   :  { %v1522_v17 = vpop.eup %1521  ;;  %v823_v1 = vmul.f32 %v1520_v42, %v821_v14  ;;  %1523 = vrcp.f32 %v860_v2  ;;  %vm828_vm0 = vweird.f32 %v1520_v42  ;;  %vm866_vm9 = vweird.f32 %v860_v2 }
 0x367   :  { %v842_v15 = vmul.f32 %v1522_v17, %v840_v11  ;;  %1525 = vtanh.f32 %v816_v3  ;;  %vm847_vm1 = vweird.f32 %v1522_v17  ;;  %vm829_vm4 = vmor %vm827_vm2, %vm828_vm0 }
 0x368   :  { %v824_v10 = vsub.f32 1.0, %v823_v1  ;;  %vm848_vm5 = vmor %vm846_vm3, %vm847_vm1  ;;  %v853_v1 = vor.u32 1.1754944e-38, %v852_v19 }
 0x369   :  { %v843_v7 = vsub.f32 1.0, %v842_v15 }
 0x36a   :  { %v825_v18 = vmul.f32 %v1520_v42, %v824_v10 }
 0x36b   :  { %v844_v6 = vmul.f32 %v1522_v17, %v843_v7 }
 0x36c   :  { %v1524_v54 = vpop.eup %1523  ;;  %v826_v49 = vadd.f32 %v1520_v42, %v825_v18 }
 0x36d   :  { %v845_v20 = vadd.f32 %v1522_v17, %v844_v6  ;;  %v862_v4 = vmul.f32 %v1524_v54, %v860_v2  ;;  %v1526_v3 = vpop.eup %1525  ;;  %vm867_vm8 = vweird.f32 %v1524_v54  ;;  %v872_v6 = vand.u32 2147483648, %v860_v2 }
 0x36e   :  { %v830_v15 = vsel %vm829_vm4, %v1520_v42, %v826_v49  ;;  %v870_v49 = vand.u32 2147483647, %v860_v2  ;;  %vm868_vm10 = vmor %vm866_vm9, %vm867_vm8 }
 0x36f   :  { %v835_v59 = vsel %vm832_vm6, %v834_v8, %v830_v15  ;;  %v849_v10 = vsel %vm848_vm5, %v1522_v17, %v845_v20  ;;  %v863_v61 = vsub.f32 1.0, %v862_v4  ;;  %v873_v42 = vor.u32 1.1754944e-38, %v872_v6 }
 0x370   :  { %v854_v7 = vsel %vm851_vm7, %v853_v1, %v849_v10  ;;  %v877_v51 = vmul.f32 %v1526_v3, %v835_v59  ;;  %vm871_vm11 = vcmp.eq.f32.partialorder %v870_v49, 8.507059e+37  ;;  %v1422_v59 = vld [vmem:[%s2629_s0 + $0xb0] sm:$0xff] }
 0x371   :  { %v876_v12 = vmul.f32 %v854_v7, %v2431_v5  ;;  %v864_v18 = vmul.f32 %v1524_v54, %v863_v61 }
 0x373   :  { %v2511_v14 = vadd.f32 %v877_v51, %v876_v12  ;;  %v865_v11 = vadd.f32 %v1524_v54, %v864_v18 }
 0x375   :  { %1527 = vtanh.f32 %v2511_v14  ;;  %v869_v13 = vsel %vm868_vm10, %v1524_v54, %v865_v11 }
 0x376   :  { %v874_v17 = vsel %vm871_vm11, %v873_v42, %v869_v13 }
 0x37b   :  { %v1528_v16 = vpop.eup %1527 }
 0x37c   :  { %v880_v9 = vmul.f32 %v1528_v16, %v874_v17 }
 0x37e   :  { %902 = vmatmul.f32.vlgmr.msrb.gmra.mxu0 %v880_v9  ;;  %922 = vmatmul.f32.vlgmr.msrb.gmra.mxu1 %v880_v9 }
 0x37f   :  { %942 = vmatmul.f32.vlgmr.msrb.gmra.mxu2 %v880_v9  ;;  %962 = vmatmul.f32.vlgmr.msrb.gmra.mxu3 %v880_v9 }
 0x380   :  { %1190 = vmatpush.msrb.mxu0 %v2226_v50  ;;  %1210 = vmatpush.msrb.mxu1 %v2229_v21  ;;  %v2872_v50 = vld [vmem:[#allocation10_spill] sm:$0xff]  ;;  %v2873_v21 = vld [vmem:[#allocation24_spill] sm:$0xff] }
 0x381   :  { %1230 = vmatpush.msrb.mxu2 %v2232_v22  ;;  %1250 = vmatpush.msrb.mxu3 %v2235_v23  ;;  %v2874_v22 = vld [vmem:[#allocation11_spill] sm:$0xff]  ;;  %v2875_v23 = vld [vmem:[#allocation12_spill] sm:$0xff] }
 0x382   :  { %1191 = vmatpush.msrb.mxu0 %v2238_v24  ;;  %1211 = vmatpush.msrb.mxu1 %v2241_v25  ;;  %v2876_v24 = vld [vmem:[#allocation13_spill] sm:$0xff]  ;;  %v2877_v25 = vld [vmem:[#allocation28_spill] sm:$0xff] }
 0x383   :  { %1231 = vmatpush.msrb.mxu2 %v2244_v26  ;;  %1251 = vmatpush.msrb.mxu3 %v2247_v27  ;;  %v2878_v26 = vld [vmem:[#allocation14_spill] sm:$0xff]  ;;  %v2879_v27 = vld [vmem:[#allocation15_spill] sm:$0xff] }
 0x384   :  { %1192 = vmatpush.msrb.mxu0 %v2250_v28  ;;  %1212 = vmatpush.msrb.mxu1 %v2253_v29  ;;  %v2880_v28 = vld [vmem:[#allocation16_spill] sm:$0xff] }
 0x385   :  { %1232 = vmatpush.msrb.mxu2 %v2256_v30  ;;  %1252 = vmatpush.msrb.mxu3 %v2259_v31  ;;  %v2881_v29 = vld [vmem:[#allocation32_spill] sm:$0xff]  ;;  %v2882_v30 = vld [vmem:[#allocation17_spill] sm:$0xff]  ;;  %v2883_v31 = vld [vmem:[#allocation18_spill] sm:$0xff] }
 0x386   :  { %1193 = vmatpush.msrb.mxu0 %v2262_v32  ;;  %1213 = vmatpush.msrb.mxu1 %v2265_v33  ;;  %v2884_v32 = vld [vmem:[#allocation19_spill] sm:$0xff]  ;;  %v2885_v33 = vld [vmem:[#allocation33_spill] sm:$0xff] }
 0x387   :  { %1233 = vmatpush.msrb.mxu2 %v2268_v35  ;;  %1253 = vmatpush.msrb.mxu3 %v2271_v39  ;;  %v2886_v35 = vld [vmem:[#allocation20_spill] sm:$0xff]  ;;  %v2887_v39 = vld [vmem:[#allocation21_spill] sm:$0xff] }
 0x388   :  { %1194 = vmatpush.msrb.mxu0 %v2274_v43  ;;  %1214 = vmatpush.msrb.mxu1 %v2277_v47  ;;  %v2888_v43 = vld [vmem:[#allocation22_spill] sm:$0xff] }
 0x389   :  { %1234 = vmatpush.msrb.mxu2 %v2280_v60  ;;  %1254 = vmatpush.msrb.mxu3 %v2283_v63  ;;  %v2889_v47 = vld [vmem:[#allocation34_spill] sm:$0xff]  ;;  %v2890_v60 = vld [vmem:[#allocation23_spill] sm:$0xff]  ;;  %v2891_v63 = vld [vmem:[#allocation25_spill] sm:$0xff] }
 0x38a   :  { %1195 = vmatpush.msrb.mxu0 %v2286_v34  ;;  %1215 = vmatpush.msrb.mxu1 %v2289_v36  ;;  %v2892_v34 = vld [vmem:[#allocation26_spill] sm:$0xff]  ;;  %v2893_v36 = vld [vmem:[#allocation35_spill] sm:$0xff] }
 0x38b   :  { %1235 = vmatpush.msrb.mxu2 %v2292_v37  ;;  %1255 = vmatpush.msrb.mxu3 %v2295_v40  ;;  %v2894_v37 = vld [vmem:[#allocation27_spill] sm:$0xff]  ;;  %v2895_v40 = vld [vmem:[#allocation29_spill] sm:$0xff] }
 0x38c   :  { %1196 = vmatpush.msrb.mxu0 %v2298_v56  ;;  %1216 = vmatpush.msrb.mxu1 %v2301_v44  ;;  %v2896_v56 = vld [vmem:[#allocation30_spill] sm:$0xff]  ;;  %v2897_v44 = vld [vmem:[#allocation36_spill] sm:$0xff] }
 0x38d   :  { %1236 = vmatpush.msrb.mxu2 %v2304_v53  ;;  %1256 = vmatpush.msrb.mxu3 %v2307_v46  ;;  %v1420_v53 = vld [vmem:[%s2629_s0 + $0xa0] sm:$0xff]  ;;  %v1421_v46 = vld [vmem:[%s2629_s0 + $0xa8] sm:$0xff] }
 0x38e   :  { %1197 = vmatpush.msrb.mxu0 %v2310_v62  ;;  %1217 = vmatpush.msrb.mxu1 %v2313_v45 }
 0x38f   :  { %1237 = vmatpush.msrb.mxu2 %v2316_v57  ;;  %1257 = vmatpush.msrb.mxu3 %v2319_v0 }
 0x390   :  { %1198 = vmatpush.msrb.mxu0 %v2322_v38  ;;  %1218 = vmatpush.msrb.mxu1 %v2325_v55 }
 0x391   :  { %1238 = vmatpush.msrb.mxu2 %v2328_v41  ;;  %1258 = vmatpush.msrb.mxu3 %v2331_v58  ;;  %v1423_v41 = vld [vmem:[%s2629_s0 + $0xb8] sm:$0xff] }
 0x392   :  { %1199 = vmatpush.msrb.mxu0 %v2334_v52  ;;  %1219 = vmatpush.msrb.mxu1 %v2337_v48 }
 0x393   :  { %1239 = vmatpush.msrb.mxu2 %v2872_v50  ;;  %1259 = vmatpush.msrb.mxu3 %v2873_v21 }
 0x394   :  { %1200 = vmatpush.msrb.mxu0 %v2874_v22  ;;  %1220 = vmatpush.msrb.mxu1 %v2875_v23 }
 0x395   :  { %1240 = vmatpush.msrb.mxu2 %v2876_v24  ;;  %1260 = vmatpush.msrb.mxu3 %v2877_v25 }
 0x396   :  { %1201 = vmatpush.msrb.mxu0 %v2878_v26  ;;  %1221 = vmatpush.msrb.mxu1 %v2879_v27 }
 0x397   :  { %1241 = vmatpush.msrb.mxu2 %v2880_v28  ;;  %1261 = vmatpush.msrb.mxu3 %v2881_v29 }
 0x398   :  { %1202 = vmatpush.msrb.mxu0 %v2882_v30  ;;  %1222 = vmatpush.msrb.mxu1 %v2883_v31 }
 0x399   :  { %1242 = vmatpush.msrb.mxu2 %v2884_v32  ;;  %1262 = vmatpush.msrb.mxu3 %v2885_v33 }
 0x39a   :  { %1203 = vmatpush.msrb.mxu0 %v2886_v35  ;;  %1223 = vmatpush.msrb.mxu1 %v2887_v39 }
 0x39b   :  { %1243 = vmatpush.msrb.mxu2 %v2888_v43  ;;  %1263 = vmatpush.msrb.mxu3 %v2889_v47 }
 0x39c   :  { %1204 = vmatpush.msrb.mxu0 %v2890_v60  ;;  %1224 = vmatpush.msrb.mxu1 %v2891_v63 }
 0x39d   :  { %1244 = vmatpush.msrb.mxu2 %v2892_v34  ;;  %1264 = vmatpush.msrb.mxu3 %v2893_v36  ;;  %v1428_v34 = vld [vmem:[%s2629_s0 + $0xc8] sm:$0xff] }
 0x39e   :  { %1205 = vmatpush.msrb.mxu0 %v2894_v37  ;;  %1225 = vmatpush.msrb.mxu1 %v2895_v40 }
 0x39f   :  { %1245 = vmatpush.msrb.mxu2 %v2896_v56  ;;  %1265 = vmatpush.msrb.mxu3 %v2897_v44 }
 0x3fb   :  { %v903_v62 = vpop.f32.mrf.mxu0  ;;  %v923_v45 = vpop.f32.mrf.mxu1 }
 0x3fc   :  { %v966_v57 = vadd.f32 %v1420_v53, %v903_v62  ;;  %v967_v0 = vadd.f32 %v1421_v46, %v923_v45  ;;  %v1430_v46 = vld [vmem:[%s2629_s0 + $0xd8] sm:$0xff] }
 0x3fe   :  { %v1424_v38 = vmul.f32 -1.442695, %v966_v57  ;;  %v1425_v55 = vmul.f32 -1.442695, %v967_v0 }
 0x400   :  { %1529 = vpow2.f32 %v1424_v38 }
 0x401   :  { %1531 = vpow2.f32 %v1425_v55 }
 0x402   :  { %v963_v58 = vpop.f32.mrf.mxu3  ;;  %v943_v54 = vpop.f32.mrf.mxu2 }
 0x403   :  { %v969_v52 = vadd.f32 %v1423_v41, %v963_v58  ;;  %v968_v20 = vadd.f32 %v1422_v59, %v943_v54  ;;  %v1429_v58 = vld [vmem:[%s2629_s0 + $0xd0] sm:$0xff] }
 0x405   :  { %v1426_v48 = vmul.f32 -1.442695, %v969_v52 }
 0x406   :  { %v1530_v5 = vpop.eup %1529 }
 0x407   :  { %v1532_v12 = vpop.eup %1531  ;;  %v973_v51 = vadd.f32 1.0, %v1530_v5  ;;  %1533 = vpow2.f32 %v1426_v48 }
 0x408   :  { %v992_v61 = vadd.f32 1.0, %v1532_v12 }
 0x409   :  { %1535 = vrcp.f32 %v973_v51  ;;  %v985_v7 = vand.u32 2147483648, %v973_v51  ;;  %v983_v6 = vand.u32 2147483647, %v973_v51  ;;  %vm979_vm14 = vweird.f32 %v973_v51 }
 0x40a   :  { %1537 = vrcp.f32 %v992_v61  ;;  %v1004_v18 = vand.u32 2147483648, %v992_v61  ;;  %v1002_v13 = vand.u32 2147483647, %v992_v61  ;;  %vm998_vm15 = vweird.f32 %v992_v61 }
 0x40b   :  { %v986_v17 = vor.u32 1.1754944e-38, %v985_v7  ;;  %vm984_vm2 = vcmp.eq.f32.partialorder %v983_v6, 8.507059e+37 }
 0x40c   :  { %v1005_v21 = vor.u32 1.1754944e-38, %v1004_v18  ;;  %vm1003_vm3 = vcmp.eq.f32.partialorder %v1002_v13, 8.507059e+37 }
 0x40d   :  { %v1534_v2 = vpop.eup %1533 }
 0x40e   :  { %v1012_v19 = vadd.f32 1.0, %v1534_v2 }
 0x40f   :  { %v1536_v8 = vpop.eup %1535 }
 0x410   :  { %v1538_v4 = vpop.eup %1537  ;;  %v975_v1 = vmul.f32 %v1536_v8, %v973_v51  ;;  %1539 = vrcp.f32 %v1012_v19  ;;  %vm980_vm12 = vweird.f32 %v1536_v8  ;;  %v1024_v33 = vand.u32 2147483648, %v1012_v19 }
 0x411   :  { %v994_v15 = vmul.f32 %v1538_v4, %v992_v61  ;;  %1541 = vtanh.f32 %v968_v20  ;;  %vm999_vm13 = vweird.f32 %v1538_v4  ;;  %vm981_vm0 = vmor %vm979_vm14, %vm980_vm12  ;;  %vm1018_vm5 = vweird.f32 %v1012_v19 }
 0x412   :  { %v976_v3 = vsub.f32 1.0, %v975_v1  ;;  %vm1000_vm1 = vmor %vm998_vm15, %vm999_vm13  ;;  %v1022_v35 = vand.u32 2147483647, %v1012_v19  ;;  %v1025_v43 = vor.u32 1.1754944e-38, %v1024_v33 }
 0x413   :  { %v995_v10 = vsub.f32 1.0, %v994_v15 }
 0x414   :  { %v977_v11 = vmul.f32 %v1536_v8, %v976_v3  ;;  %vm1023_vm7 = vcmp.eq.f32.partialorder %v1022_v35, 8.507059e+37  ;;  %v1356_v35 = vld [vmem:[#allocation6 + $0x70] sm:$0xff] }
 0x415   :  { %v996_v49 = vmul.f32 %v1538_v4, %v995_v10 }
 0x416   :  { %v1540_v42 = vpop.eup %1539  ;;  %v978_v16 = vadd.f32 %v1536_v8, %v977_v11 }
 0x417   :  { %v997_v9 = vadd.f32 %v1538_v4, %v996_v49  ;;  %v1014_v50 = vmul.f32 %v1540_v42, %v1012_v19  ;;  %v1542_v23 = vpop.eup %1541  ;;  %vm1019_vm4 = vweird.f32 %v1540_v42 }
 0x418   :  { %v982_v22 = vsel %vm981_vm0, %v1536_v8, %v978_v16  ;;  %vm1020_vm6 = vmor %vm1018_vm5, %vm1019_vm4 }
 0x419   :  { %v987_v24 = vsel %vm984_vm2, %v986_v17, %v982_v22  ;;  %v1001_v25 = vsel %vm1000_vm1, %v1538_v4, %v997_v9  ;;  %v1015_v26 = vsub.f32 1.0, %v1014_v50 }
 0x41a   :  { %v1006_v27 = vsel %vm1003_vm3, %v1005_v21, %v1001_v25  ;;  %v1029_v28 = vmul.f32 %v1542_v23, %v987_v24 }
 0x41b   :  { %v1028_v29 = vmul.f32 %v1006_v27, %v2511_v14  ;;  %v1016_v30 = vmul.f32 %v1540_v42, %v1015_v26  ;;  %v1427_v14 = vld [vmem:[%s2629_s0 + $0xc0] sm:$0xff] }
 0x41d   :  { %v2591_v31 = vadd.f32 %v1029_v28, %v1028_v29  ;;  %v1017_v32 = vadd.f32 %v1540_v42, %v1016_v30 }
 0x41f   :  { %1543 = vtanh.f32 %v2591_v31  ;;  %v1021_v39 = vsel %vm1020_vm6, %v1540_v42, %v1017_v32 }
 0x420   :  { %v1026_v60 = vsel %vm1023_vm7, %v1025_v43, %v1021_v39  ;;  %v1355_v39 = vld [vmem:[#allocation6 + $0x68] sm:$0xff]  ;;  %v1354_v43 = vld [vmem:[#allocation6 + $0x60] sm:$0xff] }
 0x425   :  { %v1544_v47 = vpop.eup %1543 }
 0x426   :  { %v1032_v63 = vmul.f32 %v1544_v47, %v1026_v60  ;;  %v1353_v47 = vld [vmem:[#allocation6 + $0x58] sm:$0xff]  ;;  %v1352_v60 = vld [vmem:[#allocation6 + $0x50] sm:$0xff] }
 0x428   :  { %1054 = vmatmul.f32.vlgmr.msra.gmra.mxu0 %v1032_v63  ;;  %1074 = vmatmul.f32.vlgmr.msra.gmra.mxu1 %v1032_v63 }
 0x429   :  { %1094 = vmatmul.f32.vlgmr.msra.gmra.mxu2 %v1032_v63  ;;  %1114 = vmatmul.f32.vlgmr.msra.gmra.mxu3 %v1032_v63  ;;  %v1351_v63 = vld [vmem:[#allocation6 + $0x48] sm:$0xff] }
 0x4a5   :  { %v1055_v36 = vpop.f32.mrf.mxu0  ;;  %v1075_v37 = vpop.f32.mrf.mxu1 }
 0x4a6   :  { %v1118_v40 = vadd.f32 %v1427_v14, %v1055_v36  ;;  %v1119_v56 = vadd.f32 %v1428_v34, %v1075_v37  ;;  %v1350_v14 = vld [vmem:[#allocation6 + $0x40] sm:$0xff]  ;;  %v1349_v34 = vld [vmem:[#allocation6 + $0x38] sm:$0xff]  ;;  %v1435_v37 = vld [vmem:[%s2629_s0 + $0xe8] sm:$0xff] }
 0x4a7   :  { %v1434_v36 = vld [vmem:[%s2629_s0 + $0xe0] sm:$0xff] }
 0x4a8   :  { %v1431_v44 = vmul.f32 -1.442695, %v1118_v40  ;;  %v1432_v53 = vmul.f32 -1.442695, %v1119_v56  ;;  %v1348_v40 = vld [vmem:[#allocation6 + $0x30] sm:$0xff] }
 0x4aa   :  { %1545 = vpow2.f32 %v1431_v44 }
 0x4ab   :  { %1547 = vpow2.f32 %v1432_v53 }
 0x4ac   :  { %v1115_v62 = vpop.f32.mrf.mxu3  ;;  %v1095_v52 = vpop.f32.mrf.mxu2 }
 0x4ad   :  { %v1121_v45 = vadd.f32 %v1430_v46, %v1115_v62  ;;  %v1120_v51 = vadd.f32 %v1429_v58, %v1095_v52  ;;  %v1347_v62 = vld [vmem:[#allocation6 + $0x28] sm:$0xff] }
 0x4ae   :  { %v1343_v52 = vld [vmem:[#allocation6 + $0x8] sm:$0xff] }
 0x4af   :  { %v1433_v57 = vmul.f32 -1.442695, %v1121_v45 }
 0x4b0   :  { %v1546_v0 = vpop.eup %1545 }
 0x4b1   :  { %v1548_v38 = vpop.eup %1547  ;;  %v1125_v55 = vadd.f32 1.0, %v1546_v0  ;;  %1549 = vpow2.f32 %v1433_v57  ;;  %v1346_v0 = vld [vmem:[#allocation6 + $0x20] sm:$0xff] }
 0x4b2   :  { %v1144_v41 = vadd.f32 1.0, %v1548_v38  ;;  %v1345_v38 = vld [vmem:[#allocation6 + $0x18] sm:$0xff] }
 0x4b3   :  { %1551 = vrcp.f32 %v1125_v55  ;;  %v1137_v8 = vand.u32 2147483648, %v1125_v55  ;;  %v1135_v1 = vand.u32 2147483647, %v1125_v55  ;;  %vm1131_vm10 = vweird.f32 %v1125_v55 }
 0x4b4   :  { %1553 = vrcp.f32 %v1144_v41  ;;  %v1156_v20 = vand.u32 2147483648, %v1144_v41  ;;  %v1154_v3 = vand.u32 2147483647, %v1144_v41  ;;  %vm1150_vm11 = vweird.f32 %v1144_v41 }
 0x4b5   :  { %v1138_v18 = vor.u32 1.1754944e-38, %v1137_v8  ;;  %vm1136_vm14 = vcmp.eq.f32.partialorder %v1135_v1, 8.507059e+37 }
 0x4b6   :  { %v1157_v49 = vor.u32 1.1754944e-38, %v1156_v20  ;;  %vm1155_vm15 = vcmp.eq.f32.partialorder %v1154_v3, 8.507059e+37 }
 0x4b7   :  { %v1550_v48 = vpop.eup %1549 }
 0x4b8   :  { %v1164_v5 = vadd.f32 1.0, %v1550_v48 }
 0x4b9   :  { %v1552_v12 = vpop.eup %1551 }
 0x4ba   :  { %v1554_v61 = vpop.eup %1553  ;;  %v1127_v59 = vmul.f32 %v1552_v12, %v1125_v55  ;;  %1555 = vrcp.f32 %v1164_v5  ;;  %vm1132_vm8 = vweird.f32 %v1552_v12  ;;  %v1176_v26 = vand.u32 2147483648, %v1164_v5  ;;  %v1437_v55 = vld [vmem:[%s2629_s0 + $0xf8] sm:$0xff] }
 0x4bb   :  { %v1146_v54 = vmul.f32 %v1554_v61, %v1144_v41  ;;  %1557 = vtanh.f32 %v1120_v51  ;;  %vm1151_vm9 = vweird.f32 %v1554_v61  ;;  %vm1133_vm12 = vmor %vm1131_vm10, %vm1132_vm8  ;;  %vm1170_vm1 = vweird.f32 %v1164_v5  ;;  %v1344_v41 = vld [vmem:[#allocation6 + $0x10] sm:$0xff] }
 0x4bc   :  { %v1128_v2 = vsub.f32 1.0, %v1127_v59  ;;  %vm1152_vm13 = vmor %vm1150_vm11, %vm1151_vm9  ;;  %v1174_v27 = vand.u32 2147483647, %v1164_v5  ;;  %v1177_v29 = vor.u32 1.1754944e-38, %v1176_v26 }
 0x4bd   :  { %v1147_v19 = vsub.f32 1.0, %v1146_v54 }
 0x4be   :  { %v1129_v4 = vmul.f32 %v1552_v12, %v1128_v2  ;;  %vm1175_vm3 = vcmp.eq.f32.partialorder %v1174_v27, 8.507059e+37  ;;  %v1436_v2 = vld [vmem:[%s2629_s0 + $0xf0] sm:$0xff] }
 0x4bf   :  { %v1148_v15 = vmul.f32 %v1554_v61, %v1147_v19 }
 0x4c0   :  { %v1556_v10 = vpop.eup %1555  ;;  %v1130_v7 = vadd.f32 %v1552_v12, %v1129_v4 }
 0x4c1   :  { %v1149_v11 = vadd.f32 %v1554_v61, %v1148_v15  ;;  %v1166_v6 = vmul.f32 %v1556_v10, %v1164_v5  ;;  %v1558_v42 = vpop.eup %1557  ;;  %vm1171_vm0 = vweird.f32 %v1556_v10  ;;  %v1342_v5 = vld [vmem:[#allocation6] sm:$0xff] }
 0x4c2   :  { %v1134_v13 = vsel %vm1133_vm12, %v1552_v12, %v1130_v7  ;;  %vm1172_vm2 = vmor %vm1170_vm1, %vm1171_vm0 }
 0x4c3   :  { %v1139_v16 = vsel %vm1136_vm14, %v1138_v18, %v1134_v13  ;;  %v1153_v17 = vsel %vm1152_vm13, %v1554_v61, %v1149_v11  ;;  %v1167_v9 = vsub.f32 1.0, %v1166_v6 }
 0x4c4   :  { %v1158_v50 = vsel %vm1155_vm15, %v1157_v49, %v1153_v17  ;;  %v1181_v21 = vmul.f32 %v1558_v42, %v1139_v16 }
 0x4c5   :  { %v1180_v22 = vmul.f32 %v1158_v50, %v2591_v31  ;;  %v1168_v23 = vmul.f32 %v1556_v10, %v1167_v9  ;;  %v1357_v31 = vld [vmem:[#allocation6 + $0x78] sm:$0xff] }
 0x4c6   :  { %1362 = vmatpush.msra.mxu0 %v1357_v31 }
 0x4c7   :  { %v2607_v24 = vadd.f32 %v1181_v21, %v1180_v22  ;;  %v1169_v25 = vadd.f32 %v1556_v10, %v1168_v23 }
 0x4c8   :  { %1363 = vmatpush.msra.mxu0 %v1356_v35 }
 0x4c9   :  { %1559 = vtanh.f32 %v2607_v24  ;;  %v1173_v28 = vsel %vm1172_vm2, %v1556_v10, %v1169_v25 }
 0x4ca   :  { %v1178_v32 = vsel %vm1175_vm3, %v1177_v29, %v1173_v28  ;;  %1364 = vmatpush.msra.mxu0 %v1355_v39 }
 0x4cc   :  { %1365 = vmatpush.msra.mxu0 %v1354_v43 }
 0x4ce   :  { %1366 = vmatpush.msra.mxu0 %v1353_v47 }
 0x4cf   :  { %v1560_v30 = vpop.eup %1559 }
 0x4d0   :  { %v1184_v33 = vmul.f32 %v1560_v30, %v1178_v32  ;;  %1367 = vmatpush.msra.mxu0 %v1352_v60 }
 0x4d2   :  { %1206 = vmatmul.f32.vlgmr.msrb.gmra.mxu0 %v1184_v33  ;;  %1226 = vmatmul.f32.vlgmr.msrb.gmra.mxu1 %v1184_v33 }
 0x4d3   :  { %1246 = vmatmul.f32.vlgmr.msrb.gmra.mxu2 %v1184_v33  ;;  %1266 = vmatmul.f32.vlgmr.msrb.gmra.mxu3 %v1184_v33 }
 0x4d4   :  { %1368 = vmatpush.msra.mxu0 %v1351_v63 }
 0x4d6   :  { %1369 = vmatpush.msra.mxu0 %v1350_v14 }
 0x4d8   :  { %1370 = vmatpush.msra.mxu0 %v1349_v34 }
 0x4da   :  { %1371 = vmatpush.msra.mxu0 %v1348_v40 }
 0x4dc   :  { %1372 = vmatpush.msra.mxu0 %v1347_v62 }
 0x4de   :  { %1373 = vmatpush.msra.mxu0 %v1346_v0 }
 0x4e0   :  { %1374 = vmatpush.msra.mxu0 %v1345_v38 }
 0x4e2   :  { %1375 = vmatpush.msra.mxu0 %v1344_v41 }
 0x4e4   :  { %1376 = vmatpush.msra.mxu0 %v1343_v52 }
 0x4e6   :  { %1377 = vmatpush.msra.mxu0 %v1342_v5 }
 0x54f   :  { %v1207_v56 = vpop.f32.mrf.mxu0  ;;  %v1227_v44 = vpop.f32.mrf.mxu1 }
 0x550   :  { %v1270_v53 = vadd.f32 %v1434_v36, %v1207_v56  ;;  %v1271_v46 = vadd.f32 %v1435_v37, %v1227_v44 }
 0x552   :  { %v1438_v45 = vmul.f32 -1.442695, %v1270_v53  ;;  %v1439_v57 = vmul.f32 -1.442695, %v1271_v46 }
 0x554   :  { %1561 = vpow2.f32 %v1438_v45 }
 0x555   :  { %1563 = vpow2.f32 %v1439_v57 }
 0x556   :  { %v1267_v58 = vpop.f32.mrf.mxu3  ;;  %v1247_v19 = vpop.f32.mrf.mxu2 }
 0x557   :  { %v1273_v48 = vadd.f32 %v1437_v55, %v1267_v58  ;;  %v1272_v1 = vadd.f32 %v1436_v2, %v1247_v19 }
 0x559   :  { %v1440_v12 = vmul.f32 -1.442695, %v1273_v48 }
 0x55a   :  { %v1562_v51 = vpop.eup %1561 }
 0x55b   :  { %v1564_v61 = vpop.eup %1563  ;;  %v1277_v59 = vadd.f32 1.0, %v1562_v51  ;;  %1565 = vpow2.f32 %v1440_v12 }
 0x55c   :  { %v1296_v54 = vadd.f32 1.0, %v1564_v61 }
 0x55d   :  { %1567 = vrcp.f32 %v1277_v59  ;;  %v1289_v11 = vand.u32 2147483648, %v1277_v59  ;;  %v1287_v13 = vand.u32 2147483647, %v1277_v59  ;;  %vm1283_vm6 = vweird.f32 %v1277_v59 }
 0x55e   :  { %1569 = vrcp.f32 %v1296_v54  ;;  %v1308_v6 = vand.u32 2147483648, %v1296_v54  ;;  %v1306_v16 = vand.u32 2147483647, %v1296_v54  ;;  %vm1302_vm7 = vweird.f32 %v1296_v54 }
 0x55f   :  { %v1290_v50 = vor.u32 1.1754944e-38, %v1289_v11  ;;  %vm1288_vm10 = vcmp.eq.f32.partialorder %v1287_v13, 8.507059e+37 }
 0x560   :  { %v1309_v23 = vor.u32 1.1754944e-38, %v1308_v6  ;;  %vm1307_vm11 = vcmp.eq.f32.partialorder %v1306_v16, 8.507059e+37 }
 0x561   :  { %v1566_v8 = vpop.eup %1565 }
 0x562   :  { %v1316_v20 = vadd.f32 1.0, %v1566_v8 }
 0x563   :  { %v1568_v4 = vpop.eup %1567 }
 0x564   :  { %v1570_v15 = vpop.eup %1569  ;;  %v1279_v3 = vmul.f32 %v1568_v4, %v1277_v59  ;;  %1571 = vrcp.f32 %v1316_v20  ;;  %vm1284_vm4 = vweird.f32 %v1568_v4  ;;  %v1328_v43 = vand.u32 2147483648, %v1316_v20 }
 0x565   :  { %v1298_v10 = vmul.f32 %v1570_v15, %v1296_v54  ;;  %1573 = vtanh.f32 %v1272_v1  ;;  %vm1303_vm5 = vweird.f32 %v1570_v15  ;;  %vm1285_vm8 = vmor %vm1283_vm6, %vm1284_vm4  ;;  %vm1322_vm13 = vweird.f32 %v1316_v20 }
 0x566   :  { %v1280_v7 = vsub.f32 1.0, %v1279_v3  ;;  %vm1304_vm9 = vmor %vm1302_vm7, %vm1303_vm5  ;;  %v1326_v47 = vand.u32 2147483647, %v1316_v20  ;;  %v1329_v63 = vor.u32 1.1754944e-38, %v1328_v43 }
 0x567   :  { %v1299_v18 = vsub.f32 1.0, %v1298_v10 }
 0x568   :  { %v1281_v49 = vmul.f32 %v1568_v4, %v1280_v7  ;;  %vm1327_vm15 = vcmp.eq.f32.partialorder %v1326_v47, 8.507059e+37 }
 0x569   :  { %v1300_v42 = vmul.f32 %v1570_v15, %v1299_v18 }
 0x56a   :  { %v1572_v17 = vpop.eup %1571  ;;  %v1282_v9 = vadd.f32 %v1568_v4, %v1281_v49 }
 0x56b   :  { %v1301_v21 = vadd.f32 %v1570_v15, %v1300_v42  ;;  %v1318_v22 = vmul.f32 %v1572_v17, %v1316_v20  ;;  %v1574_v26 = vpop.eup %1573  ;;  %vm1323_vm12 = vweird.f32 %v1572_v17 }
 0x56c   :  { %v1286_v25 = vsel %vm1285_vm8, %v1568_v4, %v1282_v9  ;;  %vm1324_vm14 = vmor %vm1322_vm13, %vm1323_vm12 }
 0x56d   :  { %v1291_v27 = vsel %vm1288_vm10, %v1290_v50, %v1286_v25  ;;  %v1305_v28 = vsel %vm1304_vm9, %v1570_v15, %v1301_v21  ;;  %v1319_v29 = vsub.f32 1.0, %v1318_v22 }
 0x56e   :  { %v1310_v30 = vsel %vm1307_vm11, %v1309_v23, %v1305_v28  ;;  %v1333_v32 = vmul.f32 %v1574_v26, %v1291_v27 }
 0x56f   :  { %v1332_v33 = vmul.f32 %v1310_v30, %v2607_v24  ;;  %v1320_v31 = vmul.f32 %v1572_v17, %v1319_v29  ;;  %v1448_v24 = vld [vmem:[%s2632_s3] ss:$0 sm:$0xff] }
 0x571   :  { %v1334_v35 = vadd.f32 %v1333_v32, %v1332_v33  ;;  %v1321_v39 = vadd.f32 %v1572_v17, %v1320_v31 }
 0x573   :  { %1575 = vtanh.f32 %v1334_v35  ;;  %v1325_v60 = vsel %vm1324_vm14, %v1572_v17, %v1321_v39 }
 0x574   :  { %v1330_v34 = vsel %vm1327_vm15, %v1329_v63, %v1325_v60 }
 0x579   :  { %v1576_v14 = vpop.eup %1575 }
 0x57a   :  { %v1336_v36 = vmul.f32 %v1576_v14, %v1330_v34 }
 0x57c   :  { %1378 = vmatmul.f32.vlgmr.msra.gmra.mxu0 %v1336_v36 }
 0x5f9   :  { %v1379_v37 = vpop.f32.mrf.mxu0 }
 0x5fa   :  { %v1380_v40 = vadd.f32 %v1448_v24, %v1379_v37 }
 0x5fc   :  { %1382 = vst [vmem:[%s2633_s4] sm:$0xff] %v1380_v40 }
 0x5fd   :  { %1387 = vsyncpa [#allocation5], 1 }
 0x5fe   :  { %1388 = vsyncpa [#allocation7], 1 }

</bundles_post_ra>
